<compile_context>
chip_gen: v6e
topology: v6e:2x2x1
jax: 0.10.0
libtpu: 0.0.40
codegen_flags: <defaults>
</compile_context>

<pallas_src>
import jax
import jax.numpy as jnp
import numpy as np
from jax import lax
from jax.experimental import pallas as pl
from jax.experimental.pallas import tpu as pltpu


# ----------------------- fused conv-tower kernel -----------------------

def _conv_tower_kernel(x_ref, w1_ref, b1_ref, w2_ref, b2_ref, o_ref,
                       xp1, r1, xp2, r2):
    """One batch sample per grid step; everything stays VMEM-resident.

    x_ref : (H, W, Cin)      one NHWC sample (batch dim squeezed by BlockSpec)
    w1_ref: (9, Cin, C2)     conv1 taps, row = ki*3 + kj
    w2_ref: (9, C2, C3)      conv2 taps
    o_ref : (H//4, W//4, C3) pooled conv2 features (NHWC order)
    xp1/xp2: zero-padded conv inputs, r1/r2: row-pooled intermediates.
    """
    H1, W1, C1 = x_ref.shape
    KH = KW = 3
    C2 = w1_ref.shape[-1]
    H2, W2 = H1 // 2, W1 // 2
    C3 = w2_ref.shape[-1]
    H3, W3 = H2 // 2, W2 // 2

    # ---------------- conv block 1: conv(3x3,s1,p1)+bias+ReLU+maxpool(2,2) ----
    xp1[...] = jnp.zeros_like(xp1)                     # zero-pad (pad=1) in VMEM
    xp1[1:H1 + 1, 1:W1 + 1, :] = x_ref[...]

    acc1 = jnp.zeros((H1 * W1, C2), jnp.float32)
    for ki in range(KH):                               # in-VMEM im2col: 9 shifted matmuls
        for kj in range(KW):
            xs = xp1[ki:ki + H1, kj:kj + W1, :]        # (H1, W1, C1)
            acc1 = acc1 + jnp.dot(xs.reshape(H1 * W1, C1),      # tile-aligned collapse
                                  w1_ref[ki * KW + kj],
                                  preferred_element_type=jnp.float32)
    z1 = jnp.maximum(acc1 + b1_ref[...], 0.0)          # (H1*W1, C2)

    # maxpool: row pairs via tile-aligned reshape + major-dim max ...
    z1 = z1.reshape(H2, 2, W1, C2)
    r1[...] = jnp.maximum(z1[:, 0], z1[:, 1])          # (H2, W1, C2)
    # ... column pairs via small windowed loads reduced over the window axis,
    # written straight into the zero-padded conv2 input (pool+pad fused).
    xp2[...] = jnp.zeros_like(xp2)
    for wo in range(W2):
        m = jnp.max(r1[:, 2 * wo:2 * wo + 2, :], axis=1)        # (H2, C2)
        xp2[1:H2 + 1, 1 + wo, :] = m

    # ---------------- conv block 2 -------------------------------------------
    acc2 = jnp.zeros((H2 * W2, C3), jnp.float32)
    for ki in range(KH):
        for kj in range(KW):
            xs = xp2[ki:ki + H2, kj:kj + W2, :]        # (H2, W2, C2)
            acc2 = acc2 + jnp.dot(xs.reshape(H2 * W2, C2),
                                  w2_ref[ki * KW + kj],
                                  preferred_element_type=jnp.float32)
    z2 = jnp.maximum(acc2 + b2_ref[...], 0.0)          # (H2*W2, C3)

    z2 = z2.reshape(H3, 2, W2, C3)
    r2[...] = jnp.maximum(z2[:, 0], z2[:, 1])          # (H3, W2, C3)
    for wo in range(W3):
        m = jnp.max(r2[:, 2 * wo:2 * wo + 2, :], axis=1)        # (H3, C3)
        o_ref[:, wo, :] = m


# ----------------------- fused FC kernel -----------------------

def _fc_kernel(x_ref, w1_ref, b1_ref, w2_ref, b2_ref, o_ref):
    """Linear(256->32)+ReLU followed by Linear(32->10); (B, 32) stays in vregs."""
    h = jnp.maximum(
        jnp.dot(x_ref[...], w1_ref[...], preferred_element_type=jnp.float32)
        + b1_ref[...], 0.0)
    o_ref[...] = (jnp.dot(h, w2_ref[...], preferred_element_type=jnp.float32)
                  + b2_ref[...]).astype(o_ref.dtype)


# ----------------------- forward pass -----------------------

def convnet_forward(x_nchw, kp):
    """Forward pass matching PyTorch ConvNet: NCHW input -> (N, 10) logits."""
    N, C_in, H, W = x_nchw.shape
    x = jnp.transpose(x_nchw, (0, 2, 3, 1))            # NCHW -> NHWC (boundary glue only)

    C2 = kp["w1"].shape[-1]
    C3 = kp["w2"].shape[-1]
    H3, W3 = H // 4, W // 4

    conv_cost = pl.CostEstimate(
        flops=N * (2 * H * W * 9 * C_in * C2
                   + 2 * (H // 2) * (W // 2) * 9 * C2 * C3),
        transcendentals=0,
        bytes_accessed=4 * (x.size + kp["w1"].size + kp["b1"].size
                            + kp["w2"].size + kp["b2"].size + N * H3 * W3 * C3),
    )
    feats = pl.pallas_call(
        _conv_tower_kernel,
        out_shape=jax.ShapeDtypeStruct((N, H3, W3, C3), jnp.float32),
        grid=(N,),
        in_specs=[
            pl.BlockSpec((None, H, W, C_in), lambda n: (n, 0, 0, 0)),
            pl.BlockSpec((9, C_in, C2), lambda n: (0, 0, 0)),
            pl.BlockSpec((1, C2), lambda n: (0, 0)),
            pl.BlockSpec((9, C2, C3), lambda n: (0, 0, 0)),
            pl.BlockSpec((1, C3), lambda n: (0, 0)),
        ],
        out_specs=pl.BlockSpec((None, H3, W3, C3), lambda n: (n, 0, 0, 0)),
        scratch_shapes=[
            pltpu.VMEM((H + 2, W + 2, C_in), jnp.float32),        # padded conv1 input
            pltpu.VMEM((H // 2, W, C2), jnp.float32),             # row-pooled conv1
            pltpu.VMEM((H // 2 + 2, W // 2 + 2, C2), jnp.float32),  # padded conv2 input
            pltpu.VMEM((H3, W // 2, C3), jnp.float32),            # row-pooled conv2
        ],
        compiler_params=pltpu.CompilerParams(dimension_semantics=("parallel",)),
        cost_estimate=conv_cost,
    )(x, kp["w1"], kp["b1"], kp["w2"], kp["b2"])

    # PyTorch Flatten()'s NCHW ordering is folded into kp["wf1"]'s rows, so the
    # NHWC features only need a free reshape here (no runtime transpose).
    xf = feats.reshape(N, H3 * W3 * C3)

    D0 = xf.shape[1]
    D1 = kp["wf1"].shape[1]
    D2 = kp["wf2"].shape[1]
    fc_cost = pl.CostEstimate(
        flops=2 * N * D0 * D1 + 2 * N * D1 * D2,
        transcendentals=0,
        bytes_accessed=4 * (xf.size + D0 * D1 + D1 + D1 * D2 + D2 + N * D2),
    )
    out = pl.pallas_call(
        _fc_kernel,
        out_shape=jax.ShapeDtypeStruct((N, D2), jnp.float32),
        grid=(1,),
        in_specs=[
            pl.BlockSpec((N, D0), lambda i: (0, 0)),
            pl.BlockSpec((D0, D1), lambda i: (0, 0)),
            pl.BlockSpec((1, D1), lambda i: (0, 0)),
            pl.BlockSpec((D1, D2), lambda i: (0, 0)),
            pl.BlockSpec((1, D2), lambda i: (0, 0)),
        ],
        out_specs=pl.BlockSpec((N, D2), lambda i: (0, 0)),
        compiler_params=pltpu.CompilerParams(dimension_semantics=("arbitrary",)),
        cost_estimate=fc_cost,
    )(xf, kp["wf1"], kp["bf1"], kp["wf2"], kp["bf2"])
    return out


# ----------------------- parameter prep (offline, outside jit) -----------------------

def prepare_params(params, input_hw=(16, 16)):
    """Reshape weights into kernel-friendly layouts and fold the NCHW Flatten
    ordering of PyTorch into FC1's rows (zero runtime cost, exact parity)."""
    (w1, b1), (w2, b2) = params["conv"]
    (wf1, bf1), (wf2, bf2) = params["fc"]
    c1, c2 = w1.shape[2], w1.shape[3]
    c3 = w2.shape[3]
    h3, w3 = input_hw[0] // 4, input_hw[1] // 4
    return {
        "w1": w1.reshape(9, c1, c2),
        "b1": b1.reshape(1, c2),
        "w2": w2.reshape(9, c2, c3),
        "b2": b2.reshape(1, c3),
        # row (c*h3 + h)*w3 + w  ->  row (h*w3 + w)*c3 + c
        "wf1": wf1.reshape(c3, h3, w3, -1).transpose(1, 2, 0, 3).reshape(c3 * h3 * w3, -1),
        "bf1": bf1.reshape(1, -1),
        "wf2": wf2,
        "bf2": bf2.reshape(1, -1),
    }


# ----------------------- pure-JAX reference -----------------------

def reference_forward(x_nchw, params):
    x = jnp.transpose(x_nchw, (0, 2, 3, 1))
    for (w, b) in params["conv"]:
        x = lax.conv_general_dilated(
            x, w, window_strides=(1, 1), padding=[(1, 1), (1, 1)],
            dimension_numbers=("NHWC", "HWIO", "NHWC")) + b
        x = jnp.maximum(x, 0.0)
        N, H, W, C = x.shape
        x = x.reshape(N, H // 2, 2, W // 2, 2, C).max(axis=(2, 4))
    x = jnp.transpose(x, (0, 3, 1, 2)).reshape(x.shape[0], -1)   # PyTorch NCHW flatten
    n_fc = len(params["fc"])
    for idx, (w, b) in enumerate(params["fc"]):
        x = x @ w + b
        if idx < n_fc - 1:
            x = jnp.maximum(x, 0.0)
    return x


def init_params(key):
    ks = jax.random.split(key, 8)
    params = {"conv": [], "fc": []}
    # conv1: 4->8 3x3, conv2: 8->16 3x3   (HWIO layout)
    params["conv"].append((0.1 * jax.random.normal(ks[0], (3, 3, 4, 8), jnp.float32),
                           0.1 * jax.random.normal(ks[1], (8,), jnp.float32)))
    params["conv"].append((0.1 * jax.random.normal(ks[2], (3, 3, 8, 16), jnp.float32),
                           0.1 * jax.random.normal(ks[3], (16,), jnp.float32)))
    # fc1: 256->32 (+ReLU), fc2: 32->10
    params["fc"].append((0.1 * jax.random.normal(ks[4], (256, 32), jnp.float32),
                         0.1 * jax.random.normal(ks[5], (32,), jnp.float32)))
    params["fc"].append((0.1 * jax.random.normal(ks[6], (32, 10), jnp.float32),
                         0.1 * jax.random.normal(ks[7], (10,), jnp.float32)))
    return params


if __name__ == "__main__":
    key = jax.random.PRNGKey(0)
    k_x, k_p = jax.random.split(key)
    x = jax.random.normal(k_x, (2, 4, 16, 16), jnp.float32)      # NCHW like PyTorch
    params = init_params(k_p)
    kparams = prepare_params(params, input_hw=(16, 16))

    out = jax.jit(convnet_forward)(x, kparams)
    out = jax.block_until_ready(out)
    assert out.shape == (2, 10), out.shape

    ref = reference_forward(x, params)
    np.testing.assert_allclose(np.asarray(out), np.asarray(ref), rtol=1e-2, atol=1e-2)

    print("KERNEL_OK")
</pallas_src>

<mosaic_0001>
module attributes {stable_mosaic.version = 11 : i64} {
  func.func @_conv_tower_kernel(%arg0: i32, %arg1: memref<1x16x16x4xf32, #tpu.memory_space<vmem>>, %arg2: memref<9x4x8xf32, #tpu.memory_space<vmem>>, %arg3: memref<1x8xf32, #tpu.memory_space<vmem>>, %arg4: memref<9x8x16xf32, #tpu.memory_space<vmem>>, %arg5: memref<1x16xf32, #tpu.memory_space<vmem>>, %arg6: memref<1x4x4x16xf32, #tpu.memory_space<vmem>>, %arg7: memref<18x18x4xf32, #tpu.memory_space<vmem>>, %arg8: memref<8x16x8xf32, #tpu.memory_space<vmem>>, %arg9: memref<10x10x8xf32, #tpu.memory_space<vmem>>, %arg10: memref<4x8x16xf32, #tpu.memory_space<vmem>>) attributes {dimension_semantics = [#tpu.dimension_semantics<parallel>], iteration_bounds = array<i64: 2>, scalar_prefetch = 0 : i64, scratch_operands = 4 : i64, tpu.core_type = #tpu.core_type<tc>, window_params = [{transform_indices = @transform_0, window_bounds = array<i64: 1, 16, 16, 4>}, {pipeline_mode = #tpu.pipeline_mode<synchronous>, transform_indices = @transform_1, window_bounds = array<i64: 9, 4, 8>}, {pipeline_mode = #tpu.pipeline_mode<synchronous>, transform_indices = @transform_2, window_bounds = array<i64: 1, 8>}, {pipeline_mode = #tpu.pipeline_mode<synchronous>, transform_indices = @transform_3, window_bounds = array<i64: 9, 8, 16>}, {pipeline_mode = #tpu.pipeline_mode<synchronous>, transform_indices = @transform_4, window_bounds = array<i64: 1, 16>}, {transform_indices = @transform_5, window_bounds = array<i64: 1, 4, 4, 16>}]} {
    %cst = arith.constant 0.000000e+00 : f32
    %0 = vector.broadcast %cst : f32 to vector<18x18x4xf32>
    %c0 = arith.constant 0 : index
    %c0_0 = arith.constant 0 : index
    %c0_1 = arith.constant 0 : index
    %1 = vector.load %arg7[%c0, %c0_0, %c0_1] : memref<18x18x4xf32, #tpu.memory_space<vmem>>, vector<18x18x4xf32>
    tpu.vector_store %arg7[%c0, %c0_0, %c0_1], %0 {strides = array<i32>} : memref<18x18x4xf32, #tpu.memory_space<vmem>>, vector<18x18x4xf32>,
    %c0_2 = arith.constant 0 : index
    %c0_3 = arith.constant 0 : index
    %c0_4 = arith.constant 0 : index
    %c0_5 = arith.constant 0 : index
    %2 = vector.load %arg1[%c0_2, %c0_3, %c0_4, %c0_5] : memref<1x16x16x4xf32, #tpu.memory_space<vmem>>, vector<1x16x16x4xf32>
    %3 = vector.shape_cast %2 : vector<1x16x16x4xf32> to vector<16x16x4xf32>
    %c1 = arith.constant 1 : index
    %c1_6 = arith.constant 1 : index
    %c0_7 = arith.constant 0 : index
    %4 = vector.load %arg7[%c1, %c1_6, %c0_7] : memref<18x18x4xf32, #tpu.memory_space<vmem>>, vector<16x16x4xf32>
    tpu.vector_store %arg7[%c1, %c1_6, %c0_7], %3 {strides = array<i32>} : memref<18x18x4xf32, #tpu.memory_space<vmem>>, vector<16x16x4xf32>,
    %cst_8 = arith.constant 0.000000e+00 : f32
    %5 = vector.broadcast %cst_8 : f32 to vector<256x8xf32>
    %c0_9 = arith.constant 0 : index
    %c0_10 = arith.constant 0 : index
    %c0_11 = arith.constant 0 : index
    %6 = vector.load %arg7[%c0_9, %c0_10, %c0_11] : memref<18x18x4xf32, #tpu.memory_space<vmem>>, vector<16x16x4xf32>
    %7 = vector.shape_cast %6 : vector<16x16x4xf32> to vector<256x4xf32>
    %c0_12 = arith.constant 0 : index
    %c0_13 = arith.constant 0 : index
    %c0_14 = arith.constant 0 : index
    %8 = vector.load %arg2[%c0_12, %c0_13, %c0_14] : memref<9x4x8xf32, #tpu.memory_space<vmem>>, vector<1x4x8xf32>
    %9 = vector.shape_cast %8 : vector<1x4x8xf32> to vector<4x8xf32>
    %cst_15 = arith.constant dense<0.000000e+00> : vector<256x8xf32>
    %10 = tpu.matmul %7, %9, %cst_15 {dimension_numbers = #tpu.dot_dimension_numbers<[1], [0], [0], [1], [0, 0, 1, 1], [], []>} : vector<256x4xf32>, vector<4x8xf32>, vector<256x8xf32> -> vector<256x8xf32>
    %11 = arith.addf %5, %10 : vector<256x8xf32>
    %c0_16 = arith.constant 0 : index
    %c1_17 = arith.constant 1 : index
    %c0_18 = arith.constant 0 : index
    %12 = vector.load %arg7[%c0_16, %c1_17, %c0_18] : memref<18x18x4xf32, #tpu.memory_space<vmem>>, vector<16x16x4xf32>
    %13 = vector.shape_cast %12 : vector<16x16x4xf32> to vector<256x4xf32>
    %c1_19 = arith.constant 1 : index
    %c0_20 = arith.constant 0 : index
    %c0_21 = arith.constant 0 : index
    %14 = vector.load %arg2[%c1_19, %c0_20, %c0_21] : memref<9x4x8xf32, #tpu.memory_space<vmem>>, vector<1x4x8xf32>
    %15 = vector.shape_cast %14 : vector<1x4x8xf32> to vector<4x8xf32>
    %cst_22 = arith.constant dense<0.000000e+00> : vector<256x8xf32>
    %16 = tpu.matmul %13, %15, %cst_22 {dimension_numbers = #tpu.dot_dimension_numbers<[1], [0], [0], [1], [0, 0, 1, 1], [], []>} : vector<256x4xf32>, vector<4x8xf32>, vector<256x8xf32> -> vector<256x8xf32>
    %17 = arith.addf %11, %16 : vector<256x8xf32>
    %c0_23 = arith.constant 0 : index
    %c2 = arith.constant 2 : index
    %c0_24 = arith.constant 0 : index
    %18 = vector.load %arg7[%c0_23, %c2, %c0_24] : memref<18x18x4xf32, #tpu.memory_space<vmem>>, vector<16x16x4xf32>
    %19 = vector.shape_cast %18 : vector<16x16x4xf32> to vector<256x4xf32>
    %c2_25 = arith.constant 2 : index
    %c0_26 = arith.constant 0 : index
    %c0_27 = arith.constant 0 : index
    %20 = vector.load %arg2[%c2_25, %c0_26, %c0_27] : memref<9x4x8xf32, #tpu.memory_space<vmem>>, vector<1x4x8xf32>
    %21 = vector.shape_cast %20 : vector<1x4x8xf32> to vector<4x8xf32>
    %cst_28 = arith.constant dense<0.000000e+00> : vector<256x8xf32>
    %22 = tpu.matmul %19, %21, %cst_28 {dimension_numbers = #tpu.dot_dimension_numbers<[1], [0], [0], [1], [0, 0, 1, 1], [], []>} : vector<256x4xf32>, vector<4x8xf32>, vector<256x8xf32> -> vector<256x8xf32>
    %23 = arith.addf %17, %22 : vector<256x8xf32>
    %c1_29 = arith.constant 1 : index
    %c0_30 = arith.constant 0 : index
    %c0_31 = arith.constant 0 : index
    %24 = vector.load %arg7[%c1_29, %c0_30, %c0_31] : memref<18x18x4xf32, #tpu.memory_space<vmem>>, vector<16x16x4xf32>
    %25 = vector.shape_cast %24 : vector<16x16x4xf32> to vector<256x4xf32>
    %c3 = arith.constant 3 : index
    %c0_32 = arith.constant 0 : index
    %c0_33 = arith.constant 0 : index
    %26 = vector.load %arg2[%c3, %c0_32, %c0_33] : memref<9x4x8xf32, #tpu.memory_space<vmem>>, vector<1x4x8xf32>
    %27 = vector.shape_cast %26 : vector<1x4x8xf32> to vector<4x8xf32>
    %cst_34 = arith.constant dense<0.000000e+00> : vector<256x8xf32>
    %28 = tpu.matmul %25, %27, %cst_34 {dimension_numbers = #tpu.dot_dimension_numbers<[1], [0], [0], [1], [0, 0, 1, 1], [], []>} : vector<256x4xf32>, vector<4x8xf32>, vector<256x8xf32> -> vector<256x8xf32>
    %29 = arith.addf %23, %28 : vector<256x8xf32>
    %c1_35 = arith.constant 1 : index
    %c1_36 = arith.constant 1 : index
    %c0_37 = arith.constant 0 : index
    %30 = vector.load %arg7[%c1_35, %c1_36, %c0_37] : memref<18x18x4xf32, #tpu.memory_space<vmem>>, vector<16x16x4xf32>
    %31 = vector.shape_cast %30 : vector<16x16x4xf32> to vector<256x4xf32>
    %c4 = arith.constant 4 : index
    %c0_38 = arith.constant 0 : index
    %c0_39 = arith.constant 0 : index
    %32 = vector.load %arg2[%c4, %c0_38, %c0_39] : memref<9x4x8xf32, #tpu.memory_space<vmem>>, vector<1x4x8xf32>
    %33 = vector.shape_cast %32 : vector<1x4x8xf32> to vector<4x8xf32>
    %cst_40 = arith.constant dense<0.000000e+00> : vector<256x8xf32>
    %34 = tpu.matmul %31, %33, %cst_40 {dimension_numbers = #tpu.dot_dimension_numbers<[1], [0], [0], [1], [0, 0, 1, 1], [], []>} : vector<256x4xf32>, vector<4x8xf32>, vector<256x8xf32> -> vector<256x8xf32>
    %35 = arith.addf %29, %34 : vector<256x8xf32>
    %c1_41 = arith.constant 1 : index
    %c2_42 = arith.constant 2 : index
    %c0_43 = arith.constant 0 : index
    %36 = vector.load %arg7[%c1_41, %c2_42, %c0_43] : memref<18x18x4xf32, #tpu.memory_space<vmem>>, vector<16x16x4xf32>
    %37 = vector.shape_cast %36 : vector<16x16x4xf32> to vector<256x4xf32>
    %c5 = arith.constant 5 : index
    %c0_44 = arith.constant 0 : index
    %c0_45 = arith.constant 0 : index
    %38 = vector.load %arg2[%c5, %c0_44, %c0_45] : memref<9x4x8xf32, #tpu.memory_space<vmem>>, vector<1x4x8xf32>
    %39 = vector.shape_cast %38 : vector<1x4x8xf32> to vector<4x8xf32>
    %cst_46 = arith.constant dense<0.000000e+00> : vector<256x8xf32>
    %40 = tpu.matmul %37, %39, %cst_46 {dimension_numbers = #tpu.dot_dimension_numbers<[1], [0], [0], [1], [0, 0, 1, 1], [], []>} : vector<256x4xf32>, vector<4x8xf32>, vector<256x8xf32> -> vector<256x8xf32>
    %41 = arith.addf %35, %40 : vector<256x8xf32>
    %c2_47 = arith.constant 2 : index
    %c0_48 = arith.constant 0 : index
    %c0_49 = arith.constant 0 : index
    %42 = vector.load %arg7[%c2_47, %c0_48, %c0_49] : memref<18x18x4xf32, #tpu.memory_space<vmem>>, vector<16x16x4xf32>
    %43 = vector.shape_cast %42 : vector<16x16x4xf32> to vector<256x4xf32>
    %c6 = arith.constant 6 : index
    %c0_50 = arith.constant 0 : index
    %c0_51 = arith.constant 0 : index
    %44 = vector.load %arg2[%c6, %c0_50, %c0_51] : memref<9x4x8xf32, #tpu.memory_space<vmem>>, vector<1x4x8xf32>
    %45 = vector.shape_cast %44 : vector<1x4x8xf32> to vector<4x8xf32>
    %cst_52 = arith.constant dense<0.000000e+00> : vector<256x8xf32>
    %46 = tpu.matmul %43, %45, %cst_52 {dimension_numbers = #tpu.dot_dimension_numbers<[1], [0], [0], [1], [0, 0, 1, 1], [], []>} : vector<256x4xf32>, vector<4x8xf32>, vector<256x8xf32> -> vector<256x8xf32>
    %47 = arith.addf %41, %46 : vector<256x8xf32>
    %c2_53 = arith.constant 2 : index
    %c1_54 = arith.constant 1 : index
    %c0_55 = arith.constant 0 : index
    %48 = vector.load %arg7[%c2_53, %c1_54, %c0_55] : memref<18x18x4xf32, #tpu.memory_space<vmem>>, vector<16x16x4xf32>
    %49 = vector.shape_cast %48 : vector<16x16x4xf32> to vector<256x4xf32>
    %c7 = arith.constant 7 : index
    %c0_56 = arith.constant 0 : index
    %c0_57 = arith.constant 0 : index
    %50 = vector.load %arg2[%c7, %c0_56, %c0_57] : memref<9x4x8xf32, #tpu.memory_space<vmem>>, vector<1x4x8xf32>
    %51 = vector.shape_cast %50 : vector<1x4x8xf32> to vector<4x8xf32>
    %cst_58 = arith.constant dense<0.000000e+00> : vector<256x8xf32>
    %52 = tpu.matmul %49, %51, %cst_58 {dimension_numbers = #tpu.dot_dimension_numbers<[1], [0], [0], [1], [0, 0, 1, 1], [], []>} : vector<256x4xf32>, vector<4x8xf32>, vector<256x8xf32> -> vector<256x8xf32>
    %53 = arith.addf %47, %52 : vector<256x8xf32>
    %c2_59 = arith.constant 2 : index
    %c2_60 = arith.constant 2 : index
    %c0_61 = arith.constant 0 : index
    %54 = vector.load %arg7[%c2_59, %c2_60, %c0_61] : memref<18x18x4xf32, #tpu.memory_space<vmem>>, vector<16x16x4xf32>
    %55 = vector.shape_cast %54 : vector<16x16x4xf32> to vector<256x4xf32>
    %c8 = arith.constant 8 : index
    %c0_62 = arith.constant 0 : index
    %c0_63 = arith.constant 0 : index
    %56 = vector.load %arg2[%c8, %c0_62, %c0_63] : memref<9x4x8xf32, #tpu.memory_space<vmem>>, vector<1x4x8xf32>
    %57 = vector.shape_cast %56 : vector<1x4x8xf32> to vector<4x8xf32>
    %cst_64 = arith.constant dense<0.000000e+00> : vector<256x8xf32>
    %58 = tpu.matmul %55, %57, %cst_64 {dimension_numbers = #tpu.dot_dimension_numbers<[1], [0], [0], [1], [0, 0, 1, 1], [], []>} : vector<256x4xf32>, vector<4x8xf32>, vector<256x8xf32> -> vector<256x8xf32>
    %59 = arith.addf %53, %58 : vector<256x8xf32>
    %c0_65 = arith.constant 0 : index
    %c0_66 = arith.constant 0 : index
    %60 = vector.load %arg3[%c0_65, %c0_66] : memref<1x8xf32, #tpu.memory_space<vmem>>, vector<1x8xf32>
    %61 = vector.broadcast %60 : vector<1x8xf32> to vector<256x8xf32>
    %62 = arith.addf %59, %61 : vector<256x8xf32>
    %cst_67 = arith.constant 0.000000e+00 : f32
    %63 = vector.broadcast %cst_67 : f32 to vector<256x8xf32>
    %64 = arith.maximumf %62, %63 : vector<256x8xf32>
    %65 = vector.shape_cast %64 : vector<256x8xf32> to vector<8x2x16x8xf32>
    %66 = vector.extract_strided_slice %65 {offsets = [0, 0, 0, 0], sizes = [8, 1, 16, 8], strides = [1, 1, 1, 1]} : vector<8x2x16x8xf32> to vector<8x1x16x8xf32>
    %67 = vector.shape_cast %66 : vector<8x1x16x8xf32> to vector<8x16x8xf32>
    %68 = vector.extract_strided_slice %65 {offsets = [0, 1, 0, 0], sizes = [8, 1, 16, 8], strides = [1, 1, 1, 1]} : vector<8x2x16x8xf32> to vector<8x1x16x8xf32>
    %69 = vector.shape_cast %68 : vector<8x1x16x8xf32> to vector<8x16x8xf32>
    %70 = arith.maximumf %67, %69 : vector<8x16x8xf32>
    %c0_68 = arith.constant 0 : index
    %c0_69 = arith.constant 0 : index
    %c0_70 = arith.constant 0 : index
    %71 = vector.load %arg8[%c0_68, %c0_69, %c0_70] : memref<8x16x8xf32, #tpu.memory_space<vmem>>, vector<8x16x8xf32>
    tpu.vector_store %arg8[%c0_68, %c0_69, %c0_70], %70 {strides = array<i32>} : memref<8x16x8xf32, #tpu.memory_space<vmem>>, vector<8x16x8xf32>,
    %cst_71 = arith.constant 0.000000e+00 : f32
    %72 = vector.broadcast %cst_71 : f32 to vector<10x10x8xf32>
    %c0_72 = arith.constant 0 : index
    %c0_73 = arith.constant 0 : index
    %c0_74 = arith.constant 0 : index
    %73 = vector.load %arg9[%c0_72, %c0_73, %c0_74] : memref<10x10x8xf32, #tpu.memory_space<vmem>>, vector<10x10x8xf32>
    tpu.vector_store %arg9[%c0_72, %c0_73, %c0_74], %72 {strides = array<i32>} : memref<10x10x8xf32, #tpu.memory_space<vmem>>, vector<10x10x8xf32>,
    %c0_75 = arith.constant 0 : index
    %c0_76 = arith.constant 0 : index
    %c0_77 = arith.constant 0 : index
    %74 = vector.load %arg8[%c0_75, %c0_76, %c0_77] : memref<8x16x8xf32, #tpu.memory_space<vmem>>, vector<8x2x8xf32>
    %cst_78 = arith.constant dense<0xFF800000> : vector<8x8xf32>
    %75 = vector.multi_reduction <maximumf>, %74, %cst_78 [1] : vector<8x2x8xf32> to vector<8x8xf32>
    %c1_79 = arith.constant 1 : index
    %c1_80 = arith.constant 1 : index
    %c0_81 = arith.constant 0 : index
    %76 = vector.load %arg9[%c1_79, %c1_80, %c0_81] : memref<10x10x8xf32, #tpu.memory_space<vmem>>, vector<8x1x8xf32>
    %77 = vector.shape_cast %76 : vector<8x1x8xf32> to vector<8x8xf32>
    %78 = vector.shape_cast %75 : vector<8x8xf32> to vector<8x1x8xf32>
    tpu.vector_store %arg9[%c1_79, %c1_80, %c0_81], %78 {strides = array<i32>} : memref<10x10x8xf32, #tpu.memory_space<vmem>>, vector<8x1x8xf32>,
    %c0_82 = arith.constant 0 : index
    %c2_83 = arith.constant 2 : index
    %c0_84 = arith.constant 0 : index
    %79 = vector.load %arg8[%c0_82, %c2_83, %c0_84] : memref<8x16x8xf32, #tpu.memory_space<vmem>>, vector<8x2x8xf32>
    %cst_85 = arith.constant dense<0xFF800000> : vector<8x8xf32>
    %80 = vector.multi_reduction <maximumf>, %79, %cst_85 [1] : vector<8x2x8xf32> to vector<8x8xf32>
    %c1_86 = arith.constant 1 : index
    %c2_87 = arith.constant 2 : index
    %c0_88 = arith.constant 0 : index
    %81 = vector.load %arg9[%c1_86, %c2_87, %c0_88] : memref<10x10x8xf32, #tpu.memory_space<vmem>>, vector<8x1x8xf32>
    %82 = vector.shape_cast %81 : vector<8x1x8xf32> to vector<8x8xf32>
    %83 = vector.shape_cast %80 : vector<8x8xf32> to vector<8x1x8xf32>
    tpu.vector_store %arg9[%c1_86, %c2_87, %c0_88], %83 {strides = array<i32>} : memref<10x10x8xf32, #tpu.memory_space<vmem>>, vector<8x1x8xf32>,
    %c0_89 = arith.constant 0 : index
    %c4_90 = arith.constant 4 : index
    %c0_91 = arith.constant 0 : index
    %84 = vector.load %arg8[%c0_89, %c4_90, %c0_91] : memref<8x16x8xf32, #tpu.memory_space<vmem>>, vector<8x2x8xf32>
    %cst_92 = arith.constant dense<0xFF800000> : vector<8x8xf32>
    %85 = vector.multi_reduction <maximumf>, %84, %cst_92 [1] : vector<8x2x8xf32> to vector<8x8xf32>
    %c1_93 = arith.constant 1 : index
    %c3_94 = arith.constant 3 : index
    %c0_95 = arith.constant 0 : index
    %86 = vector.load %arg9[%c1_93, %c3_94, %c0_95] : memref<10x10x8xf32, #tpu.memory_space<vmem>>, vector<8x1x8xf32>
    %87 = vector.shape_cast %86 : vector<8x1x8xf32> to vector<8x8xf32>
    %88 = vector.shape_cast %85 : vector<8x8xf32> to vector<8x1x8xf32>
    tpu.vector_store %arg9[%c1_93, %c3_94, %c0_95], %88 {strides = array<i32>} : memref<10x10x8xf32, #tpu.memory_space<vmem>>, vector<8x1x8xf32>,
    %c0_96 = arith.constant 0 : index
    %c6_97 = arith.constant 6 : index
    %c0_98 = arith.constant 0 : index
    %89 = vector.load %arg8[%c0_96, %c6_97, %c0_98] : memref<8x16x8xf32, #tpu.memory_space<vmem>>, vector<8x2x8xf32>
    %cst_99 = arith.constant dense<0xFF800000> : vector<8x8xf32>
    %90 = vector.multi_reduction <maximumf>, %89, %cst_99 [1] : vector<8x2x8xf32> to vector<8x8xf32>
    %c1_100 = arith.constant 1 : index
    %c4_101 = arith.constant 4 : index
    %c0_102 = arith.constant 0 : index
    %91 = vector.load %arg9[%c1_100, %c4_101, %c0_102] : memref<10x10x8xf32, #tpu.memory_space<vmem>>, vector<8x1x8xf32>
    %92 = vector.shape_cast %91 : vector<8x1x8xf32> to vector<8x8xf32>
    %93 = vector.shape_cast %90 : vector<8x8xf32> to vector<8x1x8xf32>
    tpu.vector_store %arg9[%c1_100, %c4_101, %c0_102], %93 {strides = array<i32>} : memref<10x10x8xf32, #tpu.memory_space<vmem>>, vector<8x1x8xf32>,
    %c0_103 = arith.constant 0 : index
    %c8_104 = arith.constant 8 : index
    %c0_105 = arith.constant 0 : index
    %94 = vector.load %arg8[%c0_103, %c8_104, %c0_105] : memref<8x16x8xf32, #tpu.memory_space<vmem>>, vector<8x2x8xf32>
    %cst_106 = arith.constant dense<0xFF800000> : vector<8x8xf32>
    %95 = vector.multi_reduction <maximumf>, %94, %cst_106 [1] : vector<8x2x8xf32> to vector<8x8xf32>
    %c1_107 = arith.constant 1 : index
    %c5_108 = arith.constant 5 : index
    %c0_109 = arith.constant 0 : index
    %96 = vector.load %arg9[%c1_107, %c5_108, %c0_109] : memref<10x10x8xf32, #tpu.memory_space<vmem>>, vector<8x1x8xf32>
    %97 = vector.shape_cast %96 : vector<8x1x8xf32> to vector<8x8xf32>
    %98 = vector.shape_cast %95 : vector<8x8xf32> to vector<8x1x8xf32>
    tpu.vector_store %arg9[%c1_107, %c5_108, %c0_109], %98 {strides = array<i32>} : memref<10x10x8xf32, #tpu.memory_space<vmem>>, vector<8x1x8xf32>,
    %c0_110 = arith.constant 0 : index
    %c10 = arith.constant 10 : index
    %c0_111 = arith.constant 0 : index
    %99 = vector.load %arg8[%c0_110, %c10, %c0_111] : memref<8x16x8xf32, #tpu.memory_space<vmem>>, vector<8x2x8xf32>
    %cst_112 = arith.constant dense<0xFF800000> : vector<8x8xf32>
    %100 = vector.multi_reduction <maximumf>, %99, %cst_112 [1] : vector<8x2x8xf32> to vector<8x8xf32>
    %c1_113 = arith.constant 1 : index
    %c6_114 = arith.constant 6 : index
    %c0_115 = arith.constant 0 : index
    %101 = vector.load %arg9[%c1_113, %c6_114, %c0_115] : memref<10x10x8xf32, #tpu.memory_space<vmem>>, vector<8x1x8xf32>
    %102 = vector.shape_cast %101 : vector<8x1x8xf32> to vector<8x8xf32>
    %103 = vector.shape_cast %100 : vector<8x8xf32> to vector<8x1x8xf32>
    tpu.vector_store %arg9[%c1_113, %c6_114, %c0_115], %103 {strides = array<i32>} : memref<10x10x8xf32, #tpu.memory_space<vmem>>, vector<8x1x8xf32>,
    %c0_116 = arith.constant 0 : index
    %c12 = arith.constant 12 : index
    %c0_117 = arith.constant 0 : index
    %104 = vector.load %arg8[%c0_116, %c12, %c0_117] : memref<8x16x8xf32, #tpu.memory_space<vmem>>, vector<8x2x8xf32>
    %cst_118 = arith.constant dense<0xFF800000> : vector<8x8xf32>
    %105 = vector.multi_reduction <maximumf>, %104, %cst_118 [1] : vector<8x2x8xf32> to vector<8x8xf32>
    %c1_119 = arith.constant 1 : index
    %c7_120 = arith.constant 7 : index
    %c0_121 = arith.constant 0 : index
    %106 = vector.load %arg9[%c1_119, %c7_120, %c0_121] : memref<10x10x8xf32, #tpu.memory_space<vmem>>, vector<8x1x8xf32>
    %107 = vector.shape_cast %106 : vector<8x1x8xf32> to vector<8x8xf32>
    %108 = vector.shape_cast %105 : vector<8x8xf32> to vector<8x1x8xf32>
    tpu.vector_store %arg9[%c1_119, %c7_120, %c0_121], %108 {strides = array<i32>} : memref<10x10x8xf32, #tpu.memory_space<vmem>>, vector<8x1x8xf32>,
    %c0_122 = arith.constant 0 : index
    %c14 = arith.constant 14 : index
    %c0_123 = arith.constant 0 : index
    %109 = vector.load %arg8[%c0_122, %c14, %c0_123] : memref<8x16x8xf32, #tpu.memory_space<vmem>>, vector<8x2x8xf32>
    %cst_124 = arith.constant dense<0xFF800000> : vector<8x8xf32>
    %110 = vector.multi_reduction <maximumf>, %109, %cst_124 [1] : vector<8x2x8xf32> to vector<8x8xf32>
    %c1_125 = arith.constant 1 : index
    %c8_126 = arith.constant 8 : index
    %c0_127 = arith.constant 0 : index
    %111 = vector.load %arg9[%c1_125, %c8_126, %c0_127] : memref<10x10x8xf32, #tpu.memory_space<vmem>>, vector<8x1x8xf32>
    %112 = vector.shape_cast %111 : vector<8x1x8xf32> to vector<8x8xf32>
    %113 = vector.shape_cast %110 : vector<8x8xf32> to vector<8x1x8xf32>
    tpu.vector_store %arg9[%c1_125, %c8_126, %c0_127], %113 {strides = array<i32>} : memref<10x10x8xf32, #tpu.memory_space<vmem>>, vector<8x1x8xf32>,
    %cst_128 = arith.constant 0.000000e+00 : f32
    %114 = vector.broadcast %cst_128 : f32 to vector<64x16xf32>
    %c0_129 = arith.constant 0 : index
    %c0_130 = arith.constant 0 : index
    %c0_131 = arith.constant 0 : index
    %115 = vector.load %arg9[%c0_129, %c0_130, %c0_131] : memref<10x10x8xf32, #tpu.memory_space<vmem>>, vector<8x8x8xf32>
    %116 = vector.shape_cast %115 : vector<8x8x8xf32> to vector<64x8xf32>
    %c0_132 = arith.constant 0 : index
    %c0_133 = arith.constant 0 : index
    %c0_134 = arith.constant 0 : index
    %117 = vector.load %arg4[%c0_132, %c0_133, %c0_134] : memref<9x8x16xf32, #tpu.memory_space<vmem>>, vector<1x8x16xf32>
    %118 = vector.shape_cast %117 : vector<1x8x16xf32> to vector<8x16xf32>
    %cst_135 = arith.constant dense<0.000000e+00> : vector<64x16xf32>
    %119 = tpu.matmul %116, %118, %cst_135 {dimension_numbers = #tpu.dot_dimension_numbers<[1], [0], [0], [1], [0, 0, 1, 1], [], []>} : vector<64x8xf32>, vector<8x16xf32>, vector<64x16xf32> -> vector<64x16xf32>
    %120 = arith.addf %114, %119 : vector<64x16xf32>
    %c0_136 = arith.constant 0 : index
    %c1_137 = arith.constant 1 : index
    %c0_138 = arith.constant 0 : index
    %121 = vector.load %arg9[%c0_136, %c1_137, %c0_138] : memref<10x10x8xf32, #tpu.memory_space<vmem>>, vector<8x8x8xf32>
    %122 = vector.shape_cast %121 : vector<8x8x8xf32> to vector<64x8xf32>
    %c1_139 = arith.constant 1 : index
    %c0_140 = arith.constant 0 : index
    %c0_141 = arith.constant 0 : index
    %123 = vector.load %arg4[%c1_139, %c0_140, %c0_141] : memref<9x8x16xf32, #tpu.memory_space<vmem>>, vector<1x8x16xf32>
    %124 = vector.shape_cast %123 : vector<1x8x16xf32> to vector<8x16xf32>
    %cst_142 = arith.constant dense<0.000000e+00> : vector<64x16xf32>
    %125 = tpu.matmul %122, %124, %cst_142 {dimension_numbers = #tpu.dot_dimension_numbers<[1], [0], [0], [1], [0, 0, 1, 1], [], []>} : vector<64x8xf32>, vector<8x16xf32>, vector<64x16xf32> -> vector<64x16xf32>
    %126 = arith.addf %120, %125 : vector<64x16xf32>
    %c0_143 = arith.constant 0 : index
    %c2_144 = arith.constant 2 : index
    %c0_145 = arith.constant 0 : index
    %127 = vector.load %arg9[%c0_143, %c2_144, %c0_145] : memref<10x10x8xf32, #tpu.memory_space<vmem>>, vector<8x8x8xf32>
    %128 = vector.shape_cast %127 : vector<8x8x8xf32> to vector<64x8xf32>
    %c2_146 = arith.constant 2 : index
    %c0_147 = arith.constant 0 : index
    %c0_148 = arith.constant 0 : index
    %129 = vector.load %arg4[%c2_146, %c0_147, %c0_148] : memref<9x8x16xf32, #tpu.memory_space<vmem>>, vector<1x8x16xf32>
    %130 = vector.shape_cast %129 : vector<1x8x16xf32> to vector<8x16xf32>
    %cst_149 = arith.constant dense<0.000000e+00> : vector<64x16xf32>
    %131 = tpu.matmul %128, %130, %cst_149 {dimension_numbers = #tpu.dot_dimension_numbers<[1], [0], [0], [1], [0, 0, 1, 1], [], []>} : vector<64x8xf32>, vector<8x16xf32>, vector<64x16xf32> -> vector<64x16xf32>
    %132 = arith.addf %126, %131 : vector<64x16xf32>
    %c1_150 = arith.constant 1 : index
    %c0_151 = arith.constant 0 : index
    %c0_152 = arith.constant 0 : index
    %133 = vector.load %arg9[%c1_150, %c0_151, %c0_152] : memref<10x10x8xf32, #tpu.memory_space<vmem>>, vector<8x8x8xf32>
    %134 = vector.shape_cast %133 : vector<8x8x8xf32> to vector<64x8xf32>
    %c3_153 = arith.constant 3 : index
    %c0_154 = arith.constant 0 : index
    %c0_155 = arith.constant 0 : index
    %135 = vector.load %arg4[%c3_153, %c0_154, %c0_155] : memref<9x8x16xf32, #tpu.memory_space<vmem>>, vector<1x8x16xf32>
    %136 = vector.shape_cast %135 : vector<1x8x16xf32> to vector<8x16xf32>
    %cst_156 = arith.constant dense<0.000000e+00> : vector<64x16xf32>
    %137 = tpu.matmul %134, %136, %cst_156 {dimension_numbers = #tpu.dot_dimension_numbers<[1], [0], [0], [1], [0, 0, 1, 1], [], []>} : vector<64x8xf32>, vector<8x16xf32>, vector<64x16xf32> -> vector<64x16xf32>
    %138 = arith.addf %132, %137 : vector<64x16xf32>
    %c1_157 = arith.constant 1 : index
    %c1_158 = arith.constant 1 : index
    %c0_159 = arith.constant 0 : index
    %139 = vector.load %arg9[%c1_157, %c1_158, %c0_159] : memref<10x10x8xf32, #tpu.memory_space<vmem>>, vector<8x8x8xf32>
    %140 = vector.shape_cast %139 : vector<8x8x8xf32> to vector<64x8xf32>
    %c4_160 = arith.constant 4 : index
    %c0_161 = arith.constant 0 : index
    %c0_162 = arith.constant 0 : index
    %141 = vector.load %arg4[%c4_160, %c0_161, %c0_162] : memref<9x8x16xf32, #tpu.memory_space<vmem>>, vector<1x8x16xf32>
    %142 = vector.shape_cast %141 : vector<1x8x16xf32> to vector<8x16xf32>
    %cst_163 = arith.constant dense<0.000000e+00> : vector<64x16xf32>
    %143 = tpu.matmul %140, %142, %cst_163 {dimension_numbers = #tpu.dot_dimension_numbers<[1], [0], [0], [1], [0, 0, 1, 1], [], []>} : vector<64x8xf32>, vector<8x16xf32>, vector<64x16xf32> -> vector<64x16xf32>
    %144 = arith.addf %138, %143 : vector<64x16xf32>
    %c1_164 = arith.constant 1 : index
    %c2_165 = arith.constant 2 : index
    %c0_166 = arith.constant 0 : index
    %145 = vector.load %arg9[%c1_164, %c2_165, %c0_166] : memref<10x10x8xf32, #tpu.memory_space<vmem>>, vector<8x8x8xf32>
    %146 = vector.shape_cast %145 : vector<8x8x8xf32> to vector<64x8xf32>
    %c5_167 = arith.constant 5 : index
    %c0_168 = arith.constant 0 : index
    %c0_169 = arith.constant 0 : index
    %147 = vector.load %arg4[%c5_167, %c0_168, %c0_169] : memref<9x8x16xf32, #tpu.memory_space<vmem>>, vector<1x8x16xf32>
    %148 = vector.shape_cast %147 : vector<1x8x16xf32> to vector<8x16xf32>
    %cst_170 = arith.constant dense<0.000000e+00> : vector<64x16xf32>
    %149 = tpu.matmul %146, %148, %cst_170 {dimension_numbers = #tpu.dot_dimension_numbers<[1], [0], [0], [1], [0, 0, 1, 1], [], []>} : vector<64x8xf32>, vector<8x16xf32>, vector<64x16xf32> -> vector<64x16xf32>
    %150 = arith.addf %144, %149 : vector<64x16xf32>
    %c2_171 = arith.constant 2 : index
    %c0_172 = arith.constant 0 : index
    %c0_173 = arith.constant 0 : index
    %151 = vector.load %arg9[%c2_171, %c0_172, %c0_173] : memref<10x10x8xf32, #tpu.memory_space<vmem>>, vector<8x8x8xf32>
    %152 = vector.shape_cast %151 : vector<8x8x8xf32> to vector<64x8xf32>
    %c6_174 = arith.constant 6 : index
    %c0_175 = arith.constant 0 : index
    %c0_176 = arith.constant 0 : index
    %153 = vector.load %arg4[%c6_174, %c0_175, %c0_176] : memref<9x8x16xf32, #tpu.memory_space<vmem>>, vector<1x8x16xf32>
    %154 = vector.shape_cast %153 : vector<1x8x16xf32> to vector<8x16xf32>
    %cst_177 = arith.constant dense<0.000000e+00> : vector<64x16xf32>
    %155 = tpu.matmul %152, %154, %cst_177 {dimension_numbers = #tpu.dot_dimension_numbers<[1], [0], [0], [1], [0, 0, 1, 1], [], []>} : vector<64x8xf32>, vector<8x16xf32>, vector<64x16xf32> -> vector<64x16xf32>
    %156 = arith.addf %150, %155 : vector<64x16xf32>
    %c2_178 = arith.constant 2 : index
    %c1_179 = arith.constant 1 : index
    %c0_180 = arith.constant 0 : index
    %157 = vector.load %arg9[%c2_178, %c1_179, %c0_180] : memref<10x10x8xf32, #tpu.memory_space<vmem>>, vector<8x8x8xf32>
    %158 = vector.shape_cast %157 : vector<8x8x8xf32> to vector<64x8xf32>
    %c7_181 = arith.constant 7 : index
    %c0_182 = arith.constant 0 : index
    %c0_183 = arith.constant 0 : index
    %159 = vector.load %arg4[%c7_181, %c0_182, %c0_183] : memref<9x8x16xf32, #tpu.memory_space<vmem>>, vector<1x8x16xf32>
    %160 = vector.shape_cast %159 : vector<1x8x16xf32> to vector<8x16xf32>
    %cst_184 = arith.constant dense<0.000000e+00> : vector<64x16xf32>
    %161 = tpu.matmul %158, %160, %cst_184 {dimension_numbers = #tpu.dot_dimension_numbers<[1], [0], [0], [1], [0, 0, 1, 1], [], []>} : vector<64x8xf32>, vector<8x16xf32>, vector<64x16xf32> -> vector<64x16xf32>
    %162 = arith.addf %156, %161 : vector<64x16xf32>
    %c2_185 = arith.constant 2 : index
    %c2_186 = arith.constant 2 : index
    %c0_187 = arith.constant 0 : index
    %163 = vector.load %arg9[%c2_185, %c2_186, %c0_187] : memref<10x10x8xf32, #tpu.memory_space<vmem>>, vector<8x8x8xf32>
    %164 = vector.shape_cast %163 : vector<8x8x8xf32> to vector<64x8xf32>
    %c8_188 = arith.constant 8 : index
    %c0_189 = arith.constant 0 : index
    %c0_190 = arith.constant 0 : index
    %165 = vector.load %arg4[%c8_188, %c0_189, %c0_190] : memref<9x8x16xf32, #tpu.memory_space<vmem>>, vector<1x8x16xf32>
    %166 = vector.shape_cast %165 : vector<1x8x16xf32> to vector<8x16xf32>
    %cst_191 = arith.constant dense<0.000000e+00> : vector<64x16xf32>
    %167 = tpu.matmul %164, %166, %cst_191 {dimension_numbers = #tpu.dot_dimension_numbers<[1], [0], [0], [1], [0, 0, 1, 1], [], []>} : vector<64x8xf32>, vector<8x16xf32>, vector<64x16xf32> -> vector<64x16xf32>
    %168 = arith.addf %162, %167 : vector<64x16xf32>
    %c0_192 = arith.constant 0 : index
    %c0_193 = arith.constant 0 : index
    %169 = vector.load %arg5[%c0_192, %c0_193] : memref<1x16xf32, #tpu.memory_space<vmem>>, vector<1x16xf32>
    %170 = vector.broadcast %169 : vector<1x16xf32> to vector<64x16xf32>
    %171 = arith.addf %168, %170 : vector<64x16xf32>
    %cst_194 = arith.constant 0.000000e+00 : f32
    %172 = vector.broadcast %cst_194 : f32 to vector<64x16xf32>
    %173 = arith.maximumf %171, %172 : vector<64x16xf32>
    %174 = vector.shape_cast %173 : vector<64x16xf32> to vector<4x2x8x16xf32>
    %175 = vector.extract_strided_slice %174 {offsets = [0, 0, 0, 0], sizes = [4, 1, 8, 16], strides = [1, 1, 1, 1]} : vector<4x2x8x16xf32> to vector<4x1x8x16xf32>
    %176 = vector.shape_cast %175 : vector<4x1x8x16xf32> to vector<4x8x16xf32>
    %177 = vector.extract_strided_slice %174 {offsets = [0, 1, 0, 0], sizes = [4, 1, 8, 16], strides = [1, 1, 1, 1]} : vector<4x2x8x16xf32> to vector<4x1x8x16xf32>
    %178 = vector.shape_cast %177 : vector<4x1x8x16xf32> to vector<4x8x16xf32>
    %179 = arith.maximumf %176, %178 : vector<4x8x16xf32>
    %c0_195 = arith.constant 0 : index
    %c0_196 = arith.constant 0 : index
    %c0_197 = arith.constant 0 : index
    %180 = vector.load %arg10[%c0_195, %c0_196, %c0_197] : memref<4x8x16xf32, #tpu.memory_space<vmem>>, vector<4x8x16xf32>
    tpu.vector_store %arg10[%c0_195, %c0_196, %c0_197], %179 {strides = array<i32>} : memref<4x8x16xf32, #tpu.memory_space<vmem>>, vector<4x8x16xf32>,
    %c0_198 = arith.constant 0 : index
    %c0_199 = arith.constant 0 : index
    %c0_200 = arith.constant 0 : index
    %181 = vector.load %arg10[%c0_198, %c0_199, %c0_200] : memref<4x8x16xf32, #tpu.memory_space<vmem>>, vector<4x2x16xf32>
    %cst_201 = arith.constant dense<0xFF800000> : vector<4x16xf32>
    %182 = vector.multi_reduction <maximumf>, %181, %cst_201 [1] : vector<4x2x16xf32> to vector<4x16xf32>
    %c0_202 = arith.constant 0 : index
    %c0_203 = arith.constant 0 : index
    %c0_204 = arith.constant 0 : index
    %c0_205 = arith.constant 0 : index
    %183 = vector.load %arg6[%c0_202, %c0_203, %c0_204, %c0_205] : memref<1x4x4x16xf32, #tpu.memory_space<vmem>>, vector<1x4x1x16xf32>
    %184 = vector.shape_cast %183 : vector<1x4x1x16xf32> to vector<4x16xf32>
    %185 = vector.shape_cast %182 : vector<4x16xf32> to vector<1x4x1x16xf32>
    tpu.vector_store %arg6[%c0_202, %c0_203, %c0_204, %c0_205], %185 {strides = array<i32>} : memref<1x4x4x16xf32, #tpu.memory_space<vmem>>, vector<1x4x1x16xf32>,
    %c0_206 = arith.constant 0 : index
    %c2_207 = arith.constant 2 : index
    %c0_208 = arith.constant 0 : index
    %186 = vector.load %arg10[%c0_206, %c2_207, %c0_208] : memref<4x8x16xf32, #tpu.memory_space<vmem>>, vector<4x2x16xf32>
    %cst_209 = arith.constant dense<0xFF800000> : vector<4x16xf32>
    %187 = vector.multi_reduction <maximumf>, %186, %cst_209 [1] : vector<4x2x16xf32> to vector<4x16xf32>
    %c0_210 = arith.constant 0 : index
    %c0_211 = arith.constant 0 : index
    %c1_212 = arith.constant 1 : index
    %c0_213 = arith.constant 0 : index
    %188 = vector.load %arg6[%c0_210, %c0_211, %c1_212, %c0_213] : memref<1x4x4x16xf32, #tpu.memory_space<vmem>>, vector<1x4x1x16xf32>
    %189 = vector.shape_cast %188 : vector<1x4x1x16xf32> to vector<4x16xf32>
    %190 = vector.shape_cast %187 : vector<4x16xf32> to vector<1x4x1x16xf32>
    tpu.vector_store %arg6[%c0_210, %c0_211, %c1_212, %c0_213], %190 {strides = array<i32>} : memref<1x4x4x16xf32, #tpu.memory_space<vmem>>, vector<1x4x1x16xf32>,
    %c0_214 = arith.constant 0 : index
    %c4_215 = arith.constant 4 : index
    %c0_216 = arith.constant 0 : index
    %191 = vector.load %arg10[%c0_214, %c4_215, %c0_216] : memref<4x8x16xf32, #tpu.memory_space<vmem>>, vector<4x2x16xf32>
    %cst_217 = arith.constant dense<0xFF800000> : vector<4x16xf32>
    %192 = vector.multi_reduction <maximumf>, %191, %cst_217 [1] : vector<4x2x16xf32> to vector<4x16xf32>
    %c0_218 = arith.constant 0 : index
    %c0_219 = arith.constant 0 : index
    %c2_220 = arith.constant 2 : index
    %c0_221 = arith.constant 0 : index
    %193 = vector.load %arg6[%c0_218, %c0_219, %c2_220, %c0_221] : memref<1x4x4x16xf32, #tpu.memory_space<vmem>>, vector<1x4x1x16xf32>
    %194 = vector.shape_cast %193 : vector<1x4x1x16xf32> to vector<4x16xf32>
    %195 = vector.shape_cast %192 : vector<4x16xf32> to vector<1x4x1x16xf32>
    tpu.vector_store %arg6[%c0_218, %c0_219, %c2_220, %c0_221], %195 {strides = array<i32>} : memref<1x4x4x16xf32, #tpu.memory_space<vmem>>, vector<1x4x1x16xf32>,
    %c0_222 = arith.constant 0 : index
    %c6_223 = arith.constant 6 : index
    %c0_224 = arith.constant 0 : index
    %196 = vector.load %arg10[%c0_222, %c6_223, %c0_224] : memref<4x8x16xf32, #tpu.memory_space<vmem>>, vector<4x2x16xf32>
    %cst_225 = arith.constant dense<0xFF800000> : vector<4x16xf32>
    %197 = vector.multi_reduction <maximumf>, %196, %cst_225 [1] : vector<4x2x16xf32> to vector<4x16xf32>
    %c0_226 = arith.constant 0 : index
    %c0_227 = arith.constant 0 : index
    %c3_228 = arith.constant 3 : index
    %c0_229 = arith.constant 0 : index
    %198 = vector.load %arg6[%c0_226, %c0_227, %c3_228, %c0_229] : memref<1x4x4x16xf32, #tpu.memory_space<vmem>>, vector<1x4x1x16xf32>
    %199 = vector.shape_cast %198 : vector<1x4x1x16xf32> to vector<4x16xf32>
    %200 = vector.shape_cast %197 : vector<4x16xf32> to vector<1x4x1x16xf32>
    tpu.vector_store %arg6[%c0_226, %c0_227, %c3_228, %c0_229], %200 {strides = array<i32>} : memref<1x4x4x16xf32, #tpu.memory_space<vmem>>, vector<1x4x1x16xf32>,
    return
  }
  func.func @transform_0(%arg0: i32) -> (i32, i32, i32, i32) {
    %c0_i32 = arith.constant 0 : i32
    %c0_i32_0 = arith.constant 0 : i32
    %c0_i32_1 = arith.constant 0 : i32
    %c0_i32_2 = arith.constant 0 : i32
    return %arg0, %c0_i32, %c0_i32_0, %c0_i32_1 : i32, i32, i32, i32
  }
  func.func @transform_1(%arg0: i32) -> (i32, i32, i32) {
    %c0_i32 = arith.constant 0 : i32
    %c0_i32_0 = arith.constant 0 : i32
    %c0_i32_1 = arith.constant 0 : i32
    %c0_i32_2 = arith.constant 0 : i32
    return %c0_i32, %c0_i32_0, %c0_i32_1 : i32, i32, i32
  }
  func.func @transform_2(%arg0: i32) -> (i32, i32) {
    %c0_i32 = arith.constant 0 : i32
    %c0_i32_0 = arith.constant 0 : i32
    %c0_i32_1 = arith.constant 0 : i32
    return %c0_i32, %c0_i32_0 : i32, i32
  }
  func.func @transform_3(%arg0: i32) -> (i32, i32, i32) {
    %c0_i32 = arith.constant 0 : i32
    %c0_i32_0 = arith.constant 0 : i32
    %c0_i32_1 = arith.constant 0 : i32
    %c0_i32_2 = arith.constant 0 : i32
    return %c0_i32, %c0_i32_0, %c0_i32_1 : i32, i32, i32
  }
  func.func @transform_4(%arg0: i32) -> (i32, i32) {
    %c0_i32 = arith.constant 0 : i32
    %c0_i32_0 = arith.constant 0 : i32
    %c0_i32_1 = arith.constant 0 : i32
    return %c0_i32, %c0_i32_0 : i32, i32
  }
  func.func @transform_5(%arg0: i32) -> (i32, i32, i32, i32) {
    %c0_i32 = arith.constant 0 : i32
    %c0_i32_0 = arith.constant 0 : i32
    %c0_i32_1 = arith.constant 0 : i32
    %c0_i32_2 = arith.constant 0 : i32
    return %arg0, %c0_i32, %c0_i32_0, %c0_i32_1 : i32, i32, i32, i32
  }
}

module attributes {stable_mosaic.version = 11 : i64} {
  func.func @_fc_kernel(%arg0: i32, %arg1: memref<2x256xf32, #tpu.memory_space<vmem>>, %arg2: memref<256x32xf32, #tpu.memory_space<vmem>>, %arg3: memref<1x32xf32, #tpu.memory_space<vmem>>, %arg4: memref<32x10xf32, #tpu.memory_space<vmem>>, %arg5: memref<1x10xf32, #tpu.memory_space<vmem>>, %arg6: memref<2x10xf32, #tpu.memory_space<vmem>>) attributes {dimension_semantics = [#tpu.dimension_semantics<arbitrary>], iteration_bounds = array<i64: 1>, scalar_prefetch = 0 : i64, scratch_operands = 0 : i64, tpu.core_type = #tpu.core_type<tc>, window_params = [{pipeline_mode = #tpu.pipeline_mode<synchronous>, transform_indices = @transform_0, window_bounds = array<i64: 2, 256>}, {pipeline_mode = #tpu.pipeline_mode<synchronous>, transform_indices = @transform_1, window_bounds = array<i64: 256, 32>}, {pipeline_mode = #tpu.pipeline_mode<synchronous>, transform_indices = @transform_2, window_bounds = array<i64: 1, 32>}, {pipeline_mode = #tpu.pipeline_mode<synchronous>, transform_indices = @transform_3, window_bounds = array<i64: 32, 10>}, {pipeline_mode = #tpu.pipeline_mode<synchronous>, transform_indices = @transform_4, window_bounds = array<i64: 1, 10>}, {pipeline_mode = #tpu.pipeline_mode<synchronous>, transform_indices = @transform_5, window_bounds = array<i64: 2, 10>}]} {
    %c0 = arith.constant 0 : index
    %c0_0 = arith.constant 0 : index
    %0 = vector.load %arg1[%c0, %c0_0] : memref<2x256xf32, #tpu.memory_space<vmem>>, vector<2x256xf32>
    %c0_1 = arith.constant 0 : index
    %c0_2 = arith.constant 0 : index
    %1 = vector.load %arg2[%c0_1, %c0_2] : memref<256x32xf32, #tpu.memory_space<vmem>>, vector<256x32xf32>
    %cst = arith.constant dense<0.000000e+00> : vector<2x32xf32>
    %2 = tpu.matmul %0, %1, %cst {dimension_numbers = #tpu.dot_dimension_numbers<[1], [0], [0], [1], [0, 0, 1, 1], [], []>} : vector<2x256xf32>, vector<256x32xf32>, vector<2x32xf32> -> vector<2x32xf32>
    %c0_3 = arith.constant 0 : index
    %c0_4 = arith.constant 0 : index
    %3 = vector.load %arg3[%c0_3, %c0_4] : memref<1x32xf32, #tpu.memory_space<vmem>>, vector<1x32xf32>
    %4 = vector.broadcast %3 : vector<1x32xf32> to vector<2x32xf32>
    %5 = arith.addf %2, %4 : vector<2x32xf32>
    %cst_5 = arith.constant 0.000000e+00 : f32
    %6 = vector.broadcast %cst_5 : f32 to vector<2x32xf32>
    %7 = arith.maximumf %5, %6 : vector<2x32xf32>
    %c0_6 = arith.constant 0 : index
    %c0_7 = arith.constant 0 : index
    %8 = vector.load %arg4[%c0_6, %c0_7] : memref<32x10xf32, #tpu.memory_space<vmem>>, vector<32x10xf32>
    %cst_8 = arith.constant dense<0.000000e+00> : vector<2x10xf32>
    %9 = tpu.matmul %7, %8, %cst_8 {dimension_numbers = #tpu.dot_dimension_numbers<[1], [0], [0], [1], [0, 0, 1, 1], [], []>} : vector<2x32xf32>, vector<32x10xf32>, vector<2x10xf32> -> vector<2x10xf32>
    %c0_9 = arith.constant 0 : index
    %c0_10 = arith.constant 0 : index
    %10 = vector.load %arg5[%c0_9, %c0_10] : memref<1x10xf32, #tpu.memory_space<vmem>>, vector<1x10xf32>
    %11 = vector.broadcast %10 : vector<1x10xf32> to vector<2x10xf32>
    %12 = arith.addf %9, %11 : vector<2x10xf32>
    %c0_11 = arith.constant 0 : index
    %c0_12 = arith.constant 0 : index
    %13 = vector.load %arg6[%c0_11, %c0_12] : memref<2x10xf32, #tpu.memory_space<vmem>>, vector<2x10xf32>
    tpu.vector_store %arg6[%c0_11, %c0_12], %12 {strides = array<i32>} : memref<2x10xf32, #tpu.memory_space<vmem>>, vector<2x10xf32>,
    return
  }
  func.func @transform_0(%arg0: i32) -> (i32, i32) {
    %c0_i32 = arith.constant 0 : i32
    %c0_i32_0 = arith.constant 0 : i32
    %c0_i32_1 = arith.constant 0 : i32
    return %c0_i32, %c0_i32_0 : i32, i32
  }
  func.func @transform_1(%arg0: i32) -> (i32, i32) {
    %c0_i32 = arith.constant 0 : i32
    %c0_i32_0 = arith.constant 0 : i32
    %c0_i32_1 = arith.constant 0 : i32
    return %c0_i32, %c0_i32_0 : i32, i32
  }
  func.func @transform_2(%arg0: i32) -> (i32, i32) {
    %c0_i32 = arith.constant 0 : i32
    %c0_i32_0 = arith.constant 0 : i32
    %c0_i32_1 = arith.constant 0 : i32
    return %c0_i32, %c0_i32_0 : i32, i32
  }
  func.func @transform_3(%arg0: i32) -> (i32, i32) {
    %c0_i32 = arith.constant 0 : i32
    %c0_i32_0 = arith.constant 0 : i32
    %c0_i32_1 = arith.constant 0 : i32
    return %c0_i32, %c0_i32_0 : i32, i32
  }
  func.func @transform_4(%arg0: i32) -> (i32, i32) {
    %c0_i32 = arith.constant 0 : i32
    %c0_i32_0 = arith.constant 0 : i32
    %c0_i32_1 = arith.constant 0 : i32
    return %c0_i32, %c0_i32_0 : i32, i32
  }
  func.func @transform_5(%arg0: i32) -> (i32, i32) {
    %c0_i32 = arith.constant 0 : i32
    %c0_i32_0 = arith.constant 0 : i32
    %c0_i32_1 = arith.constant 0 : i32
    return %c0_i32, %c0_i32_0 : i32, i32
  }
}

</mosaic_0001>

<bundles_post_ra>
// kernel: convnet_forward.3
= control target key start
LH: loop header
LB: loop body
LE: loop exit
PB: predicated region body
PF: predicated region fallthrough
CT: control target
= control target key end

     0   :  { %s477_s0 = inlined_call_operand.vmem [shape: f32[2,256], index: 0, kind: input, shape index: {}]   ;;  %s478_s1 = inlined_call_operand.vmem [shape: f32[256,32], index: 1, kind: input, shape index: {}]   ;;  %s479_s2 = inlined_call_operand.vmem [shape: f32[1,32], index: 2, kind: input, shape index: {}]   ;;  %s480_s3 = inlined_call_operand.vmem [shape: f32[32,10], index: 3, kind: input, shape index: {}]   ;;  %s481_s4 = inlined_call_operand.vmem [shape: f32[1,10], index: 4, kind: input, shape index: {}]   ;;  %s482_s5 = inlined_call_operand.hbm [shape: f32[2,10], index: 5, kind: output, shape index: {}]  }
   0x1   :  { %v53_v0 = vld [vmem:[%s478_s1 + $0xf8] sm:$0xff]  ;;  %v52_v2 = vld [vmem:[%s478_s1 + $0xf0] sm:$0xff]  ;;  %v51_v4 = vld [vmem:[%s478_s1 + $0xe8] sm:$0xff] }
   0x2   :  { %v37_v1 = vld [vmem:[%s478_s1 + $0x78] sm:$0xff]  ;;  %248 = vmatprep.subr.mxu0 %v53_v0  ;;  %v36_v3 = vld [vmem:[%s478_s1 + $0x70] sm:$0xff]  ;;  %v35_v5 = vld [vmem:[%s478_s1 + $0x68] sm:$0xff] }
   0x3   :  { %249 = vmatpush3.msra.mxu0 %v37_v1  ;;  %v50_v6 = vld [vmem:[%s478_s1 + $0xe0] sm:$0xff]  ;;  %v49_v8 = vld [vmem:[%s478_s1 + $0xd8] sm:$0xff]  ;;  %v48_v10 = vld [vmem:[%s478_s1 + $0xd0] sm:$0xff] }
   0x4   :  { %250 = vmatprep.subr.mxu0 %v52_v2  ;;  %v34_v7 = vld [vmem:[%s478_s1 + $0x60] sm:$0xff]  ;;  %v33_v9 = vld [vmem:[%s478_s1 + $0x58] sm:$0xff]  ;;  %v32_v11 = vld [vmem:[%s478_s1 + $0x50] sm:$0xff] }
   0x5   :  { %251 = vmatpush3.msra.mxu0 %v36_v3  ;;  %v47_v12 = vld [vmem:[%s478_s1 + $0xc8] sm:$0xff]  ;;  %v245_v13 = vld.sshfl [vmem:[%s477_s0] sm:$0x33 pattern:$0x76325410] }
   0x6   :  { %252 = vmatprep.subr.mxu0 %v51_v4  ;;  %v31_v14 = vld [vmem:[%s478_s1 + $0x48] sm:$0xff]  ;;  %v69_v15 = vcombine.high %v245_v13, %v245_v13 }
   0x7   :  { %253 = vmatpush3.msra.mxu0 %v35_v5 }
   0x8   :  { %254 = vmatprep.subr.mxu0 %v50_v6 }
   0x9   :  { %255 = vmatpush3.msra.mxu0 %v34_v7 }
   0xa   :  { %256 = vmatprep.subr.mxu0 %v49_v8 }
   0xb   :  { %257 = vmatpush3.msra.mxu0 %v33_v9 }
   0xc   :  { %258 = vmatprep.subr.mxu0 %v48_v10 }
   0xd   :  { %10 = vsyncpa [#allocation3], 0  ;;  %259 = vmatpush3.msra.mxu0 %v32_v11  ;;  %v46_v16 = vld [vmem:[%s478_s1 + $0xc0] sm:$0xff]  ;;  %136 = vmatprep.mubr.f32.mxu0 %v69_v15  ;;  %v45_v18 = vld [vmem:[%s478_s1 + $0xb8] sm:$0xff]  ;;  %v324_v34 = vmov 0.0   ;;  %vm325_vm0 = vmmov 0  }
   0xe   :  { %260 = vmatprep.subr.mxu0 %v47_v12  ;;  %v30_v17 = vld [vmem:[%s478_s1 + $0x40] sm:$0xff]  ;;  %v29_v19 = vld [vmem:[%s478_s1 + $0x38] sm:$0xff]  ;;  %v44_v20 = vld [vmem:[%s478_s1 + $0xb0] sm:$0xff]  ;;  %288 = vmatprep.subr.mxu1 %v324_v34  ;;  %vm154_vm1 = vcmask 261120   ;;  %s326_s18 = smov [#allocation2]   ;;  %vm228_vm2 = vcmask 74752  }
   0xf   :  { %261 = vmatpush3.msra.mxu0 %v31_v14  ;;  %v28_v21 = vld [vmem:[%s478_s1 + $0x30] sm:$0xff]  ;;  %v43_v22 = vld [vmem:[%s478_s1 + $0xa8] sm:$0xff]  ;;  %v42_v24 = vld [vmem:[%s478_s1 + $0xa0] sm:$0xff]  ;;  %296 = vmatprep.mubr.msk.f32.mxu1 %vm325_vm0, %v324_v34 }
  0x10   :  { %262 = vmatprep.subr.mxu0 %v46_v16  ;;  %v27_v23 = vld [vmem:[%s478_s1 + $0x28] sm:$0xff]  ;;  %v26_v25 = vld [vmem:[%s478_s1 + $0x20] sm:$0xff]  ;;  %v41_v26 = vld [vmem:[%s478_s1 + $0x98] sm:$0xff] }
  0x11   :  { %263 = vmatpush3.msra.mxu0 %v30_v17  ;;  %v25_v27 = vld [vmem:[%s478_s1 + $0x18] sm:$0xff]  ;;  %v40_v28 = vld [vmem:[%s478_s1 + $0x90] sm:$0xff]  ;;  %v39_v30 = vld [vmem:[%s478_s1 + $0x88] sm:$0xff] }
  0x12   :  { %264 = vmatprep.subr.mxu0 %v45_v18  ;;  %v24_v29 = vld [vmem:[%s478_s1 + $0x10] sm:$0xff]  ;;  %v23_v31 = vld [vmem:[%s478_s1 + $0x8] sm:$0xff]  ;;  %v38_v32 = vld [vmem:[%s478_s1 + $0x80] sm:$0xff] }
  0x13   :  { %265 = vmatpush3.msra.mxu0 %v29_v19  ;;  %v22_v33 = vld [vmem:[%s478_s1] sm:$0xff]  ;;  %v146_v35 = vld [vmem:[%s480_s3 + $0x18] sm:$0xff]  ;;  %v145_v36 = vld [vmem:[%s480_s3 + $0x10] sm:$0xff] }
  0x14   :  { %266 = vmatprep.subr.mxu0 %v44_v20  ;;  %289 = vmatpush3.msra.mxu1 %v146_v35  ;;  %v144_v37 = vld [vmem:[%s480_s3 + $0x8] sm:$0xff]  ;;  %v143_v38 = vld [vmem:[%s480_s3] sm:$0xff]  ;;  %s236_s3 = sshll.u32 %s326_s18, 4  ;;  %s237_s3 = int_to_ptr.vmem [resolvable:$true] %s236_s3 }
  0x15   :  { %267 = vmatpush3.msra.mxu0 %v28_v21  ;;  %290 = vmatprep.subr.mxu1 %v324_v34  ;;  %v244_v40 = vld [vmem:[%s479_s2] ss:$0 sm:$0xff]  ;;  %s302_s19 = scalar_lea.vmem %s237_s3, 32  ;;  %p307_p1 = scmp.lt.s32.totalorder %s237_s3, %s237_s3 }
  0x16   :  { %268 = vmatprep.subr.mxu0 %v43_v22  ;;  %291 = vmatpush3.msra.mxu1 %v145_v36  ;;  %v246_v45 = vld [vmem:[%s481_s4] ss:$0 sm:$0xff]  ;;  %p303_p0 = scmp.ne.s32.totalorder %s237_s3, %s302_s19  ;;  %p308_p2 = scmp.lt.s32.totalorder %s302_s19, %s302_s19 }
  0x17   :  { %269 = vmatpush3.msra.mxu0 %v27_v23  ;;  %292 = vmatprep.subr.mxu1 %v324_v34 }
  0x18   :  { %270 = vmatprep.subr.mxu0 %v42_v24  ;;  %293 = vmatpush3.msra.mxu1 %v144_v37  ;;  %p309_p3 = por %p308_p2, %p307_p1 }
  0x19   :  { %271 = vmatpush3.msra.mxu0 %v26_v25  ;;  %294 = vmatprep.subr.mxu1 %v324_v34 }
  0x1a   :  { %272 = vmatprep.subr.mxu0 %v41_v26  ;;  %295 = vmatpush3.msra.mxu1 %v143_v38  ;;  %p310_p4 = pnand %p309_p3, %p303_p0 }
  0x1b   :  { %273 = vmatpush3.msra.mxu0 %v25_v27 }
  0x1c   :  { %274 = vmatprep.subr.mxu0 %v40_v28 }
  0x1d   :  { %275 = vmatpush3.msra.mxu0 %v24_v29 }
  0x1e   :  { %276 = vmatprep.subr.mxu0 %v39_v30 }
  0x1f   :  { %277 = vmatpush3.msra.mxu0 %v23_v31 }
  0x20   :  { %278 = vmatprep.subr.mxu0 %v38_v32 }
  0x21   :  { %279 = vmatpush3.msra.mxu0 %v22_v33 }
  0x22   :  { %137 = vmatmul.mubr.f32.vlgmr.msra.gmra.mxu0 %v245_v13 }
  0xe2   :  { %v280_v39 = vpop.f32.mrf.mxu0 }
  0xe4   :  { %v281_v41 = vpop.f32.mrf.mxu0 }
  0xe5   :  { %v282_v42 = vadd.f32 %v281_v41, %v280_v39 }
  0xe7   :  { %v139_v43 = vadd.f32 %v282_v42, %v244_v40 }
  0xe9   :  { %v142_v44 = vmax.f32 %v139_v43, 0.0 }
  0xeb   :  { %297 = vmatmul.mubr.msk.f32.vlgmr.msra.gmra.mxu1 %vm154_vm1, %v142_v44 }
 0x1ab   :  { %v224_v46 = vpop.f32.mrf.mxu1 }
 0x1ac   :  { %v225_v47 = vadd.f32 %v246_v45, %v224_v46 }
 0x1ad   :  { %v298_v48 = vpop.f32.mrf.mxu1 }
 0x1ae   :  { %229 = vst.msk [vmem:[#allocation2] sm:$0x3] %vm228_vm2, %v225_v47 }
 0x1af   :  { %313 = shalt.err (!%p310_p4)
}
 0x1b0   :  { %239 = dma.vmem_to_hbm [thread:$0]  %s237_s3, 32, %s482_s5, [#allocation3]  }
 0x1b1   :  { %322 = dma.done.wait [#allocation3], 32  }
 0x1b2   :  { %323 = vsyncadd [#allocation3], 4294967264 }
 0x1b3   :  { %243 = vsyncpa [#allocation3], 1 }

// kernel: convnet_forward.2
= control target key start
LH: loop header
LB: loop body
LE: loop exit
PB: predicated region body
PF: predicated region fallthrough
CT: control target
= control target key end

     0   :  { %s7442_s18 = smov 0   ;;  %s9908_s0 = inlined_call_operand.vmem [shape: f32[2,16,16,4], index: 0, kind: input, shape index: {}]   ;;  %s9909_s1 = inlined_call_operand.vmem [shape: f32[9,4,8], index: 1, kind: input, shape index: {}]   ;;  %s9910_s2 = inlined_call_operand.vmem [shape: f32[1,8], index: 2, kind: input, shape index: {}]   ;;  %s9911_s3 = inlined_call_operand.vmem [shape: f32[9,8,16], index: 3, kind: input, shape index: {}]   ;;  %s9912_s4 = inlined_call_operand.vmem [shape: f32[1,16], index: 4, kind: input, shape index: {}]   ;;  %s9913_s5 = inlined_call_operand.vmem [shape: f32[2,4,4,16], index: 5, kind: output, shape index: {}]  }
   0x1 LB: > { %s6036_s19 = sadd.s32 4294967295, %s7409_s18   ;;  %p6040_p0 = scmp.ge.s32.totalorder %s7409_s18, 1  ;;  %s7409_s18 = sphi %s7442_s18, %s15_s18  }
   0x2   : > { %p187_p1 = scmp.lt.s32.totalorder %s7409_s18, 3 }
   0x4   : > { %p188_p2 = pnand %p6040_p0, %p187_p1 }
   0x6   : > { %191 = sbr.rel (%p188_p2) target bundleno = 965 (0x3c5), region = 40 }
   0xb   : > { %v7453_v0 = vld [vmem:[%s9909_s1 + $0x4] sm:$0xf]  ;;  %vm509_vm0 = vcmask 1043456   ;;  %vm225_vm1 = vcmask 31744   ;;  %vm228_vm2 = vcmask 25600   ;;  %v9914_v1 = vmov 0.0  }
   0xc   : > { %6814 = vmatprep.subr.msk.mxu0 %vm509_vm0, %v7453_v0  ;;  %226 = vst.msk [vmem:[#allocation2] sm:$0xff] %vm225_vm1, %v9914_v1  ;;  %227 = vst.msk [vmem:[#allocation2 + $0x8] sm:$0xff] %vm225_vm1, %v9914_v1  ;;  %v6112_v2 = vld [vmem:[%s9909_s1 + $0x8] sm:$0xf]  ;;  %7390 = vmatprep.subr.msk.mxu1 %vm509_vm0, %v7453_v0  ;;  %p215_p3 = scmp.lt.s32.totalorder %s6036_s19, 1  ;;  %vm3880_vm3 = vcmask 64512  }
   0xd   : > { %230 = vst.msk [vmem:[#allocation2 + $0x18] sm:$0xff] %vm225_vm1, %v9914_v1  ;;  %231 = vst.msk [vmem:[#allocation2 + $0x20] sm:$0xff] %vm225_vm1, %v9914_v1  ;;  %v7575_v3 = vld [vmem:[%s9909_s1] sm:$0xf]  ;;  %6815 = vmatpush3.msk.msra.mxu0 %vm509_vm0, %v7453_v0  ;;  %7391 = vmatpush3.msk.msra.mxu1 %vm509_vm0, %v7453_v0  ;;  %v7600_v7 = vld [vmem:[%s9909_s1 + $0x10] sm:$0xf] }
   0xe   : > { %233 = vst.msk [vmem:[#allocation2 + $0x30] sm:$0xff] %vm225_vm1, %v9914_v1  ;;  %234 = vst.msk [vmem:[#allocation2 + $0x38] sm:$0xff] %vm225_vm1, %v9914_v1  ;;  %6914 = vmatprep.subr.msk.mxu0 %vm509_vm0, %v6112_v2  ;;  %s10140_s19 = smov (!%p215_p3, %s6036_s19), 1  ;;  %6864 = vmatprep.subr.msk.mxu1 %vm509_vm0, %v7575_v3  ;;  %v6146_v33 = vld [vmem:[%s9909_s1 + $0xc] sm:$0xf]  ;;  %vm3898_vm4 = vcmask 58368  }
   0xf   : > { %236 = vst.msk [vmem:[#allocation2 + $0x48] sm:$0xff] %vm225_vm1, %v9914_v1  ;;  %237 = vst.msk [vmem:[#allocation2 + $0x50] sm:$0xff] %vm225_vm1, %v9914_v1  ;;  %s6434_s26 = sshll.u32 %s10140_s19, 8  ;;  %v7696_v42 = vld [vmem:[%s9909_s1 + $0x14] sm:$0xf]  ;;  %vm3983_vm5 = vcmask 57344  }
  0x10   : > { %239 = vst.msk [vmem:[#allocation2 + $0x60] sm:$0xff] %vm225_vm1, %v9914_v1  ;;  %240 = vst.msk [vmem:[#allocation2 + $0x68] sm:$0xff] %vm225_vm1, %v9914_v1  ;;  %s7592_s29 = scalar_lea.vmem %s9908_s0, %s6434_s26  ;;  %vm5830_vm6 = vcmask 130048   ;;  %vm5839_vm7 = vcmask 123904   ;;  %vm5868_vm8 = vcmask 122880   ;;  %s6435_s22 = sshll.u32 %s10140_s19, 4 }
  0x11   : > { %242 = vst.msk [vmem:[#allocation2 + $0x78] sm:$0xff] %vm225_vm1, %v9914_v1  ;;  %243 = vst.msk [vmem:[#allocation2 + $0x80] sm:$0xff] %vm225_vm1, %v9914_v1  ;;  %v281_v4 = vld [vmem:[%s7592_s29] sm:$0xff]  ;;  %v307_v5 = vld [vmem:[%s7592_s29 + $0xd0] sm:$0xff]  ;;  %s9863_s25 = scalar_lea.vmem %s9913_s5, %s6435_s22 }
  0x12   : > { %245 = vst.msk [vmem:[#allocation2 + $0x90] sm:$0xff] %vm225_vm1, %v9914_v1  ;;  %246 = vst.msk [vmem:[#allocation2 + $0x98] sm:$0xff] %vm225_vm1, %v9914_v1  ;;  %v282_v6 = vld [vmem:[%s7592_s29 + $0x8] sm:$0xff]  ;;  %v308_v10 = vld [vmem:[%s7592_s29 + $0xd8] sm:$0xff] }
  0x13   : > { %248 = vst.msk [vmem:[#allocation2 + $0xa8] sm:$0xff] %vm225_vm1, %v9914_v1  ;;  %249 = vst.msk [vmem:[#allocation2 + $0xb0] sm:$0xff] %vm225_vm1, %v9914_v1  ;;  %v379_v8 = vld [vmem:[#allocation2 + $0x1] sm:$0xff]  ;;  %v283_v11 = vld [vmem:[%s7592_s29 + $0x10] sm:$0xff] }
  0x14   : > { %251 = vst.msk [vmem:[#allocation2 + $0xc0] sm:$0xff] %vm225_vm1, %v9914_v1  ;;  %252 = vst.msk [vmem:[#allocation2 + $0xc8] sm:$0xff] %vm225_vm1, %v9914_v1  ;;  %6816 = vmatprep.mubr.msk.f32.mxu0 %vm225_vm1, %v379_v8  ;;  %v309_v12 = vld [vmem:[%s7592_s29 + $0xe0] sm:$0xff]  ;;  %v284_v13 = vld [vmem:[%s7592_s29 + $0x18] sm:$0xff] }
  0x15   : > { %254 = vst.msk [vmem:[#allocation2 + $0xd8] sm:$0xff] %vm225_vm1, %v9914_v1  ;;  %255 = vst.msk [vmem:[#allocation2 + $0xe0] sm:$0xff] %vm225_vm1, %v9914_v1  ;;  %v310_v14 = vld [vmem:[%s7592_s29 + $0xe8] sm:$0xff]  ;;  %v285_v15 = vld [vmem:[%s7592_s29 + $0x20] sm:$0xff] }
  0x16   : > { %257 = vst.msk [vmem:[#allocation2 + $0xf0] sm:$0xff] %vm225_vm1, %v9914_v1  ;;  %258 = vst.msk [vmem:[#allocation2 + $0xf8] sm:$0xff] %vm225_vm1, %v9914_v1  ;;  %v286_v16 = vld [vmem:[%s7592_s29 + $0x28] sm:$0xff]  ;;  %v287_v17 = vld [vmem:[%s7592_s29 + $0x30] sm:$0xff] }
  0x17   : > { %260 = vst.msk [vmem:[#allocation2 + $0x108] sm:$0xff] %vm225_vm1, %v9914_v1  ;;  %261 = vst.msk [vmem:[#allocation2 + $0x110] sm:$0xff] %vm225_vm1, %v9914_v1  ;;  %v288_v18 = vld [vmem:[%s7592_s29 + $0x38] sm:$0xff]  ;;  %v289_v19 = vld [vmem:[%s7592_s29 + $0x40] sm:$0xff] }
  0x18   : > { %263 = vst.msk [vmem:[#allocation2 + $0x120] sm:$0xff] %vm225_vm1, %v9914_v1  ;;  %264 = vst.msk [vmem:[#allocation2 + $0x128] sm:$0xff] %vm225_vm1, %v9914_v1  ;;  %v290_v20 = vld [vmem:[%s7592_s29 + $0x48] sm:$0xff]  ;;  %v291_v21 = vld [vmem:[%s7592_s29 + $0x50] sm:$0xff] }
  0x19   : > { %266 = vst.msk [vmem:[#allocation2 + $0x138] sm:$0xff] %vm225_vm1, %v9914_v1  ;;  %267 = vst.msk [vmem:[#allocation2 + $0x140] sm:$0xff] %vm225_vm1, %v9914_v1  ;;  %v292_v22 = vld [vmem:[%s7592_s29 + $0x58] sm:$0xff]  ;;  %v293_v23 = vld [vmem:[%s7592_s29 + $0x60] sm:$0xff] }
  0x1a   : > { %269 = vst.msk [vmem:[#allocation2 + $0x150] sm:$0xff] %vm225_vm1, %v9914_v1  ;;  %270 = vst.msk [vmem:[#allocation2 + $0x158] sm:$0xff] %vm225_vm1, %v9914_v1  ;;  %v294_v24 = vld [vmem:[%s7592_s29 + $0x68] sm:$0xff]  ;;  %v295_v25 = vld [vmem:[%s7592_s29 + $0x70] sm:$0xff] }
  0x1b   : > { %272 = vst.msk [vmem:[#allocation2 + $0x168] sm:$0xff] %vm225_vm1, %v9914_v1  ;;  %273 = vst.msk [vmem:[#allocation2 + $0x170] sm:$0xff] %vm225_vm1, %v9914_v1  ;;  %v296_v26 = vld [vmem:[%s7592_s29 + $0x78] sm:$0xff]  ;;  %v346_v37 = vld [vmem:[#allocation2] sm:$0xff] }
  0x1c   : > { %275 = vst.msk [vmem:[#allocation2 + $0x180] sm:$0xff] %vm225_vm1, %v9914_v1  ;;  %276 = vst.msk [vmem:[#allocation2 + $0x188] sm:$0xff] %vm225_vm1, %v9914_v1  ;;  %v347_v39 = vld [vmem:[#allocation2 + $0x8] sm:$0xff]  ;;  %v297_v44 = vld [vmem:[%s7592_s29 + $0x80] sm:$0xff] }
  0x1d   : > { %278 = vst.msk [vmem:[#allocation2 + $0x198] sm:$0xff] %vm225_vm1, %v9914_v1  ;;  %279 = vst.msk [vmem:[#allocation2 + $0x1a0] sm:$0xff] %vm225_vm1, %v9914_v1  ;;  %v298_v45 = vld [vmem:[%s7592_s29 + $0x88] sm:$0xff]  ;;  %v299_v48 = vld [vmem:[%s7592_s29 + $0x90] sm:$0xff] }
  0x1e   : > { %229 = vst.msk [vmem:[#allocation2 + $0x10] sm:$0x3] %vm228_vm2, %v9914_v1  ;;  %232 = vst.msk [vmem:[#allocation2 + $0x28] sm:$0x3] %vm228_vm2, %v9914_v1  ;;  %v300_v50 = vld [vmem:[%s7592_s29 + $0x98] sm:$0xff]  ;;  %v301_v51 = vld [vmem:[%s7592_s29 + $0xa0] sm:$0xff] }
  0x1f   : > { %235 = vst.msk [vmem:[#allocation2 + $0x40] sm:$0x3] %vm228_vm2, %v9914_v1  ;;  %238 = vst.msk [vmem:[#allocation2 + $0x58] sm:$0x3] %vm228_vm2, %v9914_v1  ;;  %v302_v52 = vld [vmem:[%s7592_s29 + $0xa8] sm:$0xff]  ;;  %v303_v53 = vld [vmem:[%s7592_s29 + $0xb0] sm:$0xff] }
  0x20   : > { %241 = vst.msk [vmem:[#allocation2 + $0x70] sm:$0x3] %vm228_vm2, %v9914_v1  ;;  %244 = vst.msk [vmem:[#allocation2 + $0x88] sm:$0x3] %vm228_vm2, %v9914_v1  ;;  %v304_v54 = vld [vmem:[%s7592_s29 + $0xb8] sm:$0xff]  ;;  %v305_v55 = vld [vmem:[%s7592_s29 + $0xc0] sm:$0xff] }
  0x21   : > { %247 = vst.msk [vmem:[#allocation2 + $0xa0] sm:$0x3] %vm228_vm2, %v9914_v1  ;;  %250 = vst.msk [vmem:[#allocation2 + $0xb8] sm:$0x3] %vm228_vm2, %v9914_v1  ;;  %v306_v58 = vld [vmem:[%s7592_s29 + $0xc8] sm:$0xff] }
  0x22   : > { %253 = vst.msk [vmem:[#allocation2 + $0xd0] sm:$0x3] %vm228_vm2, %v9914_v1  ;;  %256 = vst.msk [vmem:[#allocation2 + $0xe8] sm:$0x3] %vm228_vm2, %v9914_v1 }
  0x23   : > { %259 = vst.msk [vmem:[#allocation2 + $0x100] sm:$0x3] %vm228_vm2, %v9914_v1  ;;  %262 = vst.msk [vmem:[#allocation2 + $0x118] sm:$0x3] %vm228_vm2, %v9914_v1 }
  0x24   : > { %265 = vst.msk [vmem:[#allocation2 + $0x130] sm:$0x3] %vm228_vm2, %v9914_v1  ;;  %268 = vst.msk [vmem:[#allocation2 + $0x148] sm:$0x3] %vm228_vm2, %v9914_v1 }
  0x25   : > { %271 = vst.msk [vmem:[#allocation2 + $0x160] sm:$0x3] %vm228_vm2, %v9914_v1  ;;  %274 = vst.msk [vmem:[#allocation2 + $0x178] sm:$0x3] %vm228_vm2, %v9914_v1  ;;  %v380_v9 = vld [vmem:[#allocation2 + $0x9] sm:$0xff] }
  0x26   : > { %277 = vst.msk [vmem:[#allocation2 + $0x190] sm:$0x3] %vm228_vm2, %v9914_v1  ;;  %280 = vst.msk [vmem:[#allocation2 + $0x1a8] sm:$0x3] %vm228_vm2, %v9914_v1  ;;  %6817 = vmatmul.mubr.msk.f32.vlgmr.msra.gmra.mxu0 %vm225_vm1, %v380_v9 }
  0x27   : > { %314 = vst.msk [vmem:[#allocation2 + $0x19] sm:$0xff] %vm225_vm1, %v281_v4  ;;  %340 = vst.msk [vmem:[#allocation2 + $0x151] sm:$0xff] %vm225_vm1, %v307_v5  ;;  %6915 = vmatpush3.msk.msra.mxu0 %vm509_vm0, %v6112_v2 }
  0x28   : > { %315 = vst.msk [vmem:[#allocation2 + $0x21] sm:$0xff] %vm225_vm1, %v282_v6  ;;  %341 = vst.msk [vmem:[#allocation2 + $0x159] sm:$0xff] %vm225_vm1, %v308_v10  ;;  %7014 = vmatprep.subr.msk.mxu0 %vm509_vm0, %v7600_v7 }
  0x29   : > { %316 = vst.msk [vmem:[#allocation2 + $0x31] sm:$0xff] %vm225_vm1, %v283_v11  ;;  %342 = vst.msk [vmem:[#allocation2 + $0x169] sm:$0xff] %vm225_vm1, %v309_v12 }
  0x2a   : > { %317 = vst.msk [vmem:[#allocation2 + $0x39] sm:$0xff] %vm225_vm1, %v284_v13  ;;  %343 = vst.msk [vmem:[#allocation2 + $0x171] sm:$0xff] %vm225_vm1, %v310_v14 }
  0x2b   : > { %318 = vst.msk [vmem:[#allocation2 + $0x49] sm:$0xff] %vm225_vm1, %v285_v15  ;;  %319 = vst.msk [vmem:[#allocation2 + $0x51] sm:$0xff] %vm225_vm1, %v286_v16  ;;  %v311_v15 = vld [vmem:[%s7592_s29 + $0xf0] sm:$0xff]  ;;  %v312_v16 = vld [vmem:[%s7592_s29 + $0xf8] sm:$0xff] }
  0x2c   : > { %320 = vst.msk [vmem:[#allocation2 + $0x61] sm:$0xff] %vm225_vm1, %v287_v17  ;;  %321 = vst.msk [vmem:[#allocation2 + $0x69] sm:$0xff] %vm225_vm1, %v288_v18 }
  0x2d   : > { %322 = vst.msk [vmem:[#allocation2 + $0x79] sm:$0xff] %vm225_vm1, %v289_v19  ;;  %323 = vst.msk [vmem:[#allocation2 + $0x81] sm:$0xff] %vm225_vm1, %v290_v20 }
  0x2e   : > { %324 = vst.msk [vmem:[#allocation2 + $0x91] sm:$0xff] %vm225_vm1, %v291_v21  ;;  %325 = vst.msk [vmem:[#allocation2 + $0x99] sm:$0xff] %vm225_vm1, %v292_v22  ;;  %v7641_v27 = vld [vmem:[#allocation2 + $0x19] sm:$0xff]  ;;  %v7643_v28 = vld [vmem:[#allocation2 + $0x151] sm:$0xff] }
  0x2f   : > { %326 = vst.msk [vmem:[#allocation2 + $0xa9] sm:$0xff] %vm225_vm1, %v293_v23  ;;  %9967 = vst [vmem:[#allocation6_spill] sm:$0xff] %v7643_v28  ;;  %v7645_v29 = vld [vmem:[#allocation2 + $0x21] sm:$0xff]  ;;  %6819 = vmatprep.mubr.msk.f32.mxu0 %vm225_vm1, %v7641_v27  ;;  %6858 = vmatprep.mubr.msk.f32.mxu1 %vm225_vm1, %v7643_v28  ;;  %v7654_v30 = vld [vmem:[#allocation2 + $0x159] sm:$0xff] }
  0x30   : > { %327 = vst.msk [vmem:[#allocation2 + $0xb1] sm:$0xff] %vm225_vm1, %v294_v24  ;;  %328 = vst.msk [vmem:[#allocation2 + $0xc1] sm:$0xff] %vm225_vm1, %v295_v25  ;;  %6820 = vmatmul.mubr.msk.f32.gmra.mxu0 %vm225_vm1, %v7645_v29  ;;  %6859 = vmatmul.mubr.msk.f32.vlgmr.msra.gmra.mxu1 %vm225_vm1, %v7654_v30  ;;  %v7660_v31 = vld [vmem:[#allocation2 + $0x31] sm:$0xff]  ;;  %v7662_v32 = vld [vmem:[#allocation2 + $0x169] sm:$0xff] }
  0x31   : > { %329 = vst.msk [vmem:[#allocation2 + $0xc9] sm:$0xff] %vm225_vm1, %v296_v26  ;;  %9968 = vst [vmem:[#allocation7_spill] sm:$0xff] %v7654_v30  ;;  %6822 = vmatprep.mubr.msk.f32.mxu0 %vm225_vm1, %v7660_v31  ;;  %6861 = vmatprep.mubr.msk.f32.mxu1 %vm225_vm1, %v7662_v32  ;;  %v7671_v34 = vld [vmem:[#allocation2 + $0x39] sm:$0xff]  ;;  %v7673_v35 = vld [vmem:[#allocation2 + $0x171] sm:$0xff] }
  0x32   : > { %9969 = vst [vmem:[#allocation8_spill] sm:$0xff] %v7662_v32  ;;  %9970 = vst [vmem:[#allocation9_spill] sm:$0xff] %v7673_v35  ;;  %v7675_v36 = vld [vmem:[#allocation2 + $0x49] sm:$0xff]  ;;  %6865 = vmatpush3.msk.msra.mxu1 %vm509_vm0, %v7575_v3  ;;  %v7687_v38 = vld [vmem:[#allocation2 + $0x51] sm:$0xff] }
  0x33   : > { %6964 = vmatprep.subr.msk.mxu1 %vm509_vm0, %v6146_v33  ;;  %v7689_v40 = vld [vmem:[#allocation2 + $0x61] sm:$0xff]  ;;  %v7691_v41 = vld [vmem:[#allocation2 + $0x18] sm:$0xff]  ;;  %v7709_v46 = vld [vmem:[#allocation2 + $0x69] sm:$0xff]  ;;  %330 = vst.msk [vmem:[#allocation2 + $0xd9] sm:$0xff] %vm225_vm1, %v297_v44 }
  0x34   : > { %6823 = vmatmul.mubr.msk.f32.gmra.mxu0 %vm225_vm1, %v7671_v34  ;;  %6862 = vmatmul.mubr.msk.f32.gmra.mxu1 %vm225_vm1, %v7673_v35  ;;  %v7701_v43 = vld [vmem:[#allocation2 + $0x20] sm:$0xff]  ;;  %v7711_v47 = vld [vmem:[#allocation2 + $0x30] sm:$0xff]  ;;  %331 = vst.msk [vmem:[#allocation2 + $0xe1] sm:$0xff] %vm225_vm1, %v298_v45  ;;  %332 = vst.msk [vmem:[#allocation2 + $0xf1] sm:$0xff] %vm225_vm1, %v299_v48 }
  0x35   : > { %6825 = vmatprep.mubr.msk.f32.mxu0 %vm225_vm1, %v7675_v36  ;;  %6866 = vmatprep.mubr.msk.f32.mxu1 %vm225_vm1, %v346_v37  ;;  %9971 = vst [vmem:[#allocation10_spill] sm:$0xff] %v7711_v47  ;;  %v7716_v49 = vld [vmem:[#allocation2 + $0x79] sm:$0xff]  ;;  %333 = vst.msk [vmem:[#allocation2 + $0xf9] sm:$0xff] %vm225_vm1, %v300_v50  ;;  %v7739_v56 = vld [vmem:[#allocation2 + $0x81] sm:$0xff] }
  0x36   : > { %334 = vst.msk [vmem:[#allocation2 + $0x109] sm:$0xff] %vm225_vm1, %v301_v51  ;;  %335 = vst.msk [vmem:[#allocation2 + $0x111] sm:$0xff] %vm225_vm1, %v302_v52  ;;  %v7741_v57 = vld [vmem:[#allocation2 + $0x38] sm:$0xff]  ;;  %v7749_v60 = vld [vmem:[#allocation2 + $0x48] sm:$0xff] }
  0x37   : > { %9972 = vst [vmem:[#allocation11_spill] sm:$0xff] %v7741_v57  ;;  %336 = vst.msk [vmem:[#allocation2 + $0x121] sm:$0xff] %vm225_vm1, %v303_v53  ;;  %v7747_v59 = vld [vmem:[#allocation2 + $0x91] sm:$0xff]  ;;  %v7760_v61 = vld [vmem:[#allocation2 + $0x99] sm:$0xff] }
  0x38   : > { %6826 = vmatmul.mubr.msk.f32.gmra.mxu0 %vm225_vm1, %v7687_v38  ;;  %6867 = vmatmul.mubr.msk.f32.vlgmr.msra.gmra.mxu1 %vm225_vm1, %v347_v39  ;;  %337 = vst.msk [vmem:[#allocation2 + $0x129] sm:$0xff] %vm225_vm1, %v304_v54  ;;  %338 = vst.msk [vmem:[#allocation2 + $0x139] sm:$0xff] %vm225_vm1, %v305_v55  ;;  %v7762_v62 = vld [vmem:[#allocation2 + $0x50] sm:$0xff]  ;;  %v7766_v0 = vld [vmem:[#allocation2 + $0x60] sm:$0xff] }
  0x39   : > { %6828 = vmatprep.mubr.msk.f32.mxu0 %vm225_vm1, %v7689_v40  ;;  %6869 = vmatprep.mubr.msk.f32.mxu1 %vm225_vm1, %v7691_v41  ;;  %9973 = vst [vmem:[#allocation12_spill] sm:$0xff] %v7749_v60  ;;  %339 = vst.msk [vmem:[#allocation2 + $0x141] sm:$0xff] %vm225_vm1, %v306_v58  ;;  %v7764_v63 = vld [vmem:[#allocation2 + $0xa9] sm:$0xff]  ;;  %v7776_v2 = vld [vmem:[#allocation2 + $0xb1] sm:$0xff] }
  0x3a   : > { %6965 = vmatpush3.msk.msra.mxu1 %vm509_vm0, %v6146_v33  ;;  %9974 = vst [vmem:[#allocation13_spill] sm:$0xff] %v7762_v62  ;;  %9975 = vst [vmem:[#allocation14_spill] sm:$0xff] %v7766_v0  ;;  %v7778_v3 = vld [vmem:[#allocation2 + $0x68] sm:$0xff]  ;;  %v7782_v5 = vld [vmem:[#allocation2 + $0x78] sm:$0xff] }
  0x3b   : > { %7064 = vmatprep.subr.msk.mxu1 %vm509_vm0, %v7696_v42  ;;  %9976 = vst [vmem:[#allocation15_spill] sm:$0xff] %v7778_v3  ;;  %v7780_v4 = vld [vmem:[#allocation2 + $0xc1] sm:$0xff]  ;;  %9977 = vst [vmem:[#allocation16_spill] sm:$0xff] %v7782_v5  ;;  %v7792_v6 = vld [vmem:[#allocation2 + $0xc9] sm:$0xff] }
  0x3c   : > { %6829 = vmatmul.mubr.msk.f32.gmra.mxu0 %vm225_vm1, %v7709_v46  ;;  %6870 = vmatmul.mubr.msk.f32.gmra.mxu1 %vm225_vm1, %v7701_v43  ;;  %v7794_v8 = vld [vmem:[#allocation2 + $0x80] sm:$0xff]  ;;  %v7798_v10 = vld [vmem:[#allocation2 + $0x90] sm:$0xff]  ;;  %v7810_v12 = vld [vmem:[#allocation2 + $0x98] sm:$0xff]  ;;  %344 = vst.msk [vmem:[#allocation2 + $0x181] sm:$0xff] %vm225_vm1, %v311_v15 }
  0x3d   : > { %6831 = vmatprep.mubr.msk.f32.mxu0 %vm225_vm1, %v7716_v49  ;;  %6872 = vmatprep.mubr.msk.f32.mxu1 %vm225_vm1, %v7711_v47  ;;  %9978 = vst [vmem:[#allocation17_spill] sm:$0xff] %v7794_v8  ;;  %v7796_v9 = vld [vmem:[#allocation2 + $0xd9] sm:$0xff]  ;;  %9979 = vst [vmem:[#allocation18_spill] sm:$0xff] %v7798_v10  ;;  %v7808_v11 = vld [vmem:[#allocation2 + $0xe1] sm:$0xff] }
  0x3e   : > { %9980 = vst [vmem:[#allocation19_spill] sm:$0xff] %v7810_v12  ;;  %v7812_v13 = vld [vmem:[#allocation2 + $0xf1] sm:$0xff]  ;;  %v7814_v14 = vld [vmem:[#allocation2 + $0xa8] sm:$0xff]  ;;  %v7826_v17 = vld [vmem:[#allocation2 + $0xf9] sm:$0xff] }
  0x3f   : > { %9981 = vst [vmem:[#allocation20_spill] sm:$0xff] %v7814_v14  ;;  %9982 = vst [vmem:[#allocation21_spill] sm:$0xff] %v7826_v17  ;;  %v7828_v18 = vld [vmem:[#allocation2 + $0xb0] sm:$0xff]  ;;  %v7834_v20 = vld [vmem:[#allocation2 + $0xc0] sm:$0xff] }
  0x40   : > { %6832 = vmatmul.mubr.msk.f32.gmra.mxu0 %vm225_vm1, %v7739_v56  ;;  %6873 = vmatmul.mubr.msk.f32.gmra.mxu1 %vm225_vm1, %v7741_v57  ;;  %9983 = vst [vmem:[#allocation22_spill] sm:$0xff] %v7828_v18  ;;  %345 = vst.msk [vmem:[#allocation2 + $0x189] sm:$0xff] %vm225_vm1, %v312_v16  ;;  %v7832_v19 = vld [vmem:[#allocation2 + $0x109] sm:$0xff]  ;;  %v7844_v21 = vld [vmem:[#allocation2 + $0x111] sm:$0xff] }
  0x41   : > { %6834 = vmatprep.mubr.msk.f32.mxu0 %vm225_vm1, %v7747_v59  ;;  %6875 = vmatprep.mubr.msk.f32.mxu1 %vm225_vm1, %v7749_v60  ;;  %9984 = vst [vmem:[#allocation23_spill] sm:$0xff] %v7832_v19  ;;  %9985 = vst [vmem:[#allocation24_spill] sm:$0xff] %v7834_v20  ;;  %v7846_v22 = vld [vmem:[#allocation2 + $0xc8] sm:$0xff]  ;;  %v7850_v24 = vld [vmem:[#allocation2 + $0xd8] sm:$0xff] }
  0x42   : > { %9986 = vst [vmem:[#allocation25_spill] sm:$0xff] %v7844_v21  ;;  %9987 = vst [vmem:[#allocation26_spill] sm:$0xff] %v7846_v22  ;;  %v7848_v23 = vld [vmem:[#allocation2 + $0x121] sm:$0xff]  ;;  %v7860_v25 = vld [vmem:[#allocation2 + $0x129] sm:$0xff] }
  0x43   : > { %9988 = vst [vmem:[#allocation27_spill] sm:$0xff] %v7848_v23  ;;  %9989 = vst [vmem:[#allocation28_spill] sm:$0xff] %v7860_v25  ;;  %v7862_v26 = vld [vmem:[#allocation2 + $0xe0] sm:$0xff]  ;;  %v7866_v37 = vld [vmem:[#allocation2 + $0xf0] sm:$0xff] }
  0x44   : > { %6835 = vmatmul.mubr.msk.f32.gmra.mxu0 %vm225_vm1, %v7760_v61  ;;  %6876 = vmatmul.mubr.msk.f32.gmra.mxu1 %vm225_vm1, %v7762_v62  ;;  %9990 = vst [vmem:[#allocation29_spill] sm:$0xff] %v7862_v26  ;;  %v7864_v33 = vld [vmem:[#allocation2 + $0x139] sm:$0xff]  ;;  %v7876_v39 = vld [vmem:[#allocation2 + $0x141] sm:$0xff]  ;;  %v7889_v50 = vld [vmem:[#allocation2 + $0x110] sm:$0xff] }
  0x45   : > { %6837 = vmatprep.mubr.msk.f32.mxu0 %vm225_vm1, %v7764_v63  ;;  %6878 = vmatprep.mubr.msk.f32.mxu1 %vm225_vm1, %v7766_v0  ;;  %9991 = vst [vmem:[#allocation30_spill] sm:$0xff] %v7864_v33  ;;  %9992 = vst [vmem:[#allocation31_spill] sm:$0xff] %v7876_v39  ;;  %v7878_v44 = vld [vmem:[#allocation2 + $0xf8] sm:$0xff]  ;;  %v7880_v45 = vld [vmem:[#allocation2 + $0x108] sm:$0xff] }
  0x46   : > { %9993 = vst [vmem:[#allocation32_spill] sm:$0xff] %v7878_v44  ;;  %v1062_v48 = vld [vmem:[#allocation2 + $0x2] sm:$0xff]  ;;  %v1063_v51 = vld [vmem:[#allocation2 + $0xa] sm:$0xff]  ;;  %v7893_v53 = vld [vmem:[#allocation2 + $0x1a] sm:$0xff] }
  0x47   : > { %v7891_v52 = vld [vmem:[#allocation2 + $0x120] sm:$0xff]  ;;  %v7898_v54 = vld [vmem:[%s9909_s1 + $0x18] sm:$0xf]  ;;  %v7907_v55 = vld [vmem:[#allocation2 + $0x128] sm:$0xff] }
  0x48   : > { %6838 = vmatmul.mubr.msk.f32.gmra.mxu0 %vm225_vm1, %v7776_v2  ;;  %6879 = vmatmul.mubr.msk.f32.gmra.mxu1 %vm225_vm1, %v7778_v3  ;;  %v7909_v58 = vld [vmem:[#allocation2 + $0x22] sm:$0xff]  ;;  %v7913_v15 = vld [vmem:[#allocation2 + $0x138] sm:$0xff]  ;;  %v7933_v1 = vld [vmem:[#allocation2 + $0x4a] sm:$0xff] }
  0x49   : > { %6840 = vmatprep.mubr.msk.f32.mxu0 %vm225_vm1, %v7780_v4  ;;  %6881 = vmatprep.mubr.msk.f32.mxu1 %vm225_vm1, %v7782_v5  ;;  %v7915_v16 = vld [vmem:[#allocation2 + $0x32] sm:$0xff]  ;;  %v7947_v30 = vld [vmem:[#allocation2 + $0x168] sm:$0xff] }
  0x4a   : > { %v7943_v35 = vld [vmem:[#allocation2 + $0x158] sm:$0xff]  ;;  %v7949_v28 = vld [vmem:[#allocation2 + $0x62] sm:$0xff] }
  0x4b   : > { %v7945_v32 = vld [vmem:[#allocation2 + $0x52] sm:$0xff] }
  0x4c   : > { %6841 = vmatmul.mubr.msk.f32.gmra.mxu0 %vm225_vm1, %v7792_v6  ;;  %6882 = vmatmul.mubr.msk.f32.gmra.mxu1 %vm225_vm1, %v7794_v8 }
  0x4d   : > { %6843 = vmatprep.mubr.msk.f32.mxu0 %vm225_vm1, %v7796_v9  ;;  %6884 = vmatprep.mubr.msk.f32.mxu1 %vm225_vm1, %v7798_v10 }
  0x50   : > { %6844 = vmatmul.mubr.msk.f32.gmra.mxu0 %vm225_vm1, %v7808_v11  ;;  %6885 = vmatmul.mubr.msk.f32.gmra.mxu1 %vm225_vm1, %v7810_v12 }
  0x51   : > { %6846 = vmatprep.mubr.msk.f32.mxu0 %vm225_vm1, %v7812_v13  ;;  %6887 = vmatprep.mubr.msk.f32.mxu1 %vm225_vm1, %v7814_v14 }
  0x54   : > { %6847 = vmatmul.mubr.msk.f32.gmra.mxu0 %vm225_vm1, %v7826_v17  ;;  %6888 = vmatmul.mubr.msk.f32.gmra.mxu1 %vm225_vm1, %v7828_v18  ;;  %v7992_v17 = vld [vmem:[#allocation2 + $0xaa] sm:$0xff] }
  0x55   : > { %6849 = vmatprep.mubr.msk.f32.mxu0 %vm225_vm1, %v7832_v19  ;;  %6890 = vmatprep.mubr.msk.f32.mxu1 %vm225_vm1, %v7834_v20  ;;  %v7984_v19 = vld [vmem:[%s9909_s1 + $0x1c] sm:$0xf]  ;;  %9998 = vst [vmem:[#allocation37_spill] sm:$0xff] %v7992_v17 }
  0x58   : > { %6850 = vmatmul.mubr.msk.f32.gmra.mxu0 %vm225_vm1, %v7844_v21  ;;  %6891 = vmatmul.mubr.msk.f32.gmra.mxu1 %vm225_vm1, %v7846_v22  ;;  %v7975_v21 = vld [vmem:[#allocation2 + $0x92] sm:$0xff] }
  0x59   : > { %6852 = vmatprep.mubr.msk.f32.mxu0 %vm225_vm1, %v7848_v23  ;;  %6893 = vmatprep.mubr.msk.f32.mxu1 %vm225_vm1, %v7850_v24  ;;  %v7973_v23 = vld [vmem:[#allocation2 + $0x82] sm:$0xff]  ;;  %9996 = vst [vmem:[#allocation35_spill] sm:$0xff] %v7975_v21 }
  0x5a   : > { %9995 = vst [vmem:[#allocation34_spill] sm:$0xff] %v7973_v23 }
  0x5c   : > { %6853 = vmatmul.mubr.msk.f32.gmra.mxu0 %vm225_vm1, %v7860_v25  ;;  %6894 = vmatmul.mubr.msk.f32.gmra.mxu1 %vm225_vm1, %v7862_v26  ;;  %v7963_v25 = vld [vmem:[#allocation2 + $0x7a] sm:$0xff] }
  0x5d   : > { %6855 = vmatprep.mubr.msk.f32.mxu0 %vm225_vm1, %v7864_v33  ;;  %6896 = vmatprep.mubr.msk.f32.mxu1 %vm225_vm1, %v7866_v37  ;;  %v7961_v33 = vld [vmem:[#allocation2 + $0x6a] sm:$0xff]  ;;  %9994 = vst [vmem:[#allocation33_spill] sm:$0xff] %v7963_v25 }
  0x60   : > { %6856 = vmatmul.mubr.msk.f32.gmra.mxu0 %vm225_vm1, %v7876_v39  ;;  %6897 = vmatmul.mubr.msk.f32.gmra.mxu1 %vm225_vm1, %v7878_v44  ;;  %v7959_v39 = vld [vmem:[#allocation2 + $0x170] sm:$0xff] }
  0x61   : > { %6899 = vmatprep.mubr.msk.f32.mxu1 %vm225_vm1, %v7880_v45  ;;  %6916 = vmatprep.mubr.msk.f32.mxu0 %vm225_vm1, %v1062_v48  ;;  %v7929_v48 = vld [vmem:[#allocation2 + $0x3a] sm:$0xff] }
  0x64   : > { %6900 = vmatmul.mubr.msk.f32.gmra.mxu1 %vm225_vm1, %v7889_v50  ;;  %6917 = vmatmul.mubr.msk.f32.vlgmr.msra.gmra.mxu0 %vm225_vm1, %v1063_v51  ;;  %v7931_v51 = vld [vmem:[#allocation2 + $0x150] sm:$0xff] }
  0x65   : > { %7015 = vmatpush3.msk.msra.mxu0 %vm509_vm0, %v7600_v7  ;;  %6902 = vmatprep.mubr.msk.f32.mxu1 %vm225_vm1, %v7891_v52  ;;  %v7927_v7 = vld [vmem:[#allocation2 + $0x140] sm:$0xff] }
  0x66   : > { %6919 = vmatprep.mubr.msk.f32.mxu0 %vm225_vm1, %v7893_v53  ;;  %7114 = vmatprep.subr.msk.mxu0 %vm509_vm0, %v7898_v54 }
  0x68   : > { %6903 = vmatmul.mubr.msk.f32.gmra.mxu1 %vm225_vm1, %v7907_v55  ;;  %6920 = vmatmul.mubr.msk.f32.gmra.mxu0 %vm225_vm1, %v7909_v58 }
  0x69   : > { %6905 = vmatprep.mubr.msk.f32.mxu1 %vm225_vm1, %v7913_v15  ;;  %6922 = vmatprep.mubr.msk.f32.mxu0 %vm225_vm1, %v7915_v16 }
  0x6c   : > { %6906 = vmatmul.mubr.msk.f32.gmra.mxu1 %vm225_vm1, %v7927_v7  ;;  %6923 = vmatmul.mubr.msk.f32.gmra.mxu0 %vm225_vm1, %v7929_v48 }
  0x6d   : > { %6908 = vmatprep.mubr.msk.f32.mxu1 %vm225_vm1, %v7931_v51  ;;  %6925 = vmatprep.mubr.msk.f32.mxu0 %vm225_vm1, %v7933_v1 }
  0x70   : > { %6909 = vmatmul.mubr.msk.f32.gmra.mxu1 %vm225_vm1, %v7943_v35  ;;  %6926 = vmatmul.mubr.msk.f32.gmra.mxu0 %vm225_vm1, %v7945_v32 }
  0x71   : > { %6911 = vmatprep.mubr.msk.f32.mxu1 %vm225_vm1, %v7947_v30  ;;  %6928 = vmatprep.mubr.msk.f32.mxu0 %vm225_vm1, %v7949_v28 }
  0x74   : > { %6912 = vmatmul.mubr.msk.f32.gmra.mxu1 %vm225_vm1, %v7959_v39  ;;  %6929 = vmatmul.mubr.msk.f32.gmra.mxu0 %vm225_vm1, %v7961_v33 }
  0x75   : > { %6931 = vmatprep.mubr.msk.f32.mxu0 %vm225_vm1, %v7963_v25  ;;  %6966 = vmatprep.mubr.msk.f32.mxu1 %vm225_vm1, %v7691_v41  ;;  %v7990_v41 = vld [vmem:[#allocation2 + $0x9a] sm:$0xff] }
  0x76   : > { %9997 = vst [vmem:[#allocation36_spill] sm:$0xff] %v7990_v41 }
  0x78   : > { %6932 = vmatmul.mubr.msk.f32.gmra.mxu0 %vm225_vm1, %v7973_v23  ;;  %6967 = vmatmul.mubr.msk.f32.vlgmr.msra.gmra.mxu1 %vm225_vm1, %v7701_v43  ;;  %v8006_v43 = vld [vmem:[#allocation2 + $0xb2] sm:$0xff] }
  0x79   : > { %6934 = vmatprep.mubr.msk.f32.mxu0 %vm225_vm1, %v7975_v21  ;;  %6969 = vmatprep.mubr.msk.f32.mxu1 %vm225_vm1, %v7711_v47  ;;  %9999 = vst [vmem:[#allocation38_spill] sm:$0xff] %v8006_v43  ;;  %v8008_v47 = vld [vmem:[#allocation2 + $0xc2] sm:$0xff] }
  0x7a   : > { %7065 = vmatpush3.msk.msra.mxu1 %vm509_vm0, %v7696_v42  ;;  %10000 = vst [vmem:[#allocation39_spill] sm:$0xff] %v8008_v47  ;;  %v8018_v42 = vld [vmem:[#allocation2 + $0xca] sm:$0xff] }
  0x7b   : > { %7164 = vmatprep.subr.msk.mxu1 %vm509_vm0, %v7984_v19  ;;  %10001 = vst [vmem:[#allocation40_spill] sm:$0xff] %v8018_v42 }
  0x7c   : > { %6935 = vmatmul.mubr.msk.f32.gmra.mxu0 %vm225_vm1, %v7990_v41  ;;  %6970 = vmatmul.mubr.msk.f32.gmra.mxu1 %vm225_vm1, %v7741_v57  ;;  %v8020_v57 = vld [vmem:[#allocation2 + $0xda] sm:$0xff] }
  0x7d   : > { %6937 = vmatprep.mubr.msk.f32.mxu0 %vm225_vm1, %v7992_v17  ;;  %6972 = vmatprep.mubr.msk.f32.mxu1 %vm225_vm1, %v7749_v60  ;;  %10002 = vst [vmem:[#allocation41_spill] sm:$0xff] %v8020_v57  ;;  %v8032_v60 = vld [vmem:[#allocation2 + $0xf2] sm:$0xff] }
  0x7e   : > { %10004 = vst [vmem:[#allocation43_spill] sm:$0xff] %v8032_v60 }
  0x80   : > { %6938 = vmatmul.mubr.msk.f32.gmra.mxu0 %vm225_vm1, %v8006_v43  ;;  %6973 = vmatmul.mubr.msk.f32.gmra.mxu1 %vm225_vm1, %v7762_v62  ;;  %v8030_v62 = vld [vmem:[#allocation2 + $0xe2] sm:$0xff] }
  0x81   : > { %6940 = vmatprep.mubr.msk.f32.mxu0 %vm225_vm1, %v8008_v47  ;;  %6975 = vmatprep.mubr.msk.f32.mxu1 %vm225_vm1, %v7766_v0  ;;  %10003 = vst [vmem:[#allocation42_spill] sm:$0xff] %v8030_v62  ;;  %v8044_v0 = vld [vmem:[#allocation2 + $0x10a] sm:$0xff] }
  0x84   : > { %6941 = vmatmul.mubr.msk.f32.gmra.mxu0 %vm225_vm1, %v8018_v42  ;;  %6976 = vmatmul.mubr.msk.f32.gmra.mxu1 %vm225_vm1, %v7778_v3  ;;  %v8042_v3 = vld [vmem:[#allocation2 + $0xfa] sm:$0xff] }
  0x85   : > { %6943 = vmatprep.mubr.msk.f32.mxu0 %vm225_vm1, %v8020_v57  ;;  %6978 = vmatprep.mubr.msk.f32.mxu1 %vm225_vm1, %v7782_v5  ;;  %v8056_v5 = vld [vmem:[#allocation2 + $0x122] sm:$0xff] }
  0x88   : > { %6944 = vmatmul.mubr.msk.f32.gmra.mxu0 %vm225_vm1, %v8030_v62  ;;  %6979 = vmatmul.mubr.msk.f32.gmra.mxu1 %vm225_vm1, %v7794_v8  ;;  %v8054_v8 = vld [vmem:[#allocation2 + $0x112] sm:$0xff] }
  0x89   : > { %6946 = vmatprep.mubr.msk.f32.mxu0 %vm225_vm1, %v8032_v60  ;;  %6981 = vmatprep.mubr.msk.f32.mxu1 %vm225_vm1, %v7798_v10  ;;  %v8068_v10 = vld [vmem:[#allocation2 + $0x13a] sm:$0xff] }
  0x8c   : > { %6947 = vmatmul.mubr.msk.f32.gmra.mxu0 %vm225_vm1, %v8042_v3  ;;  %6982 = vmatmul.mubr.msk.f32.gmra.mxu1 %vm225_vm1, %v7810_v12  ;;  %v8066_v12 = vld [vmem:[#allocation2 + $0x12a] sm:$0xff] }
  0x8d   : > { %6949 = vmatprep.mubr.msk.f32.mxu0 %vm225_vm1, %v8044_v0  ;;  %6984 = vmatprep.mubr.msk.f32.mxu1 %vm225_vm1, %v7814_v14  ;;  %v8080_v14 = vld [vmem:[#allocation2 + $0x152] sm:$0xff] }
  0x90   : > { %6950 = vmatmul.mubr.msk.f32.gmra.mxu0 %vm225_vm1, %v8054_v8  ;;  %6985 = vmatmul.mubr.msk.f32.gmra.mxu1 %vm225_vm1, %v7828_v18  ;;  %v8078_v18 = vld [vmem:[#allocation2 + $0x142] sm:$0xff] }
  0x91   : > { %6952 = vmatprep.mubr.msk.f32.mxu0 %vm225_vm1, %v8056_v5  ;;  %6987 = vmatprep.mubr.msk.f32.mxu1 %vm225_vm1, %v7834_v20  ;;  %v8092_v20 = vld [vmem:[#allocation2 + $0x16a] sm:$0xff] }
  0x94   : > { %6953 = vmatmul.mubr.msk.f32.gmra.mxu0 %vm225_vm1, %v8066_v12  ;;  %6988 = vmatmul.mubr.msk.f32.gmra.mxu1 %vm225_vm1, %v7846_v22  ;;  %v8090_v22 = vld [vmem:[#allocation2 + $0x15a] sm:$0xff] }
  0x95   : > { %6955 = vmatprep.mubr.msk.f32.mxu0 %vm225_vm1, %v8068_v10  ;;  %6990 = vmatprep.mubr.msk.f32.mxu1 %vm225_vm1, %v7850_v24 }
  0x98   : > { %6956 = vmatmul.mubr.msk.f32.gmra.mxu0 %vm225_vm1, %v8078_v18  ;;  %6991 = vmatmul.mubr.msk.f32.gmra.mxu1 %vm225_vm1, %v7862_v26  ;;  %v8102_v26 = vld [vmem:[#allocation2 + $0x172] sm:$0xff] }
  0x99   : > { %6958 = vmatprep.mubr.msk.f32.mxu0 %vm225_vm1, %v8080_v14  ;;  %6993 = vmatprep.mubr.msk.f32.mxu1 %vm225_vm1, %v7866_v37 }
  0x9c   : > { %6959 = vmatmul.mubr.msk.f32.gmra.mxu0 %vm225_vm1, %v8090_v22  ;;  %6994 = vmatmul.mubr.msk.f32.gmra.mxu1 %vm225_vm1, %v7878_v44  ;;  %v8115_v44 = vld [vmem:[%s9909_s1 + $0x20] sm:$0xf] }
  0x9d   : > { %6961 = vmatprep.mubr.msk.f32.mxu0 %vm225_vm1, %v8092_v20  ;;  %6996 = vmatprep.mubr.msk.f32.mxu1 %vm225_vm1, %v7880_v45 }
  0xa0   : > { %6962 = vmatmul.mubr.msk.f32.gmra.mxu0 %vm225_vm1, %v8102_v26  ;;  %6997 = vmatmul.mubr.msk.f32.gmra.mxu1 %vm225_vm1, %v7889_v50 }
  0xa1   : > { %6999 = vmatprep.mubr.msk.f32.mxu1 %vm225_vm1, %v7891_v52  ;;  %7016 = vmatprep.mubr.msk.f32.mxu0 %vm225_vm1, %v7641_v27  ;;  %v8145_v27 = vld [vmem:[#allocation2 + $0x180] sm:$0xff] }
  0xa4   : > { %7000 = vmatmul.mubr.msk.f32.gmra.mxu1 %vm225_vm1, %v7907_v55  ;;  %7017 = vmatmul.mubr.msk.f32.vlgmr.msra.gmra.mxu0 %vm225_vm1, %v7645_v29  ;;  %v8155_v29 = vld [vmem:[#allocation2 + $0x188] sm:$0xff] }
  0xa5   : > { %7115 = vmatpush3.msk.msra.mxu0 %vm509_vm0, %v7898_v54  ;;  %7002 = vmatprep.mubr.msk.f32.mxu1 %vm225_vm1, %v7913_v15  ;;  %v10007_v54 = vld [vmem:[#allocation25_spill] sm:$0xff] }
  0xa6   : > { %7019 = vmatprep.mubr.msk.f32.mxu0 %vm225_vm1, %v7660_v31  ;;  %7214 = vmatprep.subr.msk.mxu0 %vm509_vm0, %v8115_v44 }
  0xa8   : > { %7003 = vmatmul.mubr.msk.f32.gmra.mxu1 %vm225_vm1, %v7927_v7  ;;  %7020 = vmatmul.mubr.msk.f32.gmra.mxu0 %vm225_vm1, %v7671_v34 }
  0xa9   : > { %7005 = vmatprep.mubr.msk.f32.mxu1 %vm225_vm1, %v7931_v51  ;;  %7022 = vmatprep.mubr.msk.f32.mxu0 %vm225_vm1, %v7675_v36 }
  0xac   : > { %7006 = vmatmul.mubr.msk.f32.gmra.mxu1 %vm225_vm1, %v7943_v35  ;;  %7023 = vmatmul.mubr.msk.f32.gmra.mxu0 %vm225_vm1, %v7687_v38 }
  0xad   : > { %7008 = vmatprep.mubr.msk.f32.mxu1 %vm225_vm1, %v7947_v30  ;;  %7025 = vmatprep.mubr.msk.f32.mxu0 %vm225_vm1, %v7689_v40 }
  0xb0   : > { %7009 = vmatmul.mubr.msk.f32.gmra.mxu1 %vm225_vm1, %v7959_v39  ;;  %7026 = vmatmul.mubr.msk.f32.gmra.mxu0 %vm225_vm1, %v7709_v46 }
  0xb1   : > { %7011 = vmatprep.mubr.msk.f32.mxu1 %vm225_vm1, %v8145_v27  ;;  %7028 = vmatprep.mubr.msk.f32.mxu0 %vm225_vm1, %v7716_v49 }
  0xb4   : > { %7012 = vmatmul.mubr.msk.f32.gmra.mxu1 %vm225_vm1, %v8155_v29  ;;  %7029 = vmatmul.mubr.msk.f32.gmra.mxu0 %vm225_vm1, %v7739_v56 }
  0xb5   : > { %7031 = vmatprep.mubr.msk.f32.mxu0 %vm225_vm1, %v7747_v59  ;;  %7066 = vmatprep.mubr.msk.f32.mxu1 %vm225_vm1, %v7893_v53  ;;  %v10006_v53 = vld [vmem:[#allocation23_spill] sm:$0xff] }
  0xb8   : > { %7032 = vmatmul.mubr.msk.f32.gmra.mxu0 %vm225_vm1, %v7760_v61  ;;  %7067 = vmatmul.mubr.msk.f32.vlgmr.msra.gmra.mxu1 %vm225_vm1, %v7909_v58  ;;  %v10008_v58 = vld [vmem:[#allocation27_spill] sm:$0xff] }
  0xb9   : > { %7034 = vmatprep.mubr.msk.f32.mxu0 %vm225_vm1, %v7764_v63  ;;  %7069 = vmatprep.mubr.msk.f32.mxu1 %vm225_vm1, %v7915_v16 }
  0xba   : > { %7165 = vmatpush3.msk.msra.mxu1 %vm509_vm0, %v7984_v19  ;;  %v10005_v19 = vld [vmem:[#allocation21_spill] sm:$0xff] }
  0xbc   : > { %7035 = vmatmul.mubr.msk.f32.gmra.mxu0 %vm225_vm1, %v7776_v2  ;;  %7070 = vmatmul.mubr.msk.f32.gmra.mxu1 %vm225_vm1, %v7929_v48 }
  0xbd   : > { %7037 = vmatprep.mubr.msk.f32.mxu0 %vm225_vm1, %v7780_v4  ;;  %7072 = vmatprep.mubr.msk.f32.mxu1 %vm225_vm1, %v7933_v1 }
  0xc0   : > { %7038 = vmatmul.mubr.msk.f32.gmra.mxu0 %vm225_vm1, %v7792_v6  ;;  %7073 = vmatmul.mubr.msk.f32.gmra.mxu1 %vm225_vm1, %v7945_v32 }
  0xc1   : > { %7040 = vmatprep.mubr.msk.f32.mxu0 %vm225_vm1, %v7796_v9  ;;  %7075 = vmatprep.mubr.msk.f32.mxu1 %vm225_vm1, %v7949_v28 }
  0xc4   : > { %7041 = vmatmul.mubr.msk.f32.gmra.mxu0 %vm225_vm1, %v7808_v11  ;;  %7076 = vmatmul.mubr.msk.f32.gmra.mxu1 %vm225_vm1, %v7961_v33 }
  0xc5   : > { %7043 = vmatprep.mubr.msk.f32.mxu0 %vm225_vm1, %v7812_v13  ;;  %7078 = vmatprep.mubr.msk.f32.mxu1 %vm225_vm1, %v7963_v25  ;;  %v10009_v25 = vld [vmem:[#allocation28_spill] sm:$0xff] }
  0xc8   : > { %7044 = vmatmul.mubr.msk.f32.gmra.mxu0 %vm225_vm1, %v10005_v19  ;;  %7079 = vmatmul.mubr.msk.f32.gmra.mxu1 %vm225_vm1, %v7973_v23  ;;  %v10010_v23 = vld [vmem:[#allocation30_spill] sm:$0xff] }
  0xc9   : > { %7046 = vmatprep.mubr.msk.f32.mxu0 %vm225_vm1, %v10006_v53  ;;  %7081 = vmatprep.mubr.msk.f32.mxu1 %vm225_vm1, %v7975_v21  ;;  %v10011_v21 = vld [vmem:[#allocation31_spill] sm:$0xff] }
  0xcc   : > { %7047 = vmatmul.mubr.msk.f32.gmra.mxu0 %vm225_vm1, %v10007_v54  ;;  %7082 = vmatmul.mubr.msk.f32.gmra.mxu1 %vm225_vm1, %v7990_v41  ;;  %v10012_v41 = vld [vmem:[#allocation6_spill] sm:$0xff] }
  0xcd   : > { %7049 = vmatprep.mubr.msk.f32.mxu0 %vm225_vm1, %v10008_v58  ;;  %7084 = vmatprep.mubr.msk.f32.mxu1 %vm225_vm1, %v7992_v17  ;;  %v10013_v17 = vld [vmem:[#allocation7_spill] sm:$0xff] }
  0xd0   : > { %7050 = vmatmul.mubr.msk.f32.gmra.mxu0 %vm225_vm1, %v10009_v25  ;;  %7085 = vmatmul.mubr.msk.f32.gmra.mxu1 %vm225_vm1, %v8006_v43  ;;  %v10014_v43 = vld [vmem:[#allocation8_spill] sm:$0xff] }
  0xd1   : > { %7052 = vmatprep.mubr.msk.f32.mxu0 %vm225_vm1, %v10010_v23  ;;  %7087 = vmatprep.mubr.msk.f32.mxu1 %vm225_vm1, %v8008_v47  ;;  %v8239_v47 = vld [vmem:[#allocation2 + $0x181] sm:$0xff] }
  0xd4   : > { %7053 = vmatmul.mubr.msk.f32.gmra.mxu0 %vm225_vm1, %v10011_v21  ;;  %7088 = vmatmul.mubr.msk.f32.gmra.mxu1 %vm225_vm1, %v8018_v42  ;;  %v10015_v42 = vld [vmem:[#allocation9_spill] sm:$0xff] }
  0xd5   : > { %7055 = vmatprep.mubr.msk.f32.mxu0 %vm225_vm1, %v10012_v41  ;;  %7090 = vmatprep.mubr.msk.f32.mxu1 %vm225_vm1, %v8020_v57  ;;  %v10016_v41 = vld [vmem:[#allocation10_spill] sm:$0xff] }
  0xd6   : > { %v10033_v57 = vld [vmem:[#allocation26_spill] sm:$0xff] }
  0xd8   : > { %7056 = vmatmul.mubr.msk.f32.gmra.mxu0 %vm225_vm1, %v10013_v17  ;;  %7091 = vmatmul.mubr.msk.f32.gmra.mxu1 %vm225_vm1, %v8030_v62  ;;  %v8249_v17 = vld [vmem:[#allocation2 + $0x189] sm:$0xff] }
  0xd9   : > { %7058 = vmatprep.mubr.msk.f32.mxu0 %vm225_vm1, %v10014_v43  ;;  %7093 = vmatprep.mubr.msk.f32.mxu1 %vm225_vm1, %v8032_v60  ;;  %v8285_v43 = vld [vmem:[#allocation2 + $0x182] sm:$0xff] }
  0xda   : > { %10023 = vst [vmem:[#allocation21_spill] sm:$0xff] %v8285_v43 }
  0xdc   : > { %7059 = vmatmul.mubr.msk.f32.gmra.mxu0 %vm225_vm1, %v10015_v42  ;;  %7094 = vmatmul.mubr.msk.f32.gmra.mxu1 %vm225_vm1, %v8042_v3  ;;  %v10017_v3 = vld [vmem:[#allocation11_spill] sm:$0xff] }
  0xdd   : > { %7061 = vmatprep.mubr.msk.f32.mxu0 %vm225_vm1, %v8239_v47  ;;  %7096 = vmatprep.mubr.msk.f32.mxu1 %vm225_vm1, %v8044_v0  ;;  %v10018_v0 = vld [vmem:[#allocation12_spill] sm:$0xff] }
  0xe0   : > { %7062 = vmatmul.mubr.msk.f32.gmra.mxu0 %vm225_vm1, %v8249_v17  ;;  %7097 = vmatmul.mubr.msk.f32.gmra.mxu1 %vm225_vm1, %v8054_v8  ;;  %v10020_v8 = vld [vmem:[#allocation14_spill] sm:$0xff] }
  0xe1   : > { %7099 = vmatprep.mubr.msk.f32.mxu1 %vm225_vm1, %v8056_v5  ;;  %7116 = vmatprep.mubr.msk.f32.mxu0 %vm225_vm1, %v10016_v41  ;;  %v10019_v5 = vld [vmem:[#allocation13_spill] sm:$0xff] }
  0xe2   : > { %v10024_v41 = vld [vmem:[#allocation17_spill] sm:$0xff] }
  0xe4   : > { %7100 = vmatmul.mubr.msk.f32.gmra.mxu1 %vm225_vm1, %v8066_v12  ;;  %7117 = vmatmul.mubr.msk.f32.vlgmr.msra.gmra.mxu0 %vm225_vm1, %v10017_v3 }
  0xe5   : > { %7215 = vmatpush3.msk.msra.mxu0 %vm509_vm0, %v8115_v44  ;;  %7102 = vmatprep.mubr.msk.f32.mxu1 %vm225_vm1, %v8068_v10  ;;  %v10021_v10 = vld [vmem:[#allocation15_spill] sm:$0xff] }
  0xe6   : > { %7119 = vmatprep.mubr.msk.f32.mxu0 %vm225_vm1, %v10018_v0  ;;  %v6818_v12 = vpop.f32.mrf.mxu0 }
  0xe8   : > { %7103 = vmatmul.mubr.msk.f32.gmra.mxu1 %vm225_vm1, %v8078_v18  ;;  %7120 = vmatmul.mubr.msk.f32.gmra.mxu0 %vm225_vm1, %v10019_v5  ;;  %v10022_v18 = vld [vmem:[#allocation16_spill] sm:$0xff]  ;;  %v579_v44 = vpop.f32.mrf.mxu0 }
  0xe9   : > { %7105 = vmatprep.mubr.msk.f32.mxu1 %vm225_vm1, %v8080_v14  ;;  %7122 = vmatprep.mubr.msk.f32.mxu0 %vm225_vm1, %v10020_v8 }
  0xec   : > { %7106 = vmatmul.mubr.msk.f32.gmra.mxu1 %vm225_vm1, %v8090_v22  ;;  %7123 = vmatmul.mubr.msk.f32.gmra.mxu0 %vm225_vm1, %v10021_v10  ;;  %v10025_v22 = vld [vmem:[#allocation18_spill] sm:$0xff]  ;;  %v10029_v10 = vld [vmem:[#allocation20_spill] sm:$0xff] }
  0xed   : > { %7108 = vmatprep.mubr.msk.f32.mxu1 %vm225_vm1, %v8092_v20  ;;  %7125 = vmatprep.mubr.msk.f32.mxu0 %vm225_vm1, %v10022_v18  ;;  %v8297_v20 = vld [vmem:[#allocation2 + $0x18a] sm:$0xff] }
  0xee   : > { %10026 = vst [vmem:[#allocation23_spill] sm:$0xff] %v8297_v20 }
  0xf0   : > { %v6821_v14 = vpop.f32.mrf.mxu0  ;;  %v8287_v42 = vpop.f32.mrf.mxu1  ;;  %7109 = vmatmul.mubr.msk.f32.gmra.mxu1 %vm225_vm1, %v8102_v26  ;;  %7126 = vmatmul.mubr.msk.f32.gmra.mxu0 %vm225_vm1, %v10024_v41  ;;  %v10028_v26 = vld [vmem:[#allocation19_spill] sm:$0xff] }
  0xf1   : > { %7111 = vmatprep.mubr.msk.f32.mxu1 %vm225_vm1, %v8285_v43  ;;  %7128 = vmatprep.mubr.msk.f32.mxu0 %vm225_vm1, %v10025_v22  ;;  %v10031_v43 = vld [vmem:[#allocation22_spill] sm:$0xff] }
  0xf2   : > { %v589_v3 = vpop.f32.mrf.mxu0  ;;  %v8299_v0 = vpop.f32.mrf.mxu1 }
  0xf3   : > { %10027 = vst [vmem:[#allocation25_spill] sm:$0xff] %v8299_v0 }
  0xf4   : > { %v6824_v5 = vpop.f32.mrf.mxu0  ;;  %v8301_v8 = vpop.f32.mrf.mxu1  ;;  %7112 = vmatmul.mubr.msk.f32.gmra.mxu1 %vm225_vm1, %v8297_v20  ;;  %7129 = vmatmul.mubr.msk.f32.gmra.mxu0 %vm225_vm1, %v10028_v26  ;;  %v10032_v26 = vld [vmem:[#allocation24_spill] sm:$0xff] }
  0xf5   : > { %7131 = vmatprep.mubr.msk.f32.mxu0 %vm225_vm1, %v10029_v10  ;;  %7166 = vmatprep.mubr.msk.f32.mxu1 %vm225_vm1, %v7660_v31 }
  0xf6   : > { %v599_v18 = vpop.f32.mrf.mxu0  ;;  %v8311_v41 = vpop.f32.mrf.mxu1 }
  0xf7   : > { %10030 = vst [vmem:[#allocation27_spill] sm:$0xff] %v8311_v41 }
  0xf8   : > { %v6827_v22 = vpop.f32.mrf.mxu0  ;;  %v6868_v0 = vpop.f32.mrf.mxu1  ;;  %7132 = vmatmul.mubr.msk.f32.gmra.mxu0 %vm225_vm1, %v10031_v43  ;;  %7167 = vmatmul.mubr.msk.f32.vlgmr.msra.gmra.mxu1 %vm225_vm1, %v7671_v34 }
  0xf9   : > { %v8317_v20 = vadd.f32 %v6868_v0, %v6818_v12  ;;  %7134 = vmatprep.mubr.msk.f32.mxu0 %vm225_vm1, %v10032_v26  ;;  %7169 = vmatprep.mubr.msk.f32.mxu1 %vm225_vm1, %v7675_v36  ;;  %v10034_v26 = vld [vmem:[#allocation29_spill] sm:$0xff] }
  0xfa   : > { %v609_v31 = vpop.f32.mrf.mxu0  ;;  %v903_v10 = vpop.f32.mrf.mxu1 }
  0xfb   : > { %v8323_v60 = vadd.f32 %v903_v10, %v579_v44 }
  0xfc   : > { %v6830_v41 = vpop.f32.mrf.mxu0  ;;  %v6871_v62 = vpop.f32.mrf.mxu1  ;;  %7135 = vmatmul.mubr.msk.f32.gmra.mxu0 %vm225_vm1, %v10033_v57  ;;  %7170 = vmatmul.mubr.msk.f32.gmra.mxu1 %vm225_vm1, %v7687_v38 }
  0xfd   : > { %v8329_v34 = vadd.f32 %v6871_v62, %v6821_v14  ;;  %7137 = vmatprep.mubr.msk.f32.mxu0 %vm225_vm1, %v7850_v24  ;;  %7172 = vmatprep.mubr.msk.f32.mxu1 %vm225_vm1, %v7689_v40 }
  0xfe   : > { %v619_v36 = vpop.f32.mrf.mxu0  ;;  %v913_v12 = vpop.f32.mrf.mxu1 }
  0xff   : > { %v8335_v44 = vadd.f32 %v913_v12, %v589_v3  ;;  %v10035_v3 = vld [vmem:[#allocation32_spill] sm:$0xff] }
 0x100   : > { %v6833_v43 = vpop.f32.mrf.mxu0  ;;  %v6874_v0 = vpop.f32.mrf.mxu1  ;;  %7138 = vmatmul.mubr.msk.f32.gmra.mxu0 %vm225_vm1, %v10034_v26  ;;  %7173 = vmatmul.mubr.msk.f32.gmra.mxu1 %vm225_vm1, %v7709_v46 }
 0x101   : > { %v8341_v38 = vadd.f32 %v6874_v0, %v6824_v5  ;;  %7140 = vmatprep.mubr.msk.f32.mxu0 %vm225_vm1, %v7866_v37  ;;  %7175 = vmatprep.mubr.msk.f32.mxu1 %vm225_vm1, %v7716_v49 }
 0x102   : > { %v629_v40 = vpop.f32.mrf.mxu0  ;;  %v923_v57 = vpop.f32.mrf.mxu1 }
 0x103   : > { %v8347_v62 = vadd.f32 %v923_v57, %v599_v18 }
 0x104   : > { %v6836_v24 = vpop.f32.mrf.mxu0  ;;  %v6877_v14 = vpop.f32.mrf.mxu1  ;;  %7141 = vmatmul.mubr.msk.f32.gmra.mxu0 %vm225_vm1, %v10035_v3  ;;  %7176 = vmatmul.mubr.msk.f32.gmra.mxu1 %vm225_vm1, %v7739_v56 }
 0x105   : > { %v8353_v46 = vadd.f32 %v6877_v14, %v6827_v22  ;;  %7143 = vmatprep.mubr.msk.f32.mxu0 %vm225_vm1, %v7880_v45  ;;  %7178 = vmatprep.mubr.msk.f32.mxu1 %vm225_vm1, %v7747_v59 }
 0x106   : > { %v639_v49 = vpop.f32.mrf.mxu0  ;;  %v933_v37 = vpop.f32.mrf.mxu1 }
 0x107   : > { %v8359_v5 = vadd.f32 %v933_v37, %v609_v31 }
 0x108   : > { %v6839_v18 = vpop.f32.mrf.mxu0  ;;  %v6880_v10 = vpop.f32.mrf.mxu1  ;;  %7144 = vmatmul.mubr.msk.f32.gmra.mxu0 %vm225_vm1, %v7889_v50  ;;  %7179 = vmatmul.mubr.msk.f32.gmra.mxu1 %vm225_vm1, %v7760_v61 }
 0x109   : > { %v8365_v56 = vadd.f32 %v6880_v10, %v6830_v41  ;;  %7146 = vmatprep.mubr.msk.f32.mxu0 %vm225_vm1, %v7891_v52  ;;  %7181 = vmatprep.mubr.msk.f32.mxu1 %vm225_vm1, %v7764_v63 }
 0x10a   : > { %v649_v59 = vpop.f32.mrf.mxu0  ;;  %v943_v45 = vpop.f32.mrf.mxu1 }
 0x10b   : > { %v8371_v22 = vadd.f32 %v943_v45, %v619_v36  ;;  %v3039_v45 = vld [vmem:[#allocation2 + $0x169] sm:$0xff] }
 0x10c   : > { %v6842_v31 = vpop.f32.mrf.mxu0  ;;  %v6883_v12 = vpop.f32.mrf.mxu1  ;;  %7147 = vmatmul.mubr.msk.f32.gmra.mxu0 %vm225_vm1, %v7907_v55  ;;  %7182 = vmatmul.mubr.msk.f32.gmra.mxu1 %vm225_vm1, %v7776_v2 }
 0x10d   : > { %v8377_v61 = vadd.f32 %v6883_v12, %v6833_v43  ;;  %7149 = vmatprep.mubr.msk.f32.mxu0 %vm225_vm1, %v7913_v15  ;;  %7184 = vmatprep.mubr.msk.f32.mxu1 %vm225_vm1, %v7780_v4 }
 0x10e   : > { %v8383_v63 = vpop.f32.mrf.mxu0  ;;  %v953_v50 = vpop.f32.mrf.mxu1 }
 0x10f   : > { %v8385_v52 = vadd.f32 %v953_v50, %v629_v40 }
 0x110   : > { %v6845_v41 = vpop.f32.mrf.mxu0  ;;  %v6886_v36 = vpop.f32.mrf.mxu1  ;;  %7150 = vmatmul.mubr.msk.f32.gmra.mxu0 %vm225_vm1, %v7927_v7  ;;  %7185 = vmatmul.mubr.msk.f32.gmra.mxu1 %vm225_vm1, %v7792_v6 }
 0x111   : > { %v8391_v2 = vadd.f32 %v6886_v36, %v6836_v24  ;;  %7152 = vmatprep.mubr.msk.f32.mxu0 %vm225_vm1, %v7931_v51  ;;  %7187 = vmatprep.mubr.msk.f32.mxu1 %vm225_vm1, %v7796_v9 }
 0x112   : > { %v8397_v4 = vpop.f32.mrf.mxu0  ;;  %v963_v55 = vpop.f32.mrf.mxu1 }
 0x113   : > { %v8399_v15 = vadd.f32 %v963_v55, %v639_v49  ;;  %v3037_v49 = vld [vmem:[#allocation2 + $0x151] sm:$0xff] }
 0x114   : > { %v6848_v43 = vpop.f32.mrf.mxu0  ;;  %v6889_v0 = vpop.f32.mrf.mxu1  ;;  %7153 = vmatmul.mubr.msk.f32.gmra.mxu0 %vm225_vm1, %v7943_v35  ;;  %7188 = vmatmul.mubr.msk.f32.gmra.mxu1 %vm225_vm1, %v7808_v11 }
 0x115   : > { %v8405_v6 = vadd.f32 %v6889_v0, %v6839_v18  ;;  %7155 = vmatprep.mubr.msk.f32.mxu0 %vm225_vm1, %v7947_v30  ;;  %7190 = vmatprep.mubr.msk.f32.mxu1 %vm225_vm1, %v7812_v13  ;;  %v2653_v13 = vld [vmem:[#allocation2 + $0x198] sm:$0xff] }
 0x116   : > { %v8411_v9 = vpop.f32.mrf.mxu0  ;;  %v973_v7 = vpop.f32.mrf.mxu1  ;;  %v3043_v0 = vld [vmem:[#allocation2 + $0x199] sm:$0xff] }
 0x117   : > { %v8413_v51 = vadd.f32 %v973_v7, %v649_v59 }
 0x118   : > { %v6851_v26 = vpop.f32.mrf.mxu0  ;;  %v6892_v40 = vpop.f32.mrf.mxu1  ;;  %7156 = vmatmul.mubr.msk.f32.gmra.mxu0 %vm225_vm1, %v7959_v39  ;;  %7191 = vmatmul.mubr.msk.f32.gmra.mxu1 %vm225_vm1, %v10005_v19 }
 0x119   : > { %v8419_v35 = vadd.f32 %v6892_v40, %v6842_v31  ;;  %7158 = vmatprep.mubr.msk.f32.mxu0 %vm225_vm1, %v8145_v27  ;;  %7193 = vmatprep.mubr.msk.f32.mxu1 %vm225_vm1, %v10006_v53  ;;  %v2654_v27 = vld [vmem:[#allocation2 + $0x1a0] sm:$0xff] }
 0x11a   : > { %v8425_v30 = vpop.f32.mrf.mxu0  ;;  %v8427_v11 = vpop.f32.mrf.mxu1 }
 0x11c   : > { %v6854_v57 = vpop.f32.mrf.mxu0  ;;  %v6895_v24 = vpop.f32.mrf.mxu1  ;;  %7159 = vmatmul.mubr.msk.f32.gmra.mxu0 %vm225_vm1, %v8155_v29  ;;  %7194 = vmatmul.mubr.msk.f32.gmra.mxu1 %vm225_vm1, %v10007_v54 }
 0x11d   : > { %v8433_v39 = vadd.f32 %v6895_v24, %v6845_v41  ;;  %7161 = vmatprep.mubr.msk.f32.mxu0 %vm225_vm1, %v2653_v13  ;;  %7196 = vmatprep.mubr.msk.f32.mxu1 %vm225_vm1, %v10008_v58  ;;  %v10039_v13 = vld [vmem:[#allocation35_spill] sm:$0xff] }
 0x11e   : > { %v8438_v19 = vpop.f32.mrf.mxu0  ;;  %v8440_v53 = vpop.f32.mrf.mxu1 }
 0x120   : > { %v6857_v14 = vpop.f32.mrf.mxu0  ;;  %v6898_v3 = vpop.f32.mrf.mxu1  ;;  %7162 = vmatmul.mubr.msk.f32.gmra.mxu0 %vm225_vm1, %v2654_v27  ;;  %7197 = vmatmul.mubr.msk.f32.gmra.mxu1 %vm225_vm1, %v10009_v25 }
 0x121   : > { %v8445_v29 = vadd.f32 %v6898_v3, %v6848_v43  ;;  %7199 = vmatprep.mubr.msk.f32.mxu1 %vm225_vm1, %v10010_v23  ;;  %7216 = vmatprep.mubr.msk.f32.mxu0 %vm225_vm1, %v7915_v16  ;;  %v3038_v16 = vld [vmem:[#allocation2 + $0x159] sm:$0xff] }
 0x122   : > { %v8451_v54 = vpop.f32.mrf.mxu0  ;;  %v8453_v58 = vpop.f32.mrf.mxu1 }
 0x124   : > { %v6901_v37 = vpop.f32.mrf.mxu1  ;;  %v6918_v18 = vpop.f32.mrf.mxu0  ;;  %7200 = vmatmul.mubr.msk.f32.gmra.mxu1 %vm225_vm1, %v10011_v21  ;;  %7217 = vmatmul.mubr.msk.f32.vlgmr.msra.gmra.mxu0 %vm225_vm1, %v7929_v48 }
 0x125   : > { %v8459_v25 = vadd.f32 %v6901_v37, %v6851_v26  ;;  %v1421_v23 = vadd.f32 %v6918_v18, %v8317_v20  ;;  %7202 = vmatprep.mubr.msk.f32.mxu1 %vm225_vm1, %v3037_v49  ;;  %7219 = vmatprep.mubr.msk.f32.mxu0 %vm225_vm1, %v7933_v1  ;;  %v3040_v1 = vld [vmem:[#allocation2 + $0x171] sm:$0xff]  ;;  %v10043_v49 = vld [vmem:[#allocation37_spill] sm:$0xff] }
 0x126   : > { %v8465_v10 = vpop.f32.mrf.mxu1  ;;  %v1261_v59 = vpop.f32.mrf.mxu0 }
 0x127   : > { %v8468_v31 = vadd.f32 %v1261_v59, %v8323_v60 }
 0x128   : > { %v6904_v21 = vpop.f32.mrf.mxu1  ;;  %v6921_v12 = vpop.f32.mrf.mxu0  ;;  %7203 = vmatmul.mubr.msk.f32.gmra.mxu1 %vm225_vm1, %v3038_v16  ;;  %7220 = vmatmul.mubr.msk.f32.gmra.mxu0 %vm225_vm1, %v7945_v32 }
 0x129   : > { %v8473_v48 = vadd.f32 %v6904_v21, %v6854_v57  ;;  %v1423_v20 = vadd.f32 %v6921_v12, %v8329_v34  ;;  %7205 = vmatprep.mubr.msk.f32.mxu1 %vm225_vm1, %v3039_v45  ;;  %7222 = vmatprep.mubr.msk.f32.mxu0 %vm225_vm1, %v7949_v28  ;;  %v10037_v28 = vld [vmem:[#allocation33_spill] sm:$0xff]  ;;  %v10045_v45 = vld [vmem:[#allocation38_spill] sm:$0xff]  ;;  %v10046_v12 = vld [vmem:[#allocation39_spill] sm:$0xff] }
 0x12a   : > { %v8479_v50 = vpop.f32.mrf.mxu1  ;;  %v1271_v60 = vpop.f32.mrf.mxu0 }
 0x12b   : > { %v8482_v41 = vadd.f32 %v1271_v60, %v8335_v44 }
 0x12c   : > { %v6907_v36 = vpop.f32.mrf.mxu1  ;;  %v6924_v55 = vpop.f32.mrf.mxu0  ;;  %7206 = vmatmul.mubr.msk.f32.gmra.mxu1 %vm225_vm1, %v3040_v1  ;;  %7223 = vmatmul.mubr.msk.f32.gmra.mxu0 %vm225_vm1, %v7961_v33  ;;  %v10038_v33 = vld [vmem:[#allocation34_spill] sm:$0xff] }
 0x12d   : > { %10036 = vst [vmem:[#allocation28_spill] sm:$0xff] %v8482_v41  ;;  %v8487_v32 = vadd.f32 %v6907_v36, %v6857_v14  ;;  %v1425_v34 = vadd.f32 %v6924_v55, %v8341_v38  ;;  %7208 = vmatprep.mubr.msk.f32.mxu1 %vm225_vm1, %v8239_v47  ;;  %7225 = vmatprep.mubr.msk.f32.mxu0 %vm225_vm1, %v10037_v28  ;;  %v10047_v55 = vld [vmem:[#allocation40_spill] sm:$0xff] }
 0x12e   : > { %v8494_v43 = vpop.f32.mrf.mxu1  ;;  %v1281_v44 = vpop.f32.mrf.mxu0 }
 0x12f   : > { %v8497_v7 = vadd.f32 %v1281_v44, %v8347_v62  ;;  %v3044_v62 = vld [vmem:[#allocation2 + $0x1a1] sm:$0xff] }
 0x130   : > { %v6910_v26 = vpop.f32.mrf.mxu1  ;;  %v6927_v40 = vpop.f32.mrf.mxu0  ;;  %7209 = vmatmul.mubr.msk.f32.gmra.mxu1 %vm225_vm1, %v8249_v17  ;;  %7226 = vmatmul.mubr.msk.f32.gmra.mxu0 %vm225_vm1, %v10038_v33  ;;  %v10050_v33 = vld [vmem:[#allocation42_spill] sm:$0xff] }
 0x131   : > { %v8504_v47 = vadd.f32 %v6910_v26, %v8287_v42  ;;  %v1427_v38 = vadd.f32 %v6927_v40, %v8353_v46  ;;  %7211 = vmatprep.mubr.msk.f32.mxu1 %vm225_vm1, %v3043_v0  ;;  %7228 = vmatprep.mubr.msk.f32.mxu0 %vm225_vm1, %v10039_v13  ;;  %v10042_v42 = vld [vmem:[#allocation36_spill] sm:$0xff] }
 0x132   : > { %v8510_v57 = vpop.f32.mrf.mxu1  ;;  %v1291_v24 = vpop.f32.mrf.mxu0 }
 0x133   : > { %10040 = vst [vmem:[#allocation30_spill] sm:$0xff] %v8510_v57  ;;  %v8513_v27 = vadd.f32 %v1291_v24, %v8359_v5  ;;  %v10060_v57 = vmov 0.0  }
 0x134   : > { %v6913_v17 = vpop.f32.mrf.mxu1  ;;  %v6930_v14 = vpop.f32.mrf.mxu0  ;;  %7212 = vmatmul.mubr.msk.f32.gmra.mxu1 %vm225_vm1, %v3044_v62  ;;  %7229 = vmatmul.mubr.msk.f32.gmra.mxu0 %vm225_vm1, %v10042_v42  ;;  %3897 = vst.msk [vmem:[#allocation4] sm:$0xff] %vm3880_vm3, %v10060_v57  ;;  %3900 = vst.msk [vmem:[#allocation4 + $0x10] sm:$0xff] %vm3880_vm3, %v10060_v57 }
 0x135   : > { %10041 = vst [vmem:[#allocation31_spill] sm:$0xff] %v8513_v27  ;;  %v8519_v46 = vadd.f32 %v6913_v17, %v8301_v8  ;;  %v1429_v3 = vadd.f32 %v6930_v14, %v8365_v56  ;;  %7231 = vmatprep.mubr.msk.f32.mxu0 %vm225_vm1, %v10043_v49  ;;  %v3421_v14 = vld [vmem:[#allocation2 + $0x10a] sm:$0xff]  ;;  %3902 = vst.msk [vmem:[#allocation4 + $0x20] sm:$0xff] %vm3880_vm3, %v10060_v57 }
 0x136   : > { %v8524_v37 = vpop.f32.mrf.mxu1  ;;  %v1301_v18 = vpop.f32.mrf.mxu0  ;;  %3904 = vst.msk [vmem:[#allocation4 + $0x30] sm:$0xff] %vm3880_vm3, %v10060_v57  ;;  %3906 = vst.msk [vmem:[#allocation4 + $0x40] sm:$0xff] %vm3880_vm3, %v10060_v57 }
 0x137   : > { %10044 = vst [vmem:[#allocation6_spill] sm:$0xff] %v8524_v37  ;;  %v8527_v5 = vadd.f32 %v1301_v18, %v8371_v22  ;;  %3908 = vst.msk [vmem:[#allocation4 + $0x50] sm:$0xff] %vm3880_vm3, %v10060_v57 }
 0x138   : > { %v6933_v16 = vpop.f32.mrf.mxu0  ;;  %v6968_v59 = vpop.f32.mrf.mxu1  ;;  %7232 = vmatmul.mubr.msk.f32.gmra.mxu0 %vm225_vm1, %v10045_v45  ;;  %v3423_v45 = vld [vmem:[#allocation2 + $0x122] sm:$0xff]  ;;  %3910 = vst.msk [vmem:[#allocation4 + $0x60] sm:$0xff] %vm3880_vm3, %v10060_v57  ;;  %3912 = vst.msk [vmem:[#allocation4 + $0x70] sm:$0xff] %vm3880_vm3, %v10060_v57 }
 0x139   : > { %v1431_v21 = vadd.f32 %v6933_v16, %v8377_v61  ;;  %v8532_v8 = vadd.f32 %v6968_v59, %v1421_v23  ;;  %7234 = vmatprep.mubr.msk.f32.mxu0 %vm225_vm1, %v10046_v12  ;;  %v10048_v61 = vld [vmem:[#allocation41_spill] sm:$0xff]  ;;  %3914 = vst.msk [vmem:[#allocation4 + $0x80] sm:$0xff] %vm3880_vm3, %v10060_v57  ;;  %3916 = vst.msk [vmem:[#allocation4 + $0x90] sm:$0xff] %vm3880_vm3, %v10060_v57 }
 0x13a   : > { %v1311_v56 = vpop.f32.mrf.mxu0  ;;  %v8536_v1 = vpop.f32.mrf.mxu1  ;;  %3899 = vst.msk [vmem:[#allocation4 + $0x8] sm:$0x3] %vm3898_vm4, %v10060_v57  ;;  %3901 = vst.msk [vmem:[#allocation4 + $0x18] sm:$0x3] %vm3898_vm4, %v10060_v57 }
 0x13b   : > { %v8539_v60 = vadd.f32 %v1311_v56, %v8385_v52  ;;  %3903 = vst.msk [vmem:[#allocation4 + $0x28] sm:$0x3] %vm3898_vm4, %v10060_v57  ;;  %3905 = vst.msk [vmem:[#allocation4 + $0x38] sm:$0x3] %vm3898_vm4, %v10060_v57 }
 0x13c   : > { %v6936_v22 = vpop.f32.mrf.mxu0  ;;  %v6971_v36 = vpop.f32.mrf.mxu1  ;;  %7235 = vmatmul.mubr.msk.f32.gmra.mxu0 %vm225_vm1, %v10047_v55  ;;  %v3425_v55 = vld [vmem:[#allocation2 + $0x13a] sm:$0xff]  ;;  %3907 = vst.msk [vmem:[#allocation4 + $0x48] sm:$0x3] %vm3898_vm4, %v10060_v57  ;;  %3909 = vst.msk [vmem:[#allocation4 + $0x58] sm:$0x3] %vm3898_vm4, %v10060_v57 }
 0x13d   : > { %v1433_v28 = vadd.f32 %v6936_v22, %v8391_v2  ;;  %v8544_v44 = vadd.f32 %v6971_v36, %v1423_v20  ;;  %7237 = vmatprep.mubr.msk.f32.mxu0 %vm225_vm1, %v10048_v61  ;;  %v10051_v2 = vld [vmem:[#allocation43_spill] sm:$0xff]  ;;  %3911 = vst.msk [vmem:[#allocation4 + $0x68] sm:$0x3] %vm3898_vm4, %v10060_v57  ;;  %3913 = vst.msk [vmem:[#allocation4 + $0x78] sm:$0x3] %vm3898_vm4, %v10060_v57 }
 0x13e   : > { %v1321_v23 = vpop.f32.mrf.mxu0  ;;  %v8548_v0 = vpop.f32.mrf.mxu1  ;;  %v3420_v20 = vld [vmem:[#allocation2 + $0xfa] sm:$0xff]  ;;  %3915 = vst.msk [vmem:[#allocation4 + $0x88] sm:$0x3] %vm3898_vm4, %v10060_v57  ;;  %3917 = vst.msk [vmem:[#allocation4 + $0x98] sm:$0x3] %vm3898_vm4, %v10060_v57 }
 0x13f   : > { %10049 = vst [vmem:[#allocation7_spill] sm:$0xff] %v8548_v0  ;;  %v8551_v26 = vadd.f32 %v1321_v23, %v8399_v15 }
 0x140   : > { %v6939_v52 = vpop.f32.mrf.mxu0  ;;  %v6974_v40 = vpop.f32.mrf.mxu1  ;;  %7238 = vmatmul.mubr.msk.f32.gmra.mxu0 %vm225_vm1, %v10050_v33 }
 0x141   : > { %v1435_v13 = vadd.f32 %v6939_v52, %v8405_v6  ;;  %v8556_v62 = vadd.f32 %v6974_v40, %v1425_v34  ;;  %7240 = vmatprep.mubr.msk.f32.mxu0 %vm225_vm1, %v10051_v2  ;;  %v3422_v34 = vld [vmem:[#allocation2 + $0x112] sm:$0xff] }
 0x142   : > { %v1331_v24 = vpop.f32.mrf.mxu0  ;;  %v8560_v17 = vpop.f32.mrf.mxu1  ;;  %v3427_v2 = vld [vmem:[#allocation2 + $0x152] sm:$0xff] }
 0x143   : > { %v8563_v15 = vadd.f32 %v1331_v24, %v8413_v51 }
 0x144   : > { %v6942_v42 = vpop.f32.mrf.mxu0  ;;  %v6977_v49 = vpop.f32.mrf.mxu1  ;;  %7241 = vmatmul.mubr.msk.f32.gmra.mxu0 %vm225_vm1, %v3420_v20 }
 0x145   : > { %v1437_v18 = vadd.f32 %v6942_v42, %v8419_v35  ;;  %v8567_v6 = vadd.f32 %v6977_v49, %v1427_v38  ;;  %7243 = vmatprep.mubr.msk.f32.mxu0 %vm225_vm1, %v3421_v14  ;;  %v3424_v35 = vld [vmem:[#allocation2 + $0x12a] sm:$0xff] }
 0x146   : > { %v8570_v16 = vpop.f32.mrf.mxu0  ;;  %v8572_v59 = vpop.f32.mrf.mxu1 }
 0x147   : > { %10052 = vst [vmem:[#allocation8_spill] sm:$0xff] %v8572_v59 }
 0x148   : > { %v6945_v12 = vpop.f32.mrf.mxu0  ;;  %v6980_v56 = vpop.f32.mrf.mxu1  ;;  %7244 = vmatmul.mubr.msk.f32.gmra.mxu0 %vm225_vm1, %v3422_v34  ;;  %v3429_v34 = vld [vmem:[#allocation2 + $0x16a] sm:$0xff] }
 0x149   : > { %v1439_v51 = vadd.f32 %v6945_v12, %v8433_v39  ;;  %v8576_v22 = vadd.f32 %v6980_v56, %v1429_v3  ;;  %7246 = vmatprep.mubr.msk.f32.mxu0 %vm225_vm1, %v3423_v45  ;;  %v3426_v39 = vld [vmem:[#allocation2 + $0x142] sm:$0xff] }
 0x14a   : > { %v8579_v38 = vpop.f32.mrf.mxu0  ;;  %v8581_v36 = vpop.f32.mrf.mxu1 }
 0x14c   : > { %v6948_v61 = vpop.f32.mrf.mxu0  ;;  %v6983_v23 = vpop.f32.mrf.mxu1  ;;  %7247 = vmatmul.mubr.msk.f32.gmra.mxu0 %vm225_vm1, %v3424_v35 }
 0x14d   : > { %v1441_v52 = vadd.f32 %v6948_v61, %v8445_v29  ;;  %v8585_v40 = vadd.f32 %v6983_v23, %v1431_v21  ;;  %7249 = vmatprep.mubr.msk.f32.mxu0 %vm225_vm1, %v3425_v55  ;;  %v3428_v29 = vld [vmem:[#allocation2 + $0x15a] sm:$0xff] }
 0x14e   : > { %v8588_v3 = vpop.f32.mrf.mxu0  ;;  %v8590_v33 = vpop.f32.mrf.mxu1 }
 0x14f   : > { %v1820_v57 = vadd.f32 %v8590_v33, %v8539_v60  ;;  %v984_v33 = vadd.f32 %v8427_v11, %v8383_v63  ;;  %v994_v11 = vadd.f32 %v8440_v53, %v8397_v4 }
 0x150   : > { %v6951_v20 = vpop.f32.mrf.mxu0  ;;  %v6986_v24 = vpop.f32.mrf.mxu1  ;;  %7250 = vmatmul.mubr.msk.f32.gmra.mxu0 %vm225_vm1, %v3426_v39 }
 0x151   : > { %v1443_v14 = vadd.f32 %v6951_v20, %v8459_v25  ;;  %v8594_v42 = vadd.f32 %v6986_v24, %v1433_v28  ;;  %7252 = vmatprep.mubr.msk.f32.mxu0 %vm225_vm1, %v3427_v2  ;;  %v3430_v25 = vld [vmem:[#allocation2 + $0x172] sm:$0xff]  ;;  %v10053_v20 = vld [vmem:[#allocation21_spill] sm:$0xff]  ;;  %v3433_v24 = vld [vmem:[#allocation2 + $0x19a] sm:$0xff] }
 0x152   : > { %v8597_v21 = vpop.f32.mrf.mxu0  ;;  %v8599_v49 = vpop.f32.mrf.mxu1 }
 0x154   : > { %v6954_v45 = vpop.f32.mrf.mxu0  ;;  %v6989_v12 = vpop.f32.mrf.mxu1  ;;  %7253 = vmatmul.mubr.msk.f32.gmra.mxu0 %vm225_vm1, %v3428_v29 }
 0x155   : > { %v1445_v56 = vadd.f32 %v6954_v45, %v8473_v48  ;;  %v8603_v35 = vadd.f32 %v6989_v12, %v1435_v13  ;;  %7255 = vmatprep.mubr.msk.f32.mxu0 %vm225_vm1, %v3429_v34  ;;  %v10054_v45 = vld [vmem:[#allocation23_spill] sm:$0xff] }
 0x156   : > { %v8606_v28 = vpop.f32.mrf.mxu0  ;;  %v8608_v55 = vpop.f32.mrf.mxu1 }
 0x158   : > { %v6957_v61 = vpop.f32.mrf.mxu0  ;;  %v6992_v23 = vpop.f32.mrf.mxu1  ;;  %7256 = vmatmul.mubr.msk.f32.gmra.mxu0 %vm225_vm1, %v3430_v25 }
 0x159   : > { %v1447_v39 = vadd.f32 %v6957_v61, %v8487_v32  ;;  %v8612_v2 = vadd.f32 %v6992_v23, %v1437_v18  ;;  %7258 = vmatprep.mubr.msk.f32.mxu0 %vm225_vm1, %v10053_v20  ;;  %v3434_v32 = vld [vmem:[#allocation2 + $0x1a2] sm:$0xff] }
 0x15a   : > { %v8616_v48 = vpop.f32.mrf.mxu0  ;;  %v8618_v13 = vpop.f32.mrf.mxu1 }
 0x15c   : > { %v6960_v29 = vpop.f32.mrf.mxu0  ;;  %v6995_v34 = vpop.f32.mrf.mxu1  ;;  %7259 = vmatmul.mubr.msk.f32.gmra.mxu0 %vm225_vm1, %v10054_v45 }
 0x15d   : > { %v1449_v12 = vadd.f32 %v6960_v29, %v8504_v47  ;;  %v8623_v25 = vadd.f32 %v6995_v34, %v1439_v51  ;;  %7261 = vmatprep.mubr.msk.f32.mxu0 %vm225_vm1, %v3433_v24 }
 0x15e   : > { %v8626_v18 = vpop.f32.mrf.mxu0  ;;  %v8628_v61 = vpop.f32.mrf.mxu1 }
 0x15f   : > { %10055 = vst [vmem:[#allocation9_spill] sm:$0xff] %v8626_v18 }
 0x160   : > { %v6963_v23 = vpop.f32.mrf.mxu0  ;;  %v6998_v20 = vpop.f32.mrf.mxu1  ;;  %7262 = vmatmul.mubr.msk.f32.gmra.mxu0 %vm225_vm1, %v3434_v32 }
 0x161   : > { %v1451_v59 = vadd.f32 %v6963_v23, %v8519_v46  ;;  %v8632_v27 = vadd.f32 %v6998_v20, %v1441_v52 }
 0x162   : > { %v8634_v45 = vpop.f32.mrf.mxu0  ;;  %v8636_v47 = vpop.f32.mrf.mxu1 }
 0x163   : > { %10056 = vst [vmem:[#allocation10_spill] sm:$0xff] %v8634_v45 }
 0x164   : > { %v7001_v51 = vpop.f32.mrf.mxu1  ;;  %v7018_v29 = vpop.f32.mrf.mxu0 }
 0x165   : > { %v8638_v24 = vadd.f32 %v7001_v51, %v1443_v14  ;;  %v2201_v34 = vadd.f32 %v7018_v29, %v8532_v8 }
 0x166   : > { %v8641_v0 = vpop.f32.mrf.mxu1  ;;  %v2041_v41 = vpop.f32.mrf.mxu0 }
 0x168   : > { %v7004_v37 = vpop.f32.mrf.mxu1  ;;  %v7021_v18 = vpop.f32.mrf.mxu0 }
 0x169   : > { %v8643_v32 = vadd.f32 %v7004_v37, %v1445_v56  ;;  %v8646_v46 = vadd.f32 %v7021_v18, %v8544_v44 }
 0x16a   : > { %v8648_v52 = vpop.f32.mrf.mxu1  ;;  %v8650_v23 = vpop.f32.mrf.mxu0 }
 0x16b   : > { %10057 = vst [vmem:[#allocation11_spill] sm:$0xff] %v8646_v46  ;;  %10058 = vst [vmem:[#allocation12_spill] sm:$0xff] %v8650_v23 }
 0x16c   : > { %v7007_v20 = vpop.f32.mrf.mxu1  ;;  %v7024_v45 = vpop.f32.mrf.mxu0 }
 0x16d   : > { %v8652_v14 = vadd.f32 %v7007_v20, %v1447_v39  ;;  %v8655_v8 = vadd.f32 %v7024_v45, %v8556_v62  ;;  %v1818_v45 = vadd.f32 %v8581_v36, %v8527_v5 }
 0x16e   : > { %v8657_v51 = vpop.f32.mrf.mxu1  ;;  %v2061_v29 = vpop.f32.mrf.mxu0 }
 0x16f   : > { %10059 = vst [vmem:[#allocation13_spill] sm:$0xff] %v8652_v14 }
 0x170   : > { %v7010_v37 = vpop.f32.mrf.mxu1  ;;  %v7027_v56 = vpop.f32.mrf.mxu0 }
 0x171   : > { %v8679_v44 = vadd.f32 %v7010_v37, %v1449_v12  ;;  %v8682_v62 = vadd.f32 %v7027_v56, %v8567_v6 }
 0x172   : > { %v8684_v39 = vpop.f32.mrf.mxu1  ;;  %v8686_v18 = vpop.f32.mrf.mxu0 }
 0x173   : > { %10061 = vst [vmem:[#allocation14_spill] sm:$0xff] %v8679_v44  ;;  %10062 = vst [vmem:[#allocation15_spill] sm:$0xff] %v8682_v62 }
 0x174   : > { %10063 = vst [vmem:[#allocation16_spill] sm:$0xff] %v8684_v39  ;;  %10064 = vst [vmem:[#allocation17_spill] sm:$0xff] %v8686_v18  ;;  %v7013_v6 = vpop.f32.mrf.mxu1  ;;  %v7030_v12 = vpop.f32.mrf.mxu0  ;;  %v1810_v18 = vadd.f32 %v8536_v1, %v8468_v31  ;;  %v1822_v31 = vadd.f32 %v8599_v49, %v8551_v26 }
 0x175   : > { %v8710_v20 = vadd.f32 %v7013_v6, %v1451_v59  ;;  %v2209_v37 = vadd.f32 %v7030_v12, %v8576_v22 }
 0x176   : > { %v8713_v56 = vpop.f32.mrf.mxu1  ;;  %v2081_v62 = vpop.f32.mrf.mxu0  ;;  %v2200_v39 = vadd.f32 %v2041_v41, %v1810_v18  ;;  %v1814_v41 = vadd.f32 %v8560_v17, %v8497_v7 }
 0x177   : > { %10065 = vst [vmem:[#allocation18_spill] sm:$0xff] %v8710_v20  ;;  %v2208_v46 = vadd.f32 %v2081_v62, %v1818_v45  ;;  %v1436_v45 = vadd.f32 %v8570_v16, %v984_v33 }
 0x178   : > { %v7033_v23 = vpop.f32.mrf.mxu0  ;;  %v7068_v44 = vpop.f32.mrf.mxu1 }
 0x179   : > { %v2211_v14 = vadd.f32 %v7033_v23, %v8585_v40  ;;  %v8720_v5 = vadd.f32 %v7068_v44, %v2201_v34  ;;  %v1824_v44 = vadd.f32 %v8608_v55, %v8563_v15  ;;  %v1826_v15 = vadd.f32 %v8618_v13, %v1436_v45 }
 0x17a   : > { %v2091_v59 = vpop.f32.mrf.mxu0  ;;  %v2431_v36 = vpop.f32.mrf.mxu1 }
 0x17b   : > { %v2210_v22 = vadd.f32 %v2091_v59, %v1820_v57  ;;  %v8722_v6 = vadd.f32 %v2431_v36, %v2200_v39  ;;  %v2204_v39 = vadd.f32 %v2061_v29, %v1814_v41  ;;  %v1438_v29 = vadd.f32 %v8579_v38, %v994_v11 }
 0x17c   : > { %v7036_v12 = vpop.f32.mrf.mxu0  ;;  %v8724_v20 = vpop.f32.mrf.mxu1 }
 0x17d   : > { %v2213_v1 = vadd.f32 %v7036_v12, %v8594_v42  ;;  %v1004_v12 = vadd.f32 %v8453_v58, %v8411_v9 }
 0x17e   : > { %v2101_v62 = vpop.f32.mrf.mxu0  ;;  %v8729_v60 = vpop.f32.mrf.mxu1 }
 0x17f   : > { %v2212_v40 = vadd.f32 %v2101_v62, %v1822_v31  ;;  %v1828_v31 = vadd.f32 %v8628_v61, %v1438_v29 }
 0x180   : > { %v7039_v34 = vpop.f32.mrf.mxu0  ;;  %v7074_v23 = vpop.f32.mrf.mxu1 }
 0x181   : > { %v2215_v26 = vadd.f32 %v7039_v34, %v8603_v35  ;;  %v8739_v42 = vadd.f32 %v7074_v23, %v8655_v8  ;;  %v1014_v23 = vadd.f32 %v8465_v10, %v8425_v30 }
 0x182   : > { %v2111_v49 = vpop.f32.mrf.mxu0  ;;  %v2451_v18 = vpop.f32.mrf.mxu1 }
 0x183   : > { %v2214_v7 = vadd.f32 %v2111_v49, %v1824_v44  ;;  %v8742_v17 = vadd.f32 %v2451_v18, %v2204_v39  ;;  %v1442_v44 = vadd.f32 %v8597_v21, %v1014_v23  ;;  %v1024_v18 = vadd.f32 %v8479_v50, %v8438_v19 }
 0x184   : > { %v7042_v57 = vpop.f32.mrf.mxu0  ;;  %v8744_v63 = vpop.f32.mrf.mxu1 }
 0x185   : > { %v2217_v35 = vadd.f32 %v7042_v57, %v8612_v2  ;;  %v1440_v2 = vadd.f32 %v8588_v3, %v1004_v12  ;;  %v1832_v30 = vadd.f32 %v8641_v0, %v1442_v44  ;;  %v1034_v0 = vadd.f32 %v8494_v43, %v8451_v54  ;;  %v10066_v12 = vld [vmem:[#allocation25_spill] sm:$0xff]  ;;  %v10072_v44 = vld [vmem:[#allocation16_spill] sm:$0xff] }
 0x186   : > { %v2121_v55 = vpop.f32.mrf.mxu0  ;;  %v8750_v8 = vpop.f32.mrf.mxu1  ;;  %v10068_v43 = vld [vmem:[#allocation13_spill] sm:$0xff] }
 0x187   : > { %v2216_v59 = vadd.f32 %v2121_v55, %v1826_v15  ;;  %v1830_v9 = vadd.f32 %v8636_v47, %v1440_v2  ;;  %v1446_v29 = vadd.f32 %v8616_v48, %v1034_v0  ;;  %v10069_v2 = vld [vmem:[#allocation9_spill] sm:$0xff]  ;;  %v10075_v0 = vld [vmem:[#allocation18_spill] sm:$0xff] }
 0x188   : > { %v7045_v16 = vpop.f32.mrf.mxu0  ;;  %v7080_v36 = vpop.f32.mrf.mxu1 }
 0x189   : > { %v2219_v62 = vadd.f32 %v7045_v16, %v8623_v25  ;;  %v8757_v4 = vadd.f32 %v7080_v36, %v2209_v37  ;;  %v1836_v54 = vadd.f32 %v8657_v51, %v1446_v29 }
 0x18a   : > { %v2131_v53 = vpop.f32.mrf.mxu0  ;;  %v2471_v13 = vpop.f32.mrf.mxu1 }
 0x18b   : > { %v2218_v41 = vadd.f32 %v2131_v53, %v1828_v31  ;;  %v8760_v33 = vadd.f32 %v2471_v13, %v2208_v46  ;;  %v10067_v31 = vld [vmem:[#allocation30_spill] sm:$0xff] }
 0x18c   : > { %v7048_v38 = vpop.f32.mrf.mxu0  ;;  %v7083_v34 = vpop.f32.mrf.mxu1  ;;  %v1044_v53 = vadd.f32 %v10067_v31, %v10066_v12 }
 0x18d   : > { %v2221_v58 = vadd.f32 %v7048_v38, %v8632_v27  ;;  %v8766_v61 = vadd.f32 %v7083_v34, %v2211_v14  ;;  %v6351_v27 = vld [vmem:[%s9911_s3 + $0x8] sm:$0xff] }
 0x18e   : > { %v2141_v25 = vpop.f32.mrf.mxu0  ;;  %v2481_v37 = vpop.f32.mrf.mxu1  ;;  %7264 = vmatprep.subr.mxu1 %v6351_v27  ;;  %v1448_v38 = vadd.f32 %v10069_v2, %v1044_v53 }
 0x18f   : > { %v2220_v39 = vadd.f32 %v2141_v25, %v1830_v9  ;;  %v8769_v3 = vadd.f32 %v2481_v37, %v2210_v22  ;;  %v1444_v22 = vadd.f32 %v8606_v28, %v1024_v18  ;;  %7265 = vmatpush3.msra.mxu1 %v6351_v27  ;;  %v10070_v9 = vld [vmem:[#allocation27_spill] sm:$0xff]  ;;  %v10071_v25 = vld [vmem:[#allocation6_spill] sm:$0xff] }
 0x190   : > { %v7051_v46 = vpop.f32.mrf.mxu0  ;;  %v7086_v49 = vpop.f32.mrf.mxu1  ;;  %v1054_v37 = vadd.f32 %v10071_v25, %v10070_v9  ;;  %v10074_v27 = vld [vmem:[#allocation10_spill] sm:$0xff] }
 0x191   : > { %v2223_v10 = vadd.f32 %v7051_v46, %v8638_v24  ;;  %v8775_v47 = vadd.f32 %v7086_v49, %v2213_v1  ;;  %v1834_v24 = vadd.f32 %v8648_v52, %v1444_v22  ;;  %v1838_v46 = vadd.f32 %v10072_v44, %v1448_v38  ;;  %v10073_v49 = vld [vmem:[#allocation14_spill] sm:$0xff] }
 0x192   : > { %v2151_v14 = vpop.f32.mrf.mxu0  ;;  %v2491_v21 = vpop.f32.mrf.mxu1 }
 0x193   : > { %v2222_v45 = vadd.f32 %v2151_v14, %v1832_v30  ;;  %v8781_v57 = vadd.f32 %v2491_v21, %v2212_v40  ;;  %v1450_v14 = vadd.f32 %v10074_v27, %v1054_v37 }
 0x194   : > { %v7054_v19 = vpop.f32.mrf.mxu0  ;;  %v7089_v50 = vpop.f32.mrf.mxu1 }
 0x195   : > { %v2225_v1 = vadd.f32 %v7054_v19, %v8643_v32  ;;  %v8787_v11 = vadd.f32 %v7089_v50, %v2215_v26  ;;  %v1840_v50 = vadd.f32 %v8713_v56, %v1450_v14 }
 0x196   : > { %v2161_v15 = vpop.f32.mrf.mxu0  ;;  %v2501_v55 = vpop.f32.mrf.mxu1 }
 0x197   : > { %v2224_v28 = vadd.f32 %v2161_v15, %v1834_v24  ;;  %v8790_v16 = vadd.f32 %v2501_v55, %v2214_v7 }
 0x198   : > { %v7057_v40 = vpop.f32.mrf.mxu0  ;;  %v7092_v36 = vpop.f32.mrf.mxu1 }
 0x199   : > { %v2227_v52 = vadd.f32 %v7057_v40, %v10068_v43  ;;  %v8796_v13 = vadd.f32 %v7092_v36, %v2217_v35 }
 0x19a   : > { %v2171_v32 = vpop.f32.mrf.mxu0  ;;  %v2511_v26 = vpop.f32.mrf.mxu1 }
 0x19b   : > { %v2226_v34 = vadd.f32 %v2171_v32, %v1836_v54  ;;  %v8799_v48 = vadd.f32 %v2511_v26, %v2216_v59 }
 0x19c   : > { %v7060_v7 = vpop.f32.mrf.mxu0  ;;  %v7095_v23 = vpop.f32.mrf.mxu1 }
 0x19d   : > { %v2229_v51 = vadd.f32 %v7060_v7, %v10073_v49  ;;  %v8805_v18 = vadd.f32 %v7095_v23, %v2219_v62 }
 0x19e   : > { %v2181_v35 = vpop.f32.mrf.mxu0  ;;  %v2521_v30 = vpop.f32.mrf.mxu1 }
 0x19f   : > { %v2228_v21 = vadd.f32 %v2181_v35, %v1838_v46  ;;  %v8808_v22 = vadd.f32 %v2521_v30, %v2218_v41 }
 0x1a0   : > { %v7063_v59 = vpop.f32.mrf.mxu0  ;;  %v7098_v19 = vpop.f32.mrf.mxu1 }
 0x1a1   : > { %v2231_v24 = vadd.f32 %v7063_v59, %v10075_v0  ;;  %v8812_v15 = vadd.f32 %v7098_v19, %v2221_v58  ;;  %v4505_v58 = vld [vmem:[#allocation4 + $0x1] sm:$0xff] }
 0x1a2   : > { %v2191_v55 = vpop.f32.mrf.mxu0  ;;  %v2531_v29 = vpop.f32.mrf.mxu1  ;;  %7266 = vmatprep.mubr.msk.f32.mxu1 %vm3880_vm3, %v4505_v58 }
 0x1a3   : > { %v2230_v40 = vadd.f32 %v2191_v55, %v1840_v50  ;;  %v8814_v62 = vadd.f32 %v2531_v29, %v2220_v39  ;;  %v6386_v50 = vld [vmem:[%s9911_s3 + $0x20] sm:$0xff] }
 0x1a4   : > { %v7101_v36 = vpop.f32.mrf.mxu1  ;;  %v7118_v12 = vpop.f32.mrf.mxu0  ;;  %7320 = vmatprep.subr.mxu0 %v6386_v50 }
 0x1a5   : > { %v8816_v31 = vadd.f32 %v7101_v36, %v2223_v10  ;;  %v8819_v41 = vadd.f32 %v7118_v12, %v8720_v5  ;;  %7321 = vmatpush3.msra.mxu0 %v6386_v50 }
 0x1a6   : > { %v2541_v53 = vpop.f32.mrf.mxu1  ;;  %v2822_v54 = vpop.f32.mrf.mxu0 }
 0x1a7   : > { %v8821_v43 = vadd.f32 %v2541_v53, %v2222_v45  ;;  %v8824_v56 = vadd.f32 %v2822_v54, %v8722_v6 }
 0x1a8   : > { %v7104_v32 = vpop.f32.mrf.mxu1  ;;  %v8826_v26 = vpop.f32.mrf.mxu0 }
 0x1a9   : > { %v8829_v39 = vadd.f32 %v7104_v32, %v2225_v1 }
 0x1aa   : > { %v2551_v10 = vpop.f32.mrf.mxu1  ;;  %v8831_v2 = vpop.f32.mrf.mxu0 }
 0x1ab   : > { %v8833_v5 = vadd.f32 %v2551_v10, %v2224_v28 }
 0x1ac   : > { %v7107_v38 = vpop.f32.mrf.mxu1  ;;  %v7124_v7 = vpop.f32.mrf.mxu0 }
 0x1ad   : > { %v8835_v45 = vadd.f32 %v7107_v38, %v2227_v52  ;;  %v8838_v6 = vadd.f32 %v7124_v7, %v8739_v42 }
 0x1ae   : > { %v2561_v23 = vpop.f32.mrf.mxu1  ;;  %v2842_v9 = vpop.f32.mrf.mxu0 }
 0x1af   : > { %v8840_v25 = vadd.f32 %v2561_v23, %v2226_v34  ;;  %v8843_v37 = vadd.f32 %v2842_v9, %v8742_v17 }
 0x1b0   : > { %v7110_v1 = vpop.f32.mrf.mxu1  ;;  %v8845_v44 = vpop.f32.mrf.mxu0 }
 0x1b1   : > { %v8847_v46 = vadd.f32 %v7110_v1, %v2229_v51 }
 0x1b2   : > { %v2571_v28 = vpop.f32.mrf.mxu1  ;;  %v8849_v49 = vpop.f32.mrf.mxu0 }
 0x1b3   : > { %v8851_v52 = vadd.f32 %v2571_v28, %v2228_v21 }
 0x1b4   : > { %v7113_v35 = vpop.f32.mrf.mxu1  ;;  %v7130_v42 = vpop.f32.mrf.mxu0 }
 0x1b5   : > { %v8853_v30 = vadd.f32 %v7113_v35, %v2231_v24  ;;  %v8856_v34 = vadd.f32 %v7130_v42, %v8757_v4 }
 0x1b6   : > { %v2581_v27 = vpop.f32.mrf.mxu1  ;;  %v2862_v17 = vpop.f32.mrf.mxu0 }
 0x1b7   : > { %v8858_v14 = vadd.f32 %v2581_v27, %v2230_v40  ;;  %v8861_v59 = vadd.f32 %v2862_v17, %v8760_v33 }
 0x1b8   : > { %v7133_v51 = vpop.f32.mrf.mxu0  ;;  %v8863_v19 = vpop.f32.mrf.mxu1 }
 0x1b9   : > { %v8866_v21 = vadd.f32 %v7133_v51, %v8766_v61 }
 0x1ba   : > { %v2872_v0 = vpop.f32.mrf.mxu0  ;;  %v8871_v4 = vpop.f32.mrf.mxu1 }
 0x1bb   : > { %v8874_v24 = vadd.f32 %v2872_v0, %v8769_v3 }
 0x1bc   : > { %v7136_v33 = vpop.f32.mrf.mxu0  ;;  %v8876_v55 = vpop.f32.mrf.mxu1 }
 0x1bd   : > { %v8879_v29 = vadd.f32 %v7136_v33, %v8775_v47 }
 0x1be   : > { %v2882_v61 = vpop.f32.mrf.mxu0  ;;  %v8881_v40 = vpop.f32.mrf.mxu1 }
 0x1bf   : > { %v8884_v36 = vadd.f32 %v2882_v61, %v8781_v57 }
 0x1c0   : > { %v7139_v12 = vpop.f32.mrf.mxu0  ;;  %v8886_v53 = vpop.f32.mrf.mxu1 }
 0x1c1   : > { %v8889_v54 = vadd.f32 %v7139_v12, %v8787_v11 }
 0x1c2   : > { %v2892_v3 = vpop.f32.mrf.mxu0  ;;  %v8891_v58 = vpop.f32.mrf.mxu1 }
 0x1c3   : > { %v8894_v32 = vadd.f32 %v2892_v3, %v8790_v16 }
 0x1c4   : > { %v7142_v47 = vpop.f32.mrf.mxu0  ;;  %v8896_v10 = vpop.f32.mrf.mxu1 }
 0x1c5   : > { %v8899_v38 = vadd.f32 %v7142_v47, %v8796_v13 }
 0x1c6   : > { %v2902_v57 = vpop.f32.mrf.mxu0  ;;  %v8901_v7 = vpop.f32.mrf.mxu1 }
 0x1c7   : > { %v8904_v23 = vadd.f32 %v2902_v57, %v8799_v48 }
 0x1c8   : > { %v7145_v11 = vpop.f32.mrf.mxu0  ;;  %v8906_v9 = vpop.f32.mrf.mxu1 }
 0x1c9   : > { %v8909_v1 = vadd.f32 %v7145_v11, %v8805_v18 }
 0x1ca   : > { %v2912_v16 = vpop.f32.mrf.mxu0  ;;  %v8911_v28 = vpop.f32.mrf.mxu1 }
 0x1cb   : > { %v8914_v35 = vadd.f32 %v2912_v16, %v8808_v22 }
 0x1cc   : > { %v7148_v13 = vpop.f32.mrf.mxu0  ;;  %v8916_v42 = vpop.f32.mrf.mxu1 }
 0x1cd   : > { %v8919_v27 = vadd.f32 %v7148_v13, %v8812_v15 }
 0x1ce   : > { %v2922_v48 = vpop.f32.mrf.mxu0  ;;  %v8921_v17 = vpop.f32.mrf.mxu1 }
 0x1cf   : > { %v8924_v51 = vadd.f32 %v2922_v48, %v8814_v62 }
 0x1d0   : > { %v7151_v18 = vpop.f32.mrf.mxu0  ;;  %v8926_v50 = vpop.f32.mrf.mxu1 }
 0x1d1   : > { %v8929_v0 = vadd.f32 %v7151_v18, %v8816_v31 }
 0x1d2   : > { %v2932_v22 = vpop.f32.mrf.mxu0  ;;  %v8931_v33 = vpop.f32.mrf.mxu1 }
 0x1d3   : > { %v8934_v61 = vadd.f32 %v2932_v22, %v8821_v43 }
 0x1d4   : > { %v7154_v15 = vpop.f32.mrf.mxu0  ;;  %v8936_v12 = vpop.f32.mrf.mxu1 }
 0x1d5   : > { %10076 = vst [vmem:[#allocation19_spill] sm:$0xff] %v8934_v61  ;;  %v8939_v3 = vadd.f32 %v7154_v15, %v8829_v39 }
 0x1d6   : > { %v2942_v62 = vpop.f32.mrf.mxu0  ;;  %v8941_v47 = vpop.f32.mrf.mxu1 }
 0x1d7   : > { %10077 = vst [vmem:[#allocation20_spill] sm:$0xff] %v8939_v3  ;;  %v8944_v57 = vadd.f32 %v2942_v62, %v8833_v5 }
 0x1d8   : > { %v7157_v31 = vpop.f32.mrf.mxu0  ;;  %v8946_v11 = vpop.f32.mrf.mxu1 }
 0x1d9   : > { %10078 = vst [vmem:[#allocation22_spill] sm:$0xff] %v8944_v57  ;;  %v8949_v16 = vadd.f32 %v7157_v31, %v8835_v45  ;;  %v10084_v57 = vld [vmem:[#allocation7_spill] sm:$0xff] }
 0x1da   : > { %v2952_v43 = vpop.f32.mrf.mxu0  ;;  %v8951_v13 = vpop.f32.mrf.mxu1 }
 0x1db   : > { %10079 = vst [vmem:[#allocation24_spill] sm:$0xff] %v8949_v16  ;;  %v8954_v48 = vadd.f32 %v2952_v43, %v8840_v25  ;;  %v10083_v16 = vld [vmem:[#allocation28_spill] sm:$0xff] }
 0x1dc   : > { %v7160_v39 = vpop.f32.mrf.mxu0  ;;  %v8956_v18 = vpop.f32.mrf.mxu1  ;;  %v1812_v3 = vadd.f32 %v10084_v57, %v10083_v16 }
 0x1dd   : > { %10080 = vst [vmem:[#allocation26_spill] sm:$0xff] %v8954_v48  ;;  %v8959_v22 = vadd.f32 %v7160_v39, %v8847_v46  ;;  %v10086_v46 = vld [vmem:[#allocation12_spill] sm:$0xff] }
 0x1de   : > { %v2962_v5 = vpop.f32.mrf.mxu0  ;;  %v8961_v15 = vpop.f32.mrf.mxu1  ;;  %v2202_v39 = vadd.f32 %v10086_v46, %v1812_v3  ;;  %v10089_v46 = vld [vmem:[#allocation31_spill] sm:$0xff] }
 0x1df   : > { %10081 = vst [vmem:[#allocation29_spill] sm:$0xff] %v8959_v22  ;;  %v8964_v62 = vadd.f32 %v2962_v5, %v8851_v52  ;;  %v10087_v22 = vld [vmem:[#allocation11_spill] sm:$0xff]  ;;  %v3372_v52 = vadd.f32 %v8863_v19, %v8819_v41  ;;  %v8994_v41 = vld [vmem:[%s9910_s2] ss:$0 sm:$0xff] }
 0x1e0   : > { %v7163_v45 = vpop.f32.mrf.mxu0  ;;  %v8966_v31 = vpop.f32.mrf.mxu1  ;;  %v2593_v61 = vadd.f32 %v8724_v20, %v10087_v22 }
 0x1e1   : > { %10082 = vst [vmem:[#allocation32_spill] sm:$0xff] %v8964_v62  ;;  %v8971_v25 = vadd.f32 %v7163_v45, %v8853_v30  ;;  %v2592_v30 = vadd.f32 %v8729_v60, %v2202_v39  ;;  %v3371_v45 = vadd.f32 %v8871_v4, %v8824_v56  ;;  %v10093_v56 = vld [vmem:[#allocation15_spill] sm:$0xff] }
 0x1e2   : > { %v2972_v43 = vpop.f32.mrf.mxu0  ;;  %v8973_v48 = vpop.f32.mrf.mxu1  ;;  %v2984_v16 = vadd.f32 %v8826_v26, %v2593_v61  ;;  %v10092_v61 = vld [vmem:[#allocation17_spill] sm:$0xff]  ;;  %v2597_v4 = vadd.f32 %v8744_v63, %v10093_v56 }
 0x1e3   : > { %10085 = vst [vmem:[#allocation33_spill] sm:$0xff] %v8971_v25  ;;  %v8981_v5 = vadd.f32 %v2972_v43, %v8858_v14  ;;  %v10090_v25 = vld [vmem:[#allocation8_spill] sm:$0xff]  ;;  %v2983_v22 = vadd.f32 %v8831_v2, %v2592_v30 }
 0x1e4   : > { %v8983_v62 = vpop.f32.mrf.mxu1  ;;  %v7218_v57 = vpop.f32.mrf.mxu0  ;;  %v1816_v20 = vadd.f32 %v10090_v25, %v10089_v46  ;;  %v3374_v60 = vadd.f32 %v8876_v55, %v2984_v16  ;;  %v3376_v55 = vadd.f32 %v8886_v53, %v8838_v6  ;;  %v3380_v53 = vadd.f32 %v8906_v9, %v8856_v34 }
 0x1e5   : > { %10088 = vst [vmem:[#allocation34_spill] sm:$0xff] %v8981_v5  ;;  %v3762_v3 = vadd.f32 %v7218_v57, %v3372_v52  ;;  %v3373_v52 = vadd.f32 %v8881_v40, %v2983_v22  ;;  %v3375_v40 = vadd.f32 %v8891_v58, %v8843_v37  ;;  %v9023_v37 = vadd.f32 %v8916_v42, %v8866_v21 }
 0x1e6   : > { %v8996_v14 = vpop.f32.mrf.mxu1  ;;  %v3602_v19 = vpop.f32.mrf.mxu0  ;;  %v2206_v43 = vadd.f32 %v10092_v61, %v1816_v20  ;;  %v9035_v34 = vadd.f32 %v8931_v33, %v8884_v36  ;;  %v9049_v36 = vadd.f32 %v8946_v11, %v8899_v38 }
 0x1e7   : > { %10091 = vst [vmem:[#allocation35_spill] sm:$0xff] %v8996_v14  ;;  %v3761_v26 = vadd.f32 %v3602_v19, %v3371_v45  ;;  %v3801_v57 = vadd.f32 %v8994_v41, %v3762_v3  ;;  %v2988_v14 = vadd.f32 %v8845_v44, %v2597_v4 }
 0x1e8   : > { %v7204_v39 = vpop.f32.mrf.mxu1  ;;  %v7221_v25 = vpop.f32.mrf.mxu0  ;;  %v2596_v5 = vadd.f32 %v8750_v8, %v2206_v43 }
 0x1e9   : > { %v3764_v46 = vadd.f32 %v7221_v25, %v3374_v60  ;;  %v3800_v16 = vadd.f32 %v8994_v41, %v3761_v26  ;;  %v3378_v3 = vadd.f32 %v8896_v10, %v2988_v14  ;;  %v3833_v44 = vmax.f32 %v3801_v57, 0.0 }
 0x1ea   : > { %v3332_v2 = vpop.f32.mrf.mxu1  ;;  %v3612_v30 = vpop.f32.mrf.mxu0  ;;  %v2987_v20 = vadd.f32 %v8849_v49, %v2596_v5  ;;  %v3379_v49 = vadd.f32 %v8911_v28, %v8861_v59  ;;  %v9027_v5 = vadd.f32 %v8921_v17, %v8874_v24  ;;  %v9039_v59 = vadd.f32 %v8936_v12, %v8889_v54 }
 0x1eb   : > { %v3803_v63 = vadd.f32 %v8994_v41, %v3764_v46  ;;  %v3763_v45 = vadd.f32 %v3612_v30, %v3373_v52  ;;  %v3832_v14 = vmax.f32 %v3800_v16, 0.0  ;;  %v9043_v24 = vadd.f32 %v8941_v47, %v8894_v32  ;;  %v10098_v30 = vld [vmem:[#allocation24_spill] sm:$0xff]  ;;  %v10100_v16 = vld [vmem:[#allocation29_spill] sm:$0xff] }
 0x1ec   : > { %v7207_v8 = vpop.f32.mrf.mxu1  ;;  %v7224_v19 = vpop.f32.mrf.mxu0  ;;  %v3377_v6 = vadd.f32 %v8901_v7, %v2987_v20  ;;  %v9031_v7 = vadd.f32 %v8926_v50, %v8879_v29  ;;  %v9053_v54 = vadd.f32 %v8951_v13, %v8904_v23  ;;  %v9057_v50 = vadd.f32 %v8956_v18, %v8909_v1  ;;  %v10094_v13 = vld [vmem:[#allocation19_spill] sm:$0xff] }
 0x1ed   : > { %v3835_v22 = vmax.f32 %v3803_v63, 0.0  ;;  %v3802_v60 = vadd.f32 %v8994_v41, %v3763_v45  ;;  %v3766_v61 = vadd.f32 %v7224_v19, %v3376_v55  ;;  %v9061_v32 = vadd.f32 %v8961_v15, %v8914_v35 }
 0x1ee   : > { %v3342_v58 = vpop.f32.mrf.mxu1  ;;  %v3622_v10 = vpop.f32.mrf.mxu0  ;;  %v9065_v47 = vadd.f32 %v8966_v31, %v8919_v27  ;;  %v9072_v1 = vadd.f32 %v8973_v48, %v8924_v51  ;;  %v9076_v35 = vadd.f32 %v8983_v62, %v8929_v0  ;;  %v10095_v18 = vld [vmem:[#allocation35_spill] sm:$0xff]  ;;  %v10096_v27 = vld [vmem:[#allocation20_spill] sm:$0xff]  ;;  %v10097_v51 = vld [vmem:[#allocation22_spill] sm:$0xff]  ;;  %v9090_v0 = vadd.f32 %v7207_v8, %v10098_v30 }
 0x1ef   : > { %v3865_v26 = vmax.f32 %v3833_v44, %v3835_v22  ;;  %v3834_v43 = vmax.f32 %v3802_v60, 0.0  ;;  %v3765_v21 = vadd.f32 %v3622_v10, %v3375_v40  ;;  %v3805_v29 = vadd.f32 %v8994_v41, %v3766_v61  ;;  %v10099_v62 = vld [vmem:[#allocation26_spill] sm:$0xff]  ;;  %v10102_v61 = vld [vmem:[#allocation33_spill] sm:$0xff] }
 0x1f0   : > { %v7210_v9 = vpop.f32.mrf.mxu1  ;;  %v7227_v28 = vpop.f32.mrf.mxu0  ;;  %v9080_v15 = vadd.f32 %v10095_v18, %v10094_v13  ;;  %v9083_v31 = vadd.f32 %v7204_v39, %v10096_v27  ;;  %v9087_v48 = vadd.f32 %v3332_v2, %v10097_v51  ;;  %v9093_v55 = vadd.f32 %v3342_v58, %v10099_v62  ;;  %v9130_v51 = vld [vmem:[%s9911_s3] sm:$0xff] }
 0x1f1   : > { %3882 = vst.msk [vmem:[#allocation3 + $0x8] sm:$0xff] %vm3880_vm3, %v3865_v26  ;;  %v3864_v42 = vmax.f32 %v3832_v14, %v3834_v43  ;;  %v3768_v17 = vadd.f32 %v7227_v28, %v3378_v3  ;;  %v3804_v38 = vadd.f32 %v8994_v41, %v3765_v21  ;;  %v3837_v25 = vmax.f32 %v3805_v29, 0.0  ;;  %v10101_v3 = vld [vmem:[#allocation32_spill] sm:$0xff]  ;;  %7278 = vmatprep.subr.mxu1 %v9130_v51 }
 0x1f2   : > { %v3352_v33 = vpop.f32.mrf.mxu1  ;;  %v3632_v12 = vpop.f32.mrf.mxu0  ;;  %v9096_v63 = vadd.f32 %v7210_v9, %v10100_v16 }
 0x1f3   : > { %3881 = vst.msk [vmem:[#allocation3] sm:$0xff] %vm3880_vm3, %v3864_v42  ;;  %v3807_v23 = vadd.f32 %v8994_v41, %v3768_v17  ;;  %v3767_v11 = vadd.f32 %v3632_v12, %v3377_v6  ;;  %v3836_v20 = vmax.f32 %v3804_v38, 0.0  ;;  %v9099_v19 = vadd.f32 %v3352_v33, %v10101_v3 }
 0x1f4   : > { %v7213_v56 = vpop.f32.mrf.mxu1  ;;  %v7230_v4 = vpop.f32.mrf.mxu0 }
 0x1f5   : > { %v3839_v52 = vmax.f32 %v3807_v23, 0.0  ;;  %v3806_v57 = vadd.f32 %v8994_v41, %v3767_v11  ;;  %v3770_v46 = vadd.f32 %v7230_v4, %v3380_v53  ;;  %v9102_v8 = vadd.f32 %v7213_v56, %v10102_v61  ;;  %v10103_v53 = vld [vmem:[#allocation34_spill] sm:$0xff] }
 0x1f6   : > { %v3362_v39 = vpop.f32.mrf.mxu1  ;;  %v3642_v45 = vpop.f32.mrf.mxu0 }
 0x1f7   : > { %v3867_v40 = vmax.f32 %v3837_v25, %v3839_v52  ;;  %v3838_v44 = vmax.f32 %v3806_v57, 0.0  ;;  %v9105_v6 = vadd.f32 %v8994_v41, %v3770_v46  ;;  %v9108_v58 = vadd.f32 %v3362_v39, %v10103_v53 }
 0x1f8   : > { %v4208_v22 = vld [vmem:[#allocation3 + $0x8] sm:$0x3]  ;;  %v4280_v2 = vld [vmem:[#allocation3 + $0xa] sm:$0x3]  ;;  %v4352_v60 = vld [vmem:[#allocation3 + $0xc] sm:$0x3]  ;;  %v3769_v10 = vadd.f32 %v3642_v45, %v3379_v49  ;;  %v7233_v14 = vpop.f32.mrf.mxu0 }
 0x1f9   : > { %10104 = vst [vmem:[#allocation36_spill] sm:$0xff] %v9108_v58  ;;  %v4216_v26 = vsel %vm3898_vm4, %v4208_v22, -inf  ;;  %v4288_v43 = vsel %vm3898_vm4, %v4280_v2, -inf  ;;  %v4360_v21 = vsel %vm3898_vm4, %v4352_v60, -inf  ;;  %v4424_v9 = vld [vmem:[#allocation3 + $0xe] sm:$0x3]  ;;  %v3866_v28 = vmax.f32 %v3836_v20, %v3838_v44 }
 0x1fa   : > { %3884 = vst.msk [vmem:[#allocation3 + $0x18] sm:$0xff] %vm3880_vm3, %v3867_v40  ;;  %v4217_v42 = vrot.slane %v4216_v26, 4  ;;  %v4289_v29 = vrot.slane %v4288_v43, 4  ;;  %v4361_v17 = vrot.slane %v4360_v21, 4  ;;  %v4432_v33 = vsel %vm3898_vm4, %v4424_v9, -inf  ;;  %v9115_v38 = vpop.f32.mrf.mxu0 }
 0x1fb   : > { %v3918_v12 = vld [vmem:[#allocation3] sm:$0x3]  ;;  %v4433_v49 = vrot.slane %v4432_v33, 4  ;;  %v3992_v11 = vld [vmem:[#allocation3 + $0x2] sm:$0x3]  ;;  %3883 = vst.msk [vmem:[#allocation3 + $0x10] sm:$0xff] %vm3880_vm3, %v3866_v28  ;;  %v9120_v18 = vadd.f32 %v8994_v41, %v3769_v10  ;;  %v9123_v27 = vadd.f32 %v7233_v14, %v9023_v37 }
 0x1fc   : > { %v3926_v23 = vsel %vm3898_vm4, %v3918_v12, -inf  ;;  %v4064_v13 = vld [vmem:[#allocation3 + $0x4] sm:$0x3]  ;;  %v4218_v56 = vmax.f32 %v4216_v26, %v4217_v42  ;;  %v4290_v4 = vmax.f32 %v4288_v43, %v4289_v29  ;;  %v4362_v25 = vmax.f32 %v4360_v21, %v4361_v17  ;;  %v4136_v57 = vld [vmem:[#allocation3 + $0x6] sm:$0x3]  ;;  %v9125_v46 = vpop.f32.mrf.mxu0 }
 0x1fd   : > { %v3927_v52 = vrot.slane %v3926_v23, 4  ;;  %v4434_v30 = vmax.f32 %v4432_v33, %v4433_v49  ;;  %v4000_v62 = vsel %vm3898_vm4, %v3992_v11, -inf  ;;  %v4072_v16 = vsel %vm3898_vm4, %v4064_v13, -inf }
 0x1fe   : > { %v4144_v37 = vsel %vm3898_vm4, %v4136_v57, -inf  ;;  %v4219_v39 = vrot.slane %v4218_v56, 2  ;;  %v4291_v45 = vrot.slane %v4290_v4, 2  ;;  %v4363_v20 = vrot.slane %v4362_v25, 2  ;;  %v9136_v3 = vpop.f32.mrf.mxu0 }
 0x1ff   : > { %v3928_v40 = vmax.f32 %v3926_v23, %v3927_v52  ;;  %v4435_v44 = vrot.slane %v4434_v30, 2  ;;  %v4001_v22 = vrot.slane %v4000_v62, 4  ;;  %v4073_v2 = vrot.slane %v4072_v16, 4 }
 0x200   : > { %v4145_v60 = vrot.slane %v4144_v37, 4  ;;  %v4220_v61 = vmax.f32 %v4218_v56, %v4219_v39  ;;  %v4292_v53 = vmax.f32 %v4290_v4, %v4291_v45  ;;  %v4364_v10 = vmax.f32 %v4362_v25, %v4363_v20  ;;  %v9138_v26 = vpop.f32.mrf.mxu0 }
 0x201   : > { %v3929_v14 = vrot.slane %v3928_v40, 2  ;;  %v4436_v43 = vmax.f32 %v4434_v30, %v4435_v44  ;;  %v4002_v21 = vmax.f32 %v4000_v62, %v4001_v22  ;;  %v4074_v9 = vmax.f32 %v4072_v16, %v4073_v2  ;;  %v4209_v42 = vld [vmem:[#allocation3 + $0x18] sm:$0x3]  ;;  %v4281_v49 = vld [vmem:[#allocation3 + $0x1a] sm:$0x3] }
 0x202   : > { %v4146_v28 = vmax.f32 %v4144_v37, %v4145_v60  ;;  %v4221_v29 = vrot.slane %v4220_v61, 1  ;;  %v4293_v17 = vrot.slane %v4292_v53, 1  ;;  %v4365_v33 = vrot.slane %v4364_v10, 1  ;;  %v9140_v23 = vpop.f32.mrf.mxu0  ;;  %v4353_v25 = vld [vmem:[#allocation3 + $0x1c] sm:$0x3] }
 0x203   : > { %v3930_v12 = vmax.f32 %v3928_v40, %v3929_v14  ;;  %v4437_v11 = vrot.slane %v4436_v43, 1  ;;  %v4003_v13 = vrot.slane %v4002_v21, 2  ;;  %v4075_v56 = vrot.slane %v4074_v9, 2  ;;  %v4425_v44 = vld [vmem:[#allocation3 + $0x1e] sm:$0x3] }
 0x204   : > { %v4147_v4 = vrot.slane %v4146_v28, 2  ;;  %v4222_v52 = vmax.f32 %v4220_v61, %v4221_v29  ;;  %v4294_v57 = vmax.f32 %v4292_v53, %v4293_v17  ;;  %v4366_v39 = vmax.f32 %v4364_v10, %v4365_v33  ;;  %v9142_v62 = vpop.f32.mrf.mxu0  ;;  %v3919_v40 = vld [vmem:[#allocation3 + $0x10] sm:$0x3]  ;;  %v3993_v58 = vld [vmem:[#allocation3 + $0x12] sm:$0x3] }
 0x205   : > { %v3931_v30 = vrot.slane %v3930_v12, 1  ;;  %v4438_v16 = vmax.f32 %v4436_v43, %v4437_v11  ;;  %v4004_v37 = vmax.f32 %v4002_v21, %v4003_v13  ;;  %v4076_v45 = vmax.f32 %v4074_v9, %v4075_v56  ;;  %v4065_v9 = vld [vmem:[#allocation3 + $0x14] sm:$0x3]  ;;  %v4137_v33 = vld [vmem:[#allocation3 + $0x16] sm:$0x3] }
 0x206   : > { %v4148_v20 = vmax.f32 %v4146_v28, %v4147_v4  ;;  %v4223_v2 = vsel %vm3898_vm4, %v4209_v42, -inf  ;;  %v4295_v60 = vsel %vm3898_vm4, %v4281_v49, -inf  ;;  %v4367_v14 = vsel %vm3898_vm4, %v4353_v25, -inf  ;;  %v9147_v61 = vpop.f32.mrf.mxu0  ;;  %4272 = vst.msk [vmem:[#allocation4 + $0x15] sm:$0x1] %vm3983_vm5, %v4222_v52 }
 0x207   : > { %v3932_v22 = vmax.f32 %v3930_v12, %v3931_v30  ;;  %4344 = vst.msk [vmem:[#allocation4 + $0x16] sm:$0x1] %vm3983_vm5, %v4294_v57  ;;  %4416 = vst.msk [vmem:[#allocation4 + $0x17] sm:$0x1] %vm3983_vm5, %v4366_v39  ;;  %v4005_v53 = vrot.slane %v4004_v37, 1  ;;  %v4077_v10 = vrot.slane %v4076_v45, 1 }
 0x208   : > { %v4149_v43 = vrot.slane %v4148_v20, 1  ;;  %v4224_v21 = vrot.slane %v4223_v2, 4  ;;  %4488 = vst.msk [vmem:[#allocation4 + $0x18] sm:$0x1] %vm3983_vm5, %v4438_v16  ;;  %v4296_v28 = vrot.slane %v4295_v60, 4  ;;  %v4368_v42 = vrot.slane %v4367_v14, 4  ;;  %v9155_v12 = vpop.f32.mrf.mxu0 }
 0x209   : > { %v4439_v29 = vsel %vm3898_vm4, %v4425_v44, -inf  ;;  %v3933_v17 = vsel %vm3898_vm4, %v3919_v40, -inf  ;;  %3984 = vst.msk [vmem:[#allocation4 + $0x11] sm:$0x1] %vm3983_vm5, %v3932_v22  ;;  %v4006_v49 = vmax.f32 %v4004_v37, %v4005_v53  ;;  %v4078_v11 = vmax.f32 %v4076_v45, %v4077_v10  ;;  %v9183_v10 = vld [vmem:[%s9911_s3 + $0x30] sm:$0xff] }
 0x20a   : > { %v4150_v13 = vmax.f32 %v4148_v20, %v4149_v43  ;;  %v9158_v56 = vmax.f32 %v4223_v2, %v4224_v21  ;;  %v9160_v4 = vmax.f32 %v4295_v60, %v4296_v28  ;;  %v9162_v25 = vmax.f32 %v4367_v14, %v4368_v42  ;;  %v9164_v39 = vpop.f32.mrf.mxu0  ;;  %7348 = vmatprep.subr.mxu0 %v9183_v10 }
 0x20b   : > { %v4440_v52 = vrot.slane %v4439_v29, 4  ;;  %v3934_v57 = vrot.slane %v3933_v17, 4  ;;  %v4007_v16 = vsel %vm3898_vm4, %v3993_v58, -inf  ;;  %v4079_v44 = vsel %vm3898_vm4, %v4065_v9, -inf  ;;  %4056 = vst.msk [vmem:[#allocation4 + $0x12] sm:$0x1] %vm3983_vm5, %v4006_v49 }
 0x20c   : > { %v4151_v37 = vsel %vm3898_vm4, %v4137_v33, -inf  ;;  %4128 = vst.msk [vmem:[#allocation4 + $0x13] sm:$0x1] %vm3983_vm5, %v4078_v11  ;;  %4200 = vst.msk [vmem:[#allocation4 + $0x14] sm:$0x1] %vm3983_vm5, %v4150_v13  ;;  %v7248_v2 = vpop.f32.mrf.mxu0  ;;  %v4008_v58 = vrot.slane %v4007_v16, 4  ;;  %v3811_v28 = vadd.f32 %v8994_v41, %v9123_v27  ;;  %v3771_v33 = vadd.f32 %v9115_v38, %v9027_v5 }
 0x20d   : > { %v9175_v40 = vmax.f32 %v4439_v29, %v4440_v52  ;;  %v9177_v22 = vmax.f32 %v3933_v17, %v3934_v57  ;;  %v4080_v60 = vrot.slane %v4079_v44, 4  ;;  %v4152_v14 = vrot.slane %v4151_v37, 4 }
 0x20e   : > { %v3841_v53 = vmax.f32 %v9105_v6, 0.0  ;;  %v3840_v9 = vmax.f32 %v9120_v18, 0.0  ;;  %v3702_v42 = vpop.f32.mrf.mxu0  ;;  %v9191_v29 = vmax.f32 %v4007_v16, %v4008_v58  ;;  %v3843_v49 = vmax.f32 %v3811_v28, 0.0 }
 0x20f   : > { %v9193_v6 = vmax.f32 %v4079_v44, %v4080_v60  ;;  %v9195_v17 = vmax.f32 %v4151_v37, %v4152_v14  ;;  %v3774_v11 = vadd.f32 %v9125_v46, %v9031_v7  ;;  %v3773_v18 = vadd.f32 %v9136_v3, %v9035_v34 }
 0x210   : > { %v3776_v27 = vadd.f32 %v9138_v26, %v9039_v59  ;;  %v7251_v13 = vpop.f32.mrf.mxu0  ;;  %v3810_v44 = vadd.f32 %v8994_v41, %v3771_v33  ;;  %v3869_v5 = vmax.f32 %v3841_v53, %v3843_v49  ;;  %v6368_v59 = vld [vmem:[%s9911_s3 + $0x10] sm:$0xff]  ;;  %v3775_v37 = vadd.f32 %v9140_v23, %v9043_v24 }
 0x211   : > { %v3813_v38 = vadd.f32 %v8994_v41, %v3774_v11  ;;  %v3812_v7 = vadd.f32 %v8994_v41, %v3773_v18  ;;  %v3778_v58 = vadd.f32 %v9142_v62, %v9049_v36  ;;  %v3777_v60 = vadd.f32 %v9147_v61, %v9053_v54 }
 0x212   : > { %v3815_v46 = vadd.f32 %v8994_v41, %v3776_v27  ;;  %v3712_v3 = vpop.f32.mrf.mxu0  ;;  %v3842_v26 = vmax.f32 %v3810_v44, 0.0  ;;  %3886 = vst.msk [vmem:[#allocation3 + $0x28] sm:$0xff] %vm3880_vm3, %v3869_v5  ;;  %v3780_v33 = vadd.f32 %v9155_v12, %v9057_v50  ;;  %v3814_v36 = vadd.f32 %v8994_v41, %v3775_v37 }
 0x213   : > { %v4506_v34 = vld [vmem:[#allocation4 + $0x11] sm:$0xff]  ;;  %v3845_v14 = vmax.f32 %v3813_v38, 0.0  ;;  %v3844_v53 = vmax.f32 %v3812_v7, 0.0  ;;  %v3817_v54 = vadd.f32 %v8994_v41, %v3778_v58  ;;  %v3816_v23 = vadd.f32 %v8994_v41, %v3777_v60 }
 0x214   : > { %7267 = vmatmul.mubr.msk.f32.vlgmr.msra.gmra.mxu1 %vm3880_vm3, %v4506_v34  ;;  %7322 = vmatprep.mubr.msk.f32.mxu0 %vm3880_vm3, %v4506_v34  ;;  %v3847_v28 = vmax.f32 %v3815_v46, 0.0  ;;  %v7254_v49 = vpop.f32.mrf.mxu0  ;;  %v3868_v24 = vmax.f32 %v3840_v9, %v3842_v26  ;;  %v3819_v61 = vadd.f32 %v8994_v41, %v3780_v33  ;;  %v3779_v11 = vadd.f32 %v9164_v39, %v9061_v32 }
 0x215   : > { %7279 = vmatpush3.msra.mxu1 %v9130_v51  ;;  %v3782_v18 = vadd.f32 %v7248_v2, %v9065_v47  ;;  %v3846_v51 = vmax.f32 %v3814_v36, 0.0  ;;  %v3849_v12 = vmax.f32 %v3817_v54, 0.0  ;;  %v3848_v9 = vmax.f32 %v3816_v23, 0.0 }
 0x216   : > { %7292 = vmatprep.subr.mxu1 %v6368_v59  ;;  %v3871_v62 = vmax.f32 %v3845_v14, %v3847_v28  ;;  %v3722_v50 = vpop.f32.mrf.mxu0  ;;  %3885 = vst.msk [vmem:[#allocation3 + $0x20] sm:$0xff] %vm3880_vm3, %v3868_v24  ;;  %v3781_v27 = vadd.f32 %v3702_v42, %v9072_v1  ;;  %v3851_v44 = vmax.f32 %v3819_v61, 0.0  ;;  %v3818_v5 = vadd.f32 %v8994_v41, %v3779_v11 }
 0x217   : > { %v9239_v38 = vadd.f32 %v8994_v41, %v3782_v18  ;;  %v3784_v32 = vadd.f32 %v7251_v13, %v9076_v35  ;;  %v3870_v47 = vmax.f32 %v3844_v53, %v3846_v51  ;;  %v3783_v7 = vadd.f32 %v3712_v3, %v9080_v15 }
 0x218   : > { %3888 = vst.msk [vmem:[#allocation3 + $0x38] sm:$0xff] %vm3880_vm3, %v3871_v62  ;;  %v7257_v39 = vpop.f32.mrf.mxu0  ;;  %v9243_v2 = vadd.f32 %v8994_v41, %v3781_v27  ;;  %v3786_v46 = vadd.f32 %v7254_v49, %v9083_v31  ;;  %v3873_v1 = vmax.f32 %v3849_v12, %v3851_v44  ;;  %v3850_v42 = vmax.f32 %v3818_v5, 0.0 }
 0x219   : > { %v9249_v59 = vadd.f32 %v8994_v41, %v3784_v32  ;;  %v4210_v26 = vld [vmem:[#allocation3 + $0x28] sm:$0x3]  ;;  %v4282_v37 = vld [vmem:[#allocation3 + $0x2a] sm:$0x3]  ;;  %v4354_v58 = vld [vmem:[#allocation3 + $0x2c] sm:$0x3]  ;;  %v9253_v35 = vadd.f32 %v8994_v41, %v3783_v7  ;;  %v3785_v15 = vadd.f32 %v3722_v50, %v9087_v48  ;;  %v3788_v31 = vadd.f32 %v7257_v39, %v9090_v0 }
 0x21a   : > { %3887 = vst.msk [vmem:[#allocation3 + $0x30] sm:$0xff] %vm3880_vm3, %v3870_v47  ;;  %v9256_v13 = vadd.f32 %v8994_v41, %v3786_v46  ;;  %v4230_v3 = vsel %vm3898_vm4, %v4210_v26, -inf  ;;  %v4302_v60 = vsel %vm3898_vm4, %v4282_v37, -inf  ;;  %v4374_v14 = vsel %vm3898_vm4, %v4354_v58, -inf  ;;  %v4426_v53 = vld [vmem:[#allocation3 + $0x2e] sm:$0x3] }
 0x21b   : > { %3890 = vst.msk [vmem:[#allocation3 + $0x48] sm:$0xff] %vm3880_vm3, %v3873_v1  ;;  %v3872_v28 = vmax.f32 %v3848_v9, %v3850_v42  ;;  %v4231_v33 = vrot.slane %v4230_v3, 4  ;;  %v4303_v49 = vrot.slane %v4302_v60, 4  ;;  %v4375_v24 = vrot.slane %v4374_v14, 4 }
 0x21c   : > { %v4446_v36 = vsel %vm3898_vm4, %v4426_v53, -inf  ;;  %v9268_v62 = vadd.f32 %v8994_v41, %v3785_v15  ;;  %v9271_v61 = vadd.f32 %v8994_v41, %v3788_v31 }
 0x21d   : > { %v4447_v54 = vrot.slane %v4446_v36, 4  ;;  %v3920_v23 = vld [vmem:[#allocation3 + $0x20] sm:$0x3]  ;;  %v3994_v48 = vld [vmem:[#allocation3 + $0x22] sm:$0x3]  ;;  %3889 = vst.msk [vmem:[#allocation3 + $0x40] sm:$0xff] %vm3880_vm3, %v3872_v28  ;;  %v4232_v11 = vmax.f32 %v4230_v3, %v4231_v33  ;;  %v4304_v18 = vmax.f32 %v4302_v60, %v4303_v49  ;;  %v4376_v50 = vmax.f32 %v4374_v14, %v4375_v24 }
 0x21e   : > { %v3940_v51 = vsel %vm3898_vm4, %v3920_v23, -inf  ;;  %v4066_v12 = vld [vmem:[#allocation3 + $0x24] sm:$0x3]  ;;  %v4138_v9 = vld [vmem:[#allocation3 + $0x26] sm:$0x3]  ;;  %v4014_v5 = vsel %vm3898_vm4, %v3994_v48, -inf }
 0x21f   : > { %v4448_v27 = vmax.f32 %v4446_v36, %v4447_v54  ;;  %v3941_v44 = vrot.slane %v3940_v51, 4  ;;  %v4086_v32 = vsel %vm3898_vm4, %v4066_v12, -inf  ;;  %v4211_v39 = vld [vmem:[#allocation3 + $0x38] sm:$0x3]  ;;  %v4233_v47 = vrot.slane %v4232_v11, 2 }
 0x220   : > { %v4305_v7 = vrot.slane %v4304_v18, 2  ;;  %v4377_v46 = vrot.slane %v4376_v50, 2  ;;  %v4015_v1 = vrot.slane %v4014_v5, 4  ;;  %v4283_v42 = vld [vmem:[#allocation3 + $0x3a] sm:$0x3]  ;;  %v4087_v58 = vrot.slane %v4086_v32, 4 }
 0x221   : > { %v4449_v26 = vrot.slane %v4448_v27, 2  ;;  %v3942_v37 = vmax.f32 %v3940_v51, %v3941_v44  ;;  %v4158_v15 = vsel %vm3898_vm4, %v4138_v9, -inf  ;;  %v4355_v31 = vld [vmem:[#allocation3 + $0x3c] sm:$0x3]  ;;  %v9277_v3 = vmax.f32 %v4232_v11, %v4233_v47  ;;  %v4427_v36 = vld [vmem:[#allocation3 + $0x3e] sm:$0x3] }
 0x222   : > { %v9279_v60 = vmax.f32 %v4304_v18, %v4305_v7  ;;  %v9281_v14 = vmax.f32 %v4376_v50, %v4377_v46  ;;  %v4016_v53 = vmax.f32 %v4014_v5, %v4015_v1  ;;  %v4088_v49 = vmax.f32 %v4086_v32, %v4087_v58  ;;  %v3921_v9 = vld [vmem:[#allocation3 + $0x30] sm:$0x3]  ;;  %v3995_v44 = vld [vmem:[#allocation3 + $0x32] sm:$0x3] }
 0x223   : > { %v9283_v28 = vmax.f32 %v4448_v27, %v4449_v26  ;;  %v3943_v33 = vrot.slane %v3942_v37, 2  ;;  %v4159_v24 = vrot.slane %v4158_v15, 4  ;;  %v4237_v23 = vsel %vm3898_vm4, %v4211_v39, -inf }
 0x224   : > { %v4017_v54 = vrot.slane %v4016_v53, 2  ;;  %v4309_v48 = vsel %vm3898_vm4, %v4283_v42, -inf  ;;  %v4381_v51 = vsel %vm3898_vm4, %v4355_v31, -inf  ;;  %v4089_v18 = vrot.slane %v4088_v49, 2  ;;  %v4067_v42 = vld [vmem:[#allocation3 + $0x34] sm:$0x3] }
 0x225   : > { %v9288_v11 = vmax.f32 %v3942_v37, %v3943_v33  ;;  %v4160_v12 = vmax.f32 %v4158_v15, %v4159_v24  ;;  %v4238_v50 = vrot.slane %v4237_v23, 4  ;;  %v4310_v5 = vrot.slane %v4309_v48, 4  ;;  %v4139_v31 = vld [vmem:[#allocation3 + $0x36] sm:$0x3] }
 0x226   : > { %v9290_v27 = vmax.f32 %v4016_v53, %v4017_v54  ;;  %v4382_v32 = vrot.slane %v4381_v51, 4  ;;  %v4453_v47 = vsel %vm3898_vm4, %v4427_v36, -inf  ;;  %v9293_v7 = vmax.f32 %v4088_v49, %v4089_v18  ;;  %v4212_v36 = vld [vmem:[#allocation3 + $0x48] sm:$0x3]  ;;  %v4284_v54 = vld [vmem:[#allocation3 + $0x4a] sm:$0x3] }
 0x227   : > { %v4161_v39 = vrot.slane %v4160_v12, 2  ;;  %v9295_v46 = vmax.f32 %v4237_v23, %v4238_v50  ;;  %v4454_v1 = vrot.slane %v4453_v47, 4  ;;  %v9297_v26 = vmax.f32 %v4309_v48, %v4310_v5  ;;  %v4356_v50 = vld [vmem:[#allocation3 + $0x4c] sm:$0x3]  ;;  %v3922_v48 = vld [vmem:[#allocation3 + $0x40] sm:$0x3] }
 0x228   : > { %v9299_v37 = vmax.f32 %v4381_v51, %v4382_v32  ;;  %v3947_v58 = vsel %vm3898_vm4, %v3921_v9, -inf  ;;  %v4021_v15 = vsel %vm3898_vm4, %v3995_v44, -inf  ;;  %v4093_v18 = vsel %vm3898_vm4, %v4067_v42, -inf  ;;  %v4428_v32 = vld [vmem:[#allocation3 + $0x4e] sm:$0x3] }
 0x229   : > { %v9303_v53 = vmax.f32 %v4160_v12, %v4161_v39  ;;  %v9306_v49 = vmax.f32 %v4453_v47, %v4454_v1  ;;  %v3948_v24 = vrot.slane %v3947_v58, 4  ;;  %v4022_v51 = vrot.slane %v4021_v15, 4 }
 0x22a   : > { %10105 = vst [vmem:[#allocation37_spill] sm:$0xff] %v9299_v37  ;;  %v4094_v12 = vrot.slane %v4093_v18, 4  ;;  %v4165_v5 = vsel %vm3898_vm4, %v4139_v31, -inf  ;;  %v4244_v1 = vsel %vm3898_vm4, %v4212_v36, -inf  ;;  %v4316_v23 = vsel %vm3898_vm4, %v4284_v54, -inf }
 0x22b   : > { %10106 = vst [vmem:[#allocation38_spill] sm:$0xff] %v9306_v49  ;;  %v9312_v44 = vmax.f32 %v3947_v58, %v3948_v24  ;;  %v9315_v47 = vmax.f32 %v4021_v15, %v4022_v51  ;;  %v4166_v39 = vrot.slane %v4165_v5, 4  ;;  %v4245_v43 = vrot.slane %v4244_v1, 4  ;;  %v3996_v58 = vld [vmem:[#allocation3 + $0x42] sm:$0x3]  ;;  %v9322_v24 = vpop.f32.mrf.mxu0 }
 0x22c   : > { %v9320_v42 = vmax.f32 %v4093_v18, %v4094_v12  ;;  %v4317_v9 = vrot.slane %v4316_v23, 4  ;;  %v4388_v15 = vsel %vm3898_vm4, %v4356_v50, -inf  ;;  %v4460_v36 = vsel %vm3898_vm4, %v4428_v32, -inf  ;;  %v4068_v18 = vld [vmem:[#allocation3 + $0x44] sm:$0x3] }
 0x22d   : > { %v9325_v20 = vmax.f32 %v4165_v5, %v4166_v39  ;;  %v4246_v51 = vmax.f32 %v4244_v1, %v4245_v43  ;;  %v4389_v33 = vrot.slane %v4388_v15, 4  ;;  %v4140_v12 = vld [vmem:[#allocation3 + $0x46] sm:$0x3]  ;;  %v4461_v16 = vrot.slane %v4460_v36, 4  ;;  %v9333_v21 = vpop.f32.mrf.mxu0 }
 0x22e   : > { %v4318_v45 = vmax.f32 %v4316_v23, %v4317_v9  ;;  %v3954_v57 = vsel %vm3898_vm4, %v3922_v48, -inf  ;;  %v4028_v31 = vsel %vm3898_vm4, %v3996_v58, -inf  ;;  %v4100_v43 = vsel %vm3898_vm4, %v4068_v18, -inf }
 0x22f   : > { %v4247_v5 = vrot.slane %v4246_v51, 2  ;;  %v4390_v52 = vmax.f32 %v4388_v15, %v4389_v33  ;;  %v3955_v50 = vrot.slane %v3954_v57, 4  ;;  %v4462_v32 = vmax.f32 %v4460_v36, %v4461_v16  ;;  %v3742_v18 = vpop.f32.mrf.mxu0 }
 0x230   : > { %v4319_v39 = vrot.slane %v4318_v45, 2  ;;  %v4029_v54 = vrot.slane %v4028_v31, 4  ;;  %v4172_v23 = vsel %vm3898_vm4, %v4140_v12, -inf  ;;  %v4101_v34 = vrot.slane %v4100_v43, 4 }
 0x231   : > { %v9337_v9 = vmax.f32 %v4246_v51, %v4247_v5  ;;  %v4391_v30 = vrot.slane %v4390_v52, 2  ;;  %v3956_v48 = vmax.f32 %v3954_v57, %v3955_v50  ;;  %v4463_v0 = vrot.slane %v4462_v32, 2 }
 0x232   : > { %v9339_v1 = vmax.f32 %v4318_v45, %v4319_v39  ;;  %v4030_v58 = vmax.f32 %v4028_v31, %v4029_v54  ;;  %v4173_v49 = vrot.slane %v4172_v23, 4  ;;  %v3855_v16 = vmax.f32 %v9249_v59, 0.0 }
 0x233   : > { %v9341_v33 = vmax.f32 %v4390_v52, %v4391_v30  ;;  %v3957_v15 = vrot.slane %v3956_v48, 2  ;;  %v3854_v36 = vmax.f32 %v9253_v35, 0.0  ;;  %v9345_v37 = vmax.f32 %v4462_v32, %v4463_v0 }
 0x234   : > { %v4031_v51 = vrot.slane %v4030_v58, 2  ;;  %v4102_v12 = vmax.f32 %v4100_v43, %v4101_v34  ;;  %v4174_v45 = vmax.f32 %v4172_v23, %v4173_v49  ;;  %v10107_v57 = vmax.f32 %v9239_v38, 0.0  ;;  %v7263_v43 = vpop.f32.mrf.mxu0 }
 0x235   : > { %v9347_v5 = vmax.f32 %v3956_v48, %v3957_v15  ;;  %v10108_v54 = vmax.f32 %v9243_v2, 0.0  ;;  %v3857_v52 = vmax.f32 %v9256_v13, 0.0  ;;  %v3856_v0 = vmax.f32 %v9268_v62, 0.0 }
 0x236   : > { %v3875_v31 = vmax.f32 %v10107_v57, %v3855_v16  ;;  %v9354_v39 = vmax.f32 %v4030_v58, %v4031_v51  ;;  %v4103_v59 = vrot.slane %v4102_v12, 2  ;;  %v4175_v35 = vrot.slane %v4174_v45, 2 }
 0x237   : > { %v3874_v30 = vmax.f32 %v10108_v54, %v3854_v36  ;;  %v3859_v34 = vmax.f32 %v9271_v61, 0.0  ;;  %v10109_v38 = vrot.slane %v9177_v22, 2  ;;  %v10110_v2 = vrot.slane %v9191_v29, 2 }
 0x238   : > { %3892 = vst.msk [vmem:[#allocation3 + $0x58] sm:$0xff] %vm3880_vm3, %v3875_v31  ;;  %v10111_v50 = vrot.slane %v9193_v6, 2  ;;  %v9369_v23 = vmax.f32 %v4102_v12, %v4103_v59  ;;  %v9371_v48 = vmax.f32 %v4174_v45, %v4175_v35  ;;  %v10112_v58 = vrot.slane %v9195_v17, 2  ;;  %v3752_v35 = vpop.f32.mrf.mxu0 }
 0x239   : > { %3891 = vst.msk [vmem:[#allocation3 + $0x50] sm:$0xff] %vm3880_vm3, %v3874_v30  ;;  %v3937_v49 = vmax.f32 %v9177_v22, %v10109_v38  ;;  %v4011_v13 = vmax.f32 %v9191_v29, %v10110_v2  ;;  %v10113_v15 = vrot.slane %v9158_v56, 2  ;;  %v3877_v16 = vmax.f32 %v3857_v52, %v3859_v34 }
 0x23a   : > { %v4083_v32 = vmax.f32 %v9193_v6, %v10111_v50  ;;  %v4155_v61 = vmax.f32 %v9195_v17, %v10112_v58  ;;  %v10114_v6 = vrot.slane %v9160_v4, 2  ;;  %v10115_v45 = vrot.slane %v9162_v25, 2 }
 0x23b   : > { %v4227_v22 = vmax.f32 %v9158_v56, %v10113_v15  ;;  %v3938_v36 = vrot.slane %v3937_v49, 1  ;;  %v4012_v29 = vrot.slane %v4011_v13, 1  ;;  %3894 = vst.msk [vmem:[#allocation3 + $0x68] sm:$0xff] %vm3880_vm3, %v3877_v16  ;;  %v10116_v56 = vrot.slane %v9175_v40, 2  ;;  %v10117_v16 = vld [vmem:[#allocation36_spill] sm:$0xff] }
 0x23c   : > { %v4084_v51 = vrot.slane %v4083_v32, 1  ;;  %v4156_v57 = vrot.slane %v4155_v61, 1  ;;  %v4299_v12 = vmax.f32 %v9160_v4, %v10114_v6  ;;  %v4371_v54 = vmax.f32 %v9162_v25, %v10115_v45 }
 0x23d   : > { %v4228_v31 = vrot.slane %v4227_v22, 1  ;;  %v3939_v17 = vmax.f32 %v3937_v49, %v3938_v36  ;;  %v4013_v30 = vmax.f32 %v4011_v13, %v4012_v29  ;;  %v4443_v52 = vmax.f32 %v9175_v40, %v10116_v56 }
 0x23e   : > { %v4085_v59 = vmax.f32 %v4083_v32, %v4084_v51  ;;  %v4157_v34 = vmax.f32 %v4155_v61, %v4156_v57  ;;  %v4300_v2 = vrot.slane %v4299_v12, 1  ;;  %v4372_v50 = vrot.slane %v4371_v54, 1 }
 0x23f   : > { %v4229_v38 = vmax.f32 %v4227_v22, %v4228_v31  ;;  %3985 = vst.msk [vmem:[#allocation4 + $0x21] sm:$0x1] %vm3983_vm5, %v3939_v17  ;;  %4057 = vst.msk [vmem:[#allocation4 + $0x22] sm:$0x1] %vm3983_vm5, %v4013_v30  ;;  %v4444_v4 = vrot.slane %v4443_v52, 1  ;;  %v3787_v25 = vadd.f32 %v9322_v24, %v9093_v55  ;;  %v3790_v49 = vadd.f32 %v9333_v21, %v9096_v63 }
 0x240   : > { %4129 = vst.msk [vmem:[#allocation4 + $0x23] sm:$0x1] %vm3983_vm5, %v4085_v59  ;;  %v9397_v40 = vadd.f32 %v3742_v18, %v9099_v19  ;;  %v4213_v13 = vld [vmem:[#allocation3 + $0x58] sm:$0x3]  ;;  %v4285_v32 = vld [vmem:[#allocation3 + $0x5a] sm:$0x3]  ;;  %v4301_v61 = vmax.f32 %v4299_v12, %v4300_v2  ;;  %v4373_v15 = vmax.f32 %v4371_v54, %v4372_v50  ;;  %v9402_v22 = vadd.f32 %v7263_v43, %v9102_v8 }
 0x241   : > { %v4357_v58 = vld [vmem:[#allocation3 + $0x5c] sm:$0x3]  ;;  %4201 = vst.msk [vmem:[#allocation4 + $0x24] sm:$0x1] %vm3983_vm5, %v4157_v34  ;;  %4273 = vst.msk [vmem:[#allocation4 + $0x25] sm:$0x1] %vm3983_vm5, %v4229_v38  ;;  %v9405_v55 = vadd.f32 %v3752_v35, %v10117_v16  ;;  %v4445_v18 = vmax.f32 %v4443_v52, %v4444_v4  ;;  %v3826_v45 = vadd.f32 %v8994_v41, %v3787_v25 }
 0x242   : > { %v4251_v63 = vsel %vm3898_vm4, %v4213_v13, -inf  ;;  %v4323_v19 = vsel %vm3898_vm4, %v4285_v32, -inf  ;;  %v4395_v21 = vsel %vm3898_vm4, %v4357_v58, -inf  ;;  %v4429_v24 = vld [vmem:[#allocation3 + $0x5e] sm:$0x3]  ;;  %v9417_v54 = vadd.f32 %v8994_v41, %v3790_v49 }
 0x243   : > { %v4252_v36 = vrot.slane %v4251_v63, 4  ;;  %v4324_v29 = vrot.slane %v4323_v19, 4  ;;  %v4396_v51 = vrot.slane %v4395_v21, 4  ;;  %v4467_v57 = vsel %vm3898_vm4, %v4429_v24, -inf  ;;  %v3923_v31 = vld [vmem:[#allocation3 + $0x50] sm:$0x3] }
 0x244   : > { %4345 = vst.msk [vmem:[#allocation4 + $0x26] sm:$0x1] %vm3983_vm5, %v4301_v61  ;;  %4417 = vst.msk [vmem:[#allocation4 + $0x27] sm:$0x1] %vm3983_vm5, %v4373_v15  ;;  %v4468_v8 = vrot.slane %v4467_v57, 4  ;;  %v3961_v43 = vsel %vm3898_vm4, %v3923_v31, -inf }
 0x245   : > { %v3997_v6 = vld [vmem:[#allocation3 + $0x52] sm:$0x3]  ;;  %v4069_v12 = vld [vmem:[#allocation3 + $0x54] sm:$0x3]  ;;  %4489 = vst.msk [vmem:[#allocation4 + $0x28] sm:$0x1] %vm3983_vm5, %v4445_v18  ;;  %v9419_v17 = vmax.f32 %v4251_v63, %v4252_v36  ;;  %v9421_v30 = vmax.f32 %v4323_v19, %v4324_v29  ;;  %v9423_v59 = vmax.f32 %v4395_v21, %v4396_v51 }
 0x246   : > { %v3962_v56 = vrot.slane %v3961_v43, 4  ;;  %v4141_v52 = vld [vmem:[#allocation3 + $0x56] sm:$0x3]  ;;  %v4214_v35 = vld [vmem:[#allocation3 + $0x68] sm:$0x3]  ;;  %v9425_v34 = vmax.f32 %v4467_v57, %v4468_v8  ;;  %v4035_v38 = vsel %vm3898_vm4, %v3997_v6, -inf }
 0x247   : > { %v4107_v2 = vsel %vm3898_vm4, %v4069_v12, -inf  ;;  %v4179_v50 = vsel %vm3898_vm4, %v4141_v52, -inf  ;;  %v4286_v4 = vld [vmem:[#allocation3 + $0x6a] sm:$0x3]  ;;  %v4254_v41 = vrot.slane %v9419_v17, 2  ;;  %v4326_v25 = vrot.slane %v9421_v30, 2 }
 0x248   : > { %v4398_v49 = vrot.slane %v9423_v59, 2  ;;  %v9433_v13 = vmax.f32 %v3961_v43, %v3962_v56  ;;  %v4358_v32 = vld [vmem:[#allocation3 + $0x6c] sm:$0x3]  ;;  %v4036_v61 = vrot.slane %v4035_v38, 4  ;;  %v4108_v15 = vrot.slane %v4107_v2, 4  ;;  %v9452_v56 = vld [vmem:[%s9911_s3 + $0x40] sm:$0xff] }
 0x249   : > { %v4180_v16 = vrot.slane %v4179_v50, 4  ;;  %v4430_v63 = vld [vmem:[#allocation3 + $0x6e] sm:$0x3]  ;;  %v4258_v21 = vsel %vm3898_vm4, %v4214_v35, -inf  ;;  %v4330_v24 = vsel %vm3898_vm4, %v4286_v4, -inf  ;;  %v4402_v18 = vsel %vm3898_vm4, %v4358_v32, -inf }
 0x24a   : > { %v3964_v19 = vrot.slane %v9433_v13, 2  ;;  %v9440_v36 = vmax.f32 %v4035_v38, %v4036_v61  ;;  %v9442_v29 = vmax.f32 %v4107_v2, %v4108_v15  ;;  %v4259_v57 = vrot.slane %v4258_v21, 4 }
 0x24b   : > { %v9444_v51 = vmax.f32 %v4179_v50, %v4180_v16  ;;  %v4331_v31 = vrot.slane %v4330_v24, 4  ;;  %v4403_v8 = vrot.slane %v4402_v18, 4  ;;  %v4474_v43 = vsel %vm3898_vm4, %v4430_v63, -inf  ;;  %v7401_v16 = vld [vmem:[%s9910_s2] ss:$0 sm:$0xff] }
 0x24c   : > { %v9447_v6 = vld [vmem:[#allocation4 + $0x21] sm:$0xff]  ;;  %v3858_v12 = vmax.f32 %v3826_v45, 0.0  ;;  %v4038_v52 = vrot.slane %v9440_v36, 2  ;;  %v4110_v35 = vrot.slane %v9442_v29, 2  ;;  %v4260_v2 = vmax.f32 %v4258_v21, %v4259_v57 }
 0x24d   : > { %v4182_v38 = vrot.slane %v9444_v51, 2  ;;  %7269 = vmatprep.mubr.msk.f32.mxu1 %vm3880_vm3, %v9447_v6  ;;  %7323 = vmatmul.mubr.msk.f32.vlgmr.msra.gmra.mxu0 %vm3880_vm3, %v9447_v6  ;;  %v4332_v50 = vmax.f32 %v4330_v24, %v4331_v31  ;;  %v4404_v45 = vmax.f32 %v4402_v18, %v4403_v8  ;;  %v4475_v4 = vrot.slane %v4474_v43, 4 }
 0x24e   : > { %v3876_v32 = vmax.f32 %v3856_v0, %v3858_v12  ;;  %7349 = vmatpush3.msra.mxu0 %v9183_v10  ;;  %v4261_v61 = vrot.slane %v4260_v2, 2  ;;  %v3861_v15 = vmax.f32 %v9417_v54, 0.0  ;;  %v3828_v63 = vadd.f32 %v7401_v16, %v9397_v40 }
 0x24f   : > { %v3831_v21 = vadd.f32 %v7401_v16, %v9402_v22  ;;  %7376 = vmatprep.subr.mxu0 %v9452_v56  ;;  %v4333_v24 = vrot.slane %v4332_v50, 2  ;;  %v4405_v18 = vrot.slane %v4404_v45, 2  ;;  %v4476_v57 = vmax.f32 %v4474_v43, %v4475_v4 }
 0x250   : > { %3893 = vst.msk [vmem:[#allocation3 + $0x60] sm:$0xff] %vm3880_vm3, %v3876_v32  ;;  %v3945_v10 = vrot.slane %v9288_v11, 1  ;;  %v9473_v62 = vmax.f32 %v4260_v2, %v4261_v61  ;;  %v3860_v0 = vmax.f32 %v3828_v63, 0.0  ;;  %v4019_v31 = vrot.slane %v9290_v27, 1 }
 0x251   : > { %v3863_v54 = vmax.f32 %v3831_v21, 0.0  ;;  %v9476_v8 = vmax.f32 %v4332_v50, %v4333_v24  ;;  %v9478_v40 = vmax.f32 %v4404_v45, %v4405_v18  ;;  %v4477_v22 = vrot.slane %v4476_v57, 2 }
 0x252   : > { %v3946_v12 = vmax.f32 %v9288_v11, %v3945_v10  ;;  %v4020_v43 = vmax.f32 %v9290_v27, %v4019_v31  ;;  %v4091_v4 = vrot.slane %v9293_v7, 1  ;;  %v4163_v32 = vrot.slane %v9303_v53, 1 }
 0x253   : > { %v3879_v58 = vmax.f32 %v3861_v15, %v3863_v54  ;;  %v9484_v2 = vmax.f32 %v4476_v57, %v4477_v22  ;;  %v4235_v61 = vrot.slane %v9277_v3, 1  ;;  %v4307_v50 = vrot.slane %v9279_v60, 1 }
 0x254   : > { %3986 = vst.msk [vmem:[#allocation4 + $0x31] sm:$0x1] %vm3983_vm5, %v3946_v12  ;;  %v4379_v45 = vrot.slane %v9281_v14, 1  ;;  %4058 = vst.msk [vmem:[#allocation4 + $0x32] sm:$0x1] %vm3983_vm5, %v4020_v43  ;;  %v4092_v11 = vmax.f32 %v9293_v7, %v4091_v4  ;;  %v4164_v27 = vmax.f32 %v9303_v53, %v4163_v32  ;;  %v4451_v15 = vrot.slane %v9283_v28, 1 }
 0x255   : > { %3896 = vst.msk [vmem:[#allocation3 + $0x78] sm:$0xff] %vm3880_vm3, %v3879_v58  ;;  %v3830_v63 = vadd.f32 %v7401_v16, %v9405_v55  ;;  %v4236_v21 = vmax.f32 %v9277_v3, %v4235_v61  ;;  %v4308_v24 = vmax.f32 %v9279_v60, %v4307_v50  ;;  %v10118_v57 = vrot.slane %v9312_v44, 2 }
 0x256   : > { %v4380_v18 = vmax.f32 %v9281_v14, %v4379_v45  ;;  %4130 = vst.msk [vmem:[#allocation4 + $0x33] sm:$0x1] %vm3983_vm5, %v4092_v11  ;;  %4202 = vst.msk [vmem:[#allocation4 + $0x34] sm:$0x1] %vm3983_vm5, %v4164_v27  ;;  %v4452_v7 = vmax.f32 %v9283_v28, %v4451_v15  ;;  %v10119_v53 = vrot.slane %v9315_v47, 2  ;;  %v10120_v60 = vrot.slane %v9320_v42, 2 }
 0x257   : > { %v3951_v58 = vmax.f32 %v9312_v44, %v10118_v57  ;;  %v3924_v10 = vld [vmem:[#allocation3 + $0x60] sm:$0x3]  ;;  %v3998_v54 = vld [vmem:[#allocation3 + $0x62] sm:$0x3]  ;;  %v4070_v31 = vld [vmem:[#allocation3 + $0x64] sm:$0x3] }
 0x258   : > { %v4025_v3 = vmax.f32 %v9315_v47, %v10119_v53  ;;  %v4097_v14 = vmax.f32 %v9320_v42, %v10120_v60  ;;  %v10121_v55 = vrot.slane %v9325_v20, 2  ;;  %v3968_v16 = vsel %vm3898_vm4, %v3924_v10, -inf  ;;  %v4142_v28 = vld [vmem:[#allocation3 + $0x66] sm:$0x3]  ;;  %4274 = vst.msk [vmem:[#allocation4 + $0x35] sm:$0x1] %vm3983_vm5, %v4236_v21 }
 0x259   : > { %v4042_v22 = vsel %vm3898_vm4, %v3998_v54, -inf  ;;  %v4114_v12 = vsel %vm3898_vm4, %v4070_v31, -inf  ;;  %4346 = vst.msk [vmem:[#allocation4 + $0x36] sm:$0x1] %vm3983_vm5, %v4308_v24  ;;  %4418 = vst.msk [vmem:[#allocation4 + $0x37] sm:$0x1] %vm3983_vm5, %v4380_v18 }
 0x25a   : > { %v9514_v44 = vmax.f32 %v9325_v20, %v10121_v55  ;;  %v3862_v47 = vmax.f32 %v3830_v63, 0.0  ;;  %v3969_v42 = vrot.slane %v3968_v16, 4  ;;  %v4043_v43 = vrot.slane %v4042_v22, 4  ;;  %4490 = vst.msk [vmem:[#allocation4 + $0x38] sm:$0x1] %vm3983_vm5, %v4452_v7 }
 0x25b   : > { %v4115_v4 = vrot.slane %v4114_v12, 4  ;;  %v4186_v20 = vsel %vm3898_vm4, %v4142_v28, -inf  ;;  %v3952_v50 = vrot.slane %v3951_v58, 1  ;;  %v4026_v45 = vrot.slane %v4025_v3, 1 }
 0x25c   : > { %v4187_v32 = vrot.slane %v4186_v20, 4  ;;  %v3878_v61 = vmax.f32 %v3860_v0, %v3862_v47  ;;  %v3970_v11 = vmax.f32 %v3968_v16, %v3969_v42  ;;  %v4044_v27 = vmax.f32 %v4042_v22, %v4043_v43  ;;  %v4215_v24 = vld [vmem:[#allocation3 + $0x78] sm:$0x3]  ;;  %v4287_v10 = vld [vmem:[#allocation3 + $0x7a] sm:$0x3] }
 0x25d   : > { %v4116_v15 = vmax.f32 %v4114_v12, %v4115_v4  ;;  %v4098_v21 = vrot.slane %v4097_v14, 1  ;;  %v4359_v18 = vld [vmem:[#allocation3 + $0x7c] sm:$0x3]  ;;  %v3953_v63 = vmax.f32 %v3951_v58, %v3952_v50  ;;  %v4027_v54 = vmax.f32 %v4025_v3, %v4026_v45  ;;  %v4431_v16 = vld [vmem:[#allocation3 + $0x7e] sm:$0x3] }
 0x25e   : > { %v4188_v57 = vmax.f32 %v4186_v20, %v4187_v32  ;;  %3895 = vst.msk [vmem:[#allocation3 + $0x70] sm:$0xff] %vm3880_vm3, %v3878_v61  ;;  %v10122_v31 = vrot.slane %v9295_v46, 2  ;;  %v3971_v53 = vrot.slane %v3970_v11, 2  ;;  %v4045_v0 = vrot.slane %v4044_v27, 2 }
 0x25f   : > { %v4117_v60 = vrot.slane %v4116_v15, 2  ;;  %v4265_v55 = vsel %vm3898_vm4, %v4215_v24, -inf  ;;  %v4337_v28 = vsel %vm3898_vm4, %v4287_v10, -inf  ;;  %v4409_v47 = vsel %vm3898_vm4, %v4359_v18, -inf  ;;  %3987 = vst.msk [vmem:[#allocation4 + $0x41] sm:$0x1] %vm3983_vm5, %v3953_v63 }
 0x260   : > { %v4241_v7 = vmax.f32 %v9295_v46, %v10122_v31  ;;  %v4189_v22 = vrot.slane %v4188_v57, 2  ;;  %v4266_v12 = vrot.slane %v4265_v55, 4  ;;  %4059 = vst.msk [vmem:[#allocation4 + $0x42] sm:$0x1] %vm3983_vm5, %v4027_v54  ;;  %v9533_v58 = vmax.f32 %v3970_v11, %v3971_v53 }
 0x261   : > { %v9535_v3 = vmax.f32 %v4044_v27, %v4045_v0  ;;  %v9537_v46 = vmax.f32 %v4116_v15, %v4117_v60  ;;  %v4338_v42 = vrot.slane %v4337_v28, 4  ;;  %v4410_v20 = vrot.slane %v4409_v47, 4  ;;  %v9542_v61 = vld [vmem:[#allocation4 + $0x31] sm:$0xff] }
 0x262   : > { %v9539_v43 = vmax.f32 %v4188_v57, %v4189_v22  ;;  %v4267_v4 = vmax.f32 %v4265_v55, %v4266_v12  ;;  %v4481_v32 = vsel %vm3898_vm4, %v4431_v16, -inf  ;;  %7270 = vmatmul.mubr.msk.f32.gmra.mxu1 %vm3880_vm3, %v9542_v61  ;;  %7325 = vmatprep.mubr.msk.f32.mxu0 %vm3880_vm3, %v9542_v61  ;;  %v4099_v11 = vmax.f32 %v4097_v14, %v4098_v21  ;;  %v10124_v60 = vld [vmem:[#allocation37_spill] sm:$0xff] }
 0x263   : > { %v4339_v50 = vmax.f32 %v4337_v28, %v4338_v42  ;;  %v4482_v45 = vrot.slane %v4481_v32, 4  ;;  %v4170_v27 = vrot.slane %v9514_v44, 1  ;;  %v4411_v57 = vmax.f32 %v4409_v47, %v4410_v20 }
 0x264   : > { %v4268_v15 = vrot.slane %v4267_v4, 2  ;;  %v4242_v24 = vrot.slane %v4241_v7, 1  ;;  %v10123_v10 = vrot.slane %v9297_v26, 2  ;;  %4131 = vst.msk [vmem:[#allocation4 + $0x43] sm:$0x1] %vm3983_vm5, %v4099_v11  ;;  %v10125_v55 = vrot.slane %v10124_v60, 2 }
 0x265   : > { %v4340_v63 = vrot.slane %v4339_v50, 2  ;;  %v4483_v54 = vmax.f32 %v4481_v32, %v4482_v45  ;;  %v3925_v31 = vld [vmem:[#allocation3 + $0x70] sm:$0x3]  ;;  %v3999_v53 = vld [vmem:[#allocation3 + $0x72] sm:$0x3]  ;;  %v4171_v0 = vmax.f32 %v9514_v44, %v4170_v27  ;;  %v4412_v16 = vrot.slane %v4411_v57, 2 }
 0x266   : > { %v4313_v18 = vmax.f32 %v9297_v26, %v10123_v10  ;;  %v4385_v14 = vmax.f32 %v10124_v60, %v10125_v55  ;;  %v9557_v21 = vmax.f32 %v4267_v4, %v4268_v15  ;;  %v3975_v22 = vsel %vm3898_vm4, %v3925_v31, -inf  ;;  %v4071_v26 = vld [vmem:[#allocation3 + $0x74] sm:$0x3]  ;;  %v4143_v32 = vld [vmem:[#allocation3 + $0x76] sm:$0x3]  ;;  %v10126_v60 = vld [vmem:[#allocation38_spill] sm:$0xff] }
 0x267   : > { %v4049_v12 = vsel %vm3898_vm4, %v3999_v53, -inf  ;;  %v9561_v28 = vmax.f32 %v4339_v50, %v4340_v63  ;;  %v4484_v47 = vrot.slane %v4483_v54, 2  ;;  %v3976_v42 = vrot.slane %v3975_v22, 4  ;;  %4203 = vst.msk [vmem:[#allocation4 + $0x44] sm:$0x1] %vm3983_vm5, %v4171_v0 }
 0x268   : > { %v4050_v20 = vrot.slane %v4049_v12, 4  ;;  %v9564_v44 = vmax.f32 %v4411_v57, %v4412_v16  ;;  %v4121_v45 = vsel %vm3898_vm4, %v4071_v26, -inf  ;;  %v4193_v4 = vsel %vm3898_vm4, %v4143_v32, -inf }
 0x269   : > { %v4243_v11 = vmax.f32 %v4241_v7, %v4242_v24  ;;  %v9568_v27 = vmax.f32 %v4483_v54, %v4484_v47  ;;  %v3977_v15 = vmax.f32 %v3975_v22, %v3976_v42  ;;  %v4122_v31 = vrot.slane %v4121_v45, 4 }
 0x26a   : > { %v4051_v10 = vmax.f32 %v4049_v12, %v4050_v20  ;;  %v4194_v50 = vrot.slane %v4193_v4, 4  ;;  %v4314_v63 = vrot.slane %v4313_v18, 1  ;;  %v4386_v53 = vrot.slane %v4385_v14, 1 }
 0x26b   : > { %4275 = vst.msk [vmem:[#allocation4 + $0x45] sm:$0x1] %vm3983_vm5, %v4243_v11  ;;  %v10127_v55 = vrot.slane %v10126_v60, 2  ;;  %v3978_v0 = vrot.slane %v3977_v15, 2  ;;  %v4123_v26 = vmax.f32 %v4121_v45, %v4122_v31  ;;  %v3959_v32 = vrot.slane %v9347_v5, 1 }
 0x26c   : > { %v4052_v16 = vrot.slane %v4051_v10, 2  ;;  %v4195_v7 = vmax.f32 %v4193_v4, %v4194_v50  ;;  %v4315_v24 = vmax.f32 %v4313_v18, %v4314_v63  ;;  %v4387_v54 = vmax.f32 %v4385_v14, %v4386_v53 }
 0x26d   : > { %v4457_v57 = vmax.f32 %v10126_v60, %v10127_v55  ;;  %v9575_v12 = vmax.f32 %v3977_v15, %v3978_v0  ;;  %v4124_v42 = vrot.slane %v4123_v26, 2  ;;  %v3960_v20 = vmax.f32 %v9347_v5, %v3959_v32 }
 0x26e   : > { %v9577_v47 = vmax.f32 %v4051_v10, %v4052_v16  ;;  %v4196_v11 = vrot.slane %v4195_v7, 2  ;;  %4347 = vst.msk [vmem:[#allocation4 + $0x46] sm:$0x1] %vm3983_vm5, %v4315_v24  ;;  %4419 = vst.msk [vmem:[#allocation4 + $0x47] sm:$0x1] %vm3983_vm5, %v4387_v54  ;;  %v4033_v45 = vrot.slane %v9354_v39, 1 }
 0x26f   : > { %v4458_v22 = vrot.slane %v4457_v57, 1  ;;  %v4105_v4 = vrot.slane %v9369_v23, 1  ;;  %v9584_v18 = vmax.f32 %v4123_v26, %v4124_v42  ;;  %3988 = vst.msk [vmem:[#allocation4 + $0x51] sm:$0x1] %vm3983_vm5, %v3960_v20  ;;  %v4177_v14 = vrot.slane %v9371_v48, 1 }
 0x270   : > { %v4249_v15 = vrot.slane %v9337_v9, 1  ;;  %v4321_v5 = vrot.slane %v9339_v1, 1  ;;  %v9590_v10 = vmax.f32 %v4195_v7, %v4196_v11  ;;  %v4034_v31 = vmax.f32 %v9354_v39, %v4033_v45 }
 0x271   : > { %v4459_v60 = vmax.f32 %v4457_v57, %v4458_v22  ;;  %v4106_v50 = vmax.f32 %v9369_v23, %v4105_v4  ;;  %v4393_v63 = vrot.slane %v9341_v33, 1  ;;  %v4178_v53 = vmax.f32 %v9371_v48, %v4177_v14 }
 0x272   : > { %v4250_v55 = vmax.f32 %v9337_v9, %v4249_v15  ;;  %v4322_v57 = vmax.f32 %v9339_v1, %v4321_v5  ;;  %v4465_v0 = vrot.slane %v9345_v37, 1  ;;  %4060 = vst.msk [vmem:[#allocation4 + $0x52] sm:$0x1] %vm3983_vm5, %v4034_v31  ;;  %v3965_v39 = vmax.f32 %v9433_v13, %v3964_v19 }
 0x273   : > { %4491 = vst.msk [vmem:[#allocation4 + $0x48] sm:$0x1] %vm3983_vm5, %v4459_v60  ;;  %4132 = vst.msk [vmem:[#allocation4 + $0x53] sm:$0x1] %vm3983_vm5, %v4106_v50  ;;  %v4394_v16 = vmax.f32 %v9341_v33, %v4393_v63  ;;  %v4039_v23 = vmax.f32 %v9440_v36, %v4038_v52  ;;  %v4111_v9 = vmax.f32 %v9442_v29, %v4110_v35  ;;  %v4119_v42 = vrot.slane %v9537_v46, 1 }
 0x274   : > { %4204 = vst.msk [vmem:[#allocation4 + $0x54] sm:$0x1] %vm3983_vm5, %v4178_v53  ;;  %4276 = vst.msk [vmem:[#allocation4 + $0x55] sm:$0x1] %vm3983_vm5, %v4250_v55  ;;  %v4466_v1 = vmax.f32 %v9345_v37, %v4465_v0  ;;  %v4183_v33 = vmax.f32 %v9444_v51, %v4182_v38  ;;  %v4255_v48 = vmax.f32 %v9419_v17, %v4254_v41  ;;  %v3966_v19 = vrot.slane %v3965_v39, 1 }
 0x275   : > { %4348 = vst.msk [vmem:[#allocation4 + $0x56] sm:$0x1] %vm3983_vm5, %v4322_v57  ;;  %v4327_v13 = vmax.f32 %v9421_v30, %v4326_v25  ;;  %4420 = vst.msk [vmem:[#allocation4 + $0x57] sm:$0x1] %vm3983_vm5, %v4394_v16  ;;  %v4040_v36 = vrot.slane %v4039_v23, 1  ;;  %v4112_v29 = vrot.slane %v4111_v9, 1  ;;  %v4399_v37 = vmax.f32 %v9423_v59, %v4398_v49 }
 0x276   : > { %4492 = vst.msk [vmem:[#allocation4 + $0x58] sm:$0x1] %vm3983_vm5, %v4466_v1  ;;  %v4184_v51 = vrot.slane %v4183_v33, 1  ;;  %v4256_v52 = vrot.slane %v4255_v48, 1  ;;  %v10128_v17 = vrot.slane %v9425_v34, 2  ;;  %v3967_v38 = vmax.f32 %v3965_v39, %v3966_v19  ;;  %v4499_v19 = vld [vmem:[#allocation4 + $0x30] sm:$0xff] }
 0x277   : > { %v4328_v35 = vrot.slane %v4327_v13, 1  ;;  %v4041_v30 = vmax.f32 %v4039_v23, %v4040_v36  ;;  %v4113_v25 = vmax.f32 %v4111_v9, %v4112_v29  ;;  %v4400_v26 = vrot.slane %v4399_v37, 1  ;;  %v4500_v36 = vld [vmem:[#allocation4 + $0x40] sm:$0xff] }
 0x278   : > { %v4471_v41 = vmax.f32 %v9425_v34, %v10128_v17  ;;  %v4185_v7 = vmax.f32 %v4183_v33, %v4184_v51  ;;  %v4257_v24 = vmax.f32 %v4255_v48, %v4256_v52  ;;  %3989 = vst.msk [vmem:[#allocation4 + $0x61] sm:$0x1] %vm3983_vm5, %v3967_v38  ;;  %v3973_v34 = vrot.slane %v9533_v58, 1  ;;  %v4498_v48 = vld [vmem:[#allocation4 + $0x20] sm:$0xff]  ;;  %v4774_v17 = vld [vmem:[#allocation4 + $0x12] sm:$0xff] }
 0x279   : > { %v4329_v54 = vmax.f32 %v4327_v13, %v4328_v35  ;;  %4061 = vst.msk [vmem:[#allocation4 + $0x62] sm:$0x1] %vm3983_vm5, %v4041_v30  ;;  %4133 = vst.msk [vmem:[#allocation4 + $0x63] sm:$0x1] %vm3983_vm5, %v4113_v25  ;;  %v4401_v59 = vmax.f32 %v4399_v37, %v4400_v26  ;;  %v4047_v49 = vrot.slane %v9535_v3, 1  ;;  %v4191_v11 = vrot.slane %v9539_v43, 1 }
 0x27a   : > { %v9633_v32 = vld [vmem:[#allocation4 + $0x41] sm:$0xff]  ;;  %v4472_v22 = vrot.slane %v4471_v41, 1  ;;  %4205 = vst.msk [vmem:[#allocation4 + $0x64] sm:$0x1] %vm3983_vm5, %v4185_v7  ;;  %4277 = vst.msk [vmem:[#allocation4 + $0x65] sm:$0x1] %vm3983_vm5, %v4257_v24  ;;  %v3974_v4 = vmax.f32 %v9533_v58, %v3973_v34  ;;  %v4120_v15 = vmax.f32 %v9537_v46, %v4119_v42 }
 0x27b   : > { %7272 = vmatprep.mubr.msk.f32.mxu1 %vm3880_vm3, %v9633_v32  ;;  %7326 = vmatmul.mubr.msk.f32.gmra.mxu0 %vm3880_vm3, %v9633_v32  ;;  %4349 = vst.msk [vmem:[#allocation4 + $0x66] sm:$0x1] %vm3983_vm5, %v4329_v54  ;;  %v4263_v60 = vrot.slane %v9473_v62, 1  ;;  %v4335_v45 = vrot.slane %v9476_v8, 1  ;;  %4421 = vst.msk [vmem:[#allocation4 + $0x67] sm:$0x1] %vm3983_vm5, %v4401_v59  ;;  %v4048_v14 = vmax.f32 %v9535_v3, %v4047_v49 }
 0x27c   : > { %v4473_v20 = vmax.f32 %v4471_v41, %v4472_v22  ;;  %v4407_v5 = vrot.slane %v9478_v40, 1  ;;  %v4192_v31 = vmax.f32 %v9539_v43, %v4191_v11  ;;  %v4479_v53 = vrot.slane %v9484_v2, 1  ;;  %3990 = vst.msk [vmem:[#allocation4 + $0x71] sm:$0x1] %vm3983_vm5, %v3974_v4  ;;  %4134 = vst.msk [vmem:[#allocation4 + $0x73] sm:$0x1] %vm3983_vm5, %v4120_v15 }
 0x27d   : > { %v4264_v50 = vmax.f32 %v9473_v62, %v4263_v60  ;;  %v4336_v63 = vmax.f32 %v9476_v8, %v4335_v45  ;;  %v9661_v55 = vld [vmem:[#allocation4 + $0x51] sm:$0xff]  ;;  %4062 = vst.msk [vmem:[#allocation4 + $0x72] sm:$0x1] %vm3983_vm5, %v4048_v14  ;;  %v3980_v3 = vrot.slane %v9575_v12, 1  ;;  %v4054_v46 = vrot.slane %v9577_v47, 1  ;;  %v7402_v13 = vld [vmem:[%s9911_s3 + $0x10] sm:$0xff] }
 0x27e   : > { %4493 = vst.msk [vmem:[#allocation4 + $0x68] sm:$0x1] %vm3983_vm5, %v4473_v20  ;;  %v4408_v58 = vmax.f32 %v9478_v40, %v4407_v5  ;;  %v4126_v62 = vrot.slane %v9584_v18, 1  ;;  %7273 = vmatmul.mubr.msk.f32.gmra.mxu1 %vm3880_vm3, %v9661_v55  ;;  %7328 = vmatprep.mubr.msk.f32.mxu0 %vm3880_vm3, %v9661_v55  ;;  %4206 = vst.msk [vmem:[#allocation4 + $0x74] sm:$0x1] %vm3983_vm5, %v4192_v31  ;;  %v4480_v8 = vmax.f32 %v9484_v2, %v4479_v53  ;;  %v4501_v29 = vld [vmem:[#allocation4 + $0x50] sm:$0xff] }
 0x27f   : > { %4278 = vst.msk [vmem:[#allocation4 + $0x75] sm:$0x1] %vm3983_vm5, %v4264_v50  ;;  %4350 = vst.msk [vmem:[#allocation4 + $0x76] sm:$0x1] %vm3983_vm5, %v4336_v63  ;;  %v4198_v40 = vrot.slane %v9590_v10, 1  ;;  %v4270_v43 = vrot.slane %v9557_v21, 1  ;;  %v3981_v0 = vmax.f32 %v9575_v12, %v3980_v3  ;;  %v4055_v16 = vmax.f32 %v9577_v47, %v4054_v46 }
 0x280   : > { %v4342_v57 = vrot.slane %v9561_v28, 1  ;;  %4422 = vst.msk [vmem:[#allocation4 + $0x77] sm:$0x1] %vm3983_vm5, %v4408_v58  ;;  %v4127_v39 = vmax.f32 %v9584_v18, %v4126_v62  ;;  %v4414_v23 = vrot.slane %v9564_v44, 1  ;;  %4494 = vst.msk [vmem:[#allocation4 + $0x78] sm:$0x1] %vm3983_vm5, %v4480_v8 }
 0x281   : > { %v4199_v2 = vmax.f32 %v9590_v10, %v4198_v40  ;;  %v4271_v9 = vmax.f32 %v9557_v21, %v4270_v43  ;;  %v4486_v33 = vrot.slane %v9568_v27, 1  ;;  %3991 = vst.msk [vmem:[#allocation4 + $0x81] sm:$0x1] %vm3983_vm5, %v3981_v0  ;;  %4063 = vst.msk [vmem:[#allocation4 + $0x82] sm:$0x1] %vm3983_vm5, %v4055_v16  ;;  %v6377_v10 = vld [vmem:[%s9911_s3 + $0x18] sm:$0xff] }
 0x282   : > { %v4343_v1 = vmax.f32 %v9561_v28, %v4342_v57  ;;  %4135 = vst.msk [vmem:[#allocation4 + $0x83] sm:$0x1] %vm3983_vm5, %v4127_v39  ;;  %v4415_v12 = vmax.f32 %v9564_v44, %v4414_v23  ;;  %v4496_v28 = vld [vmem:[#allocation4] sm:$0xff]  ;;  %v6395_v41 = vld [vmem:[%s9911_s3 + $0x28] sm:$0xff]  ;;  %v6413_v59 = vld [vmem:[%s9911_s3 + $0x38] sm:$0xff] }
 0x283   : > { %4207 = vst.msk [vmem:[#allocation4 + $0x84] sm:$0x1] %vm3983_vm5, %v4199_v2  ;;  %4279 = vst.msk [vmem:[#allocation4 + $0x85] sm:$0x1] %vm3983_vm5, %v4271_v9  ;;  %v4487_v21 = vmax.f32 %v9568_v27, %v4486_v33  ;;  %v4497_v27 = vld [vmem:[#allocation4 + $0x10] sm:$0xff]  ;;  %v4502_v37 = vld [vmem:[#allocation4 + $0x60] sm:$0xff] }
 0x284   : > { %4351 = vst.msk [vmem:[#allocation4 + $0x86] sm:$0x1] %vm3983_vm5, %v4343_v1  ;;  %4423 = vst.msk [vmem:[#allocation4 + $0x87] sm:$0x1] %vm3983_vm5, %v4415_v12  ;;  %v4773_v51 = vld [vmem:[#allocation4 + $0x2] sm:$0xff]  ;;  %v4776_v30 = vld [vmem:[#allocation4 + $0x32] sm:$0xff] }
 0x285   : > { %v9699_v47 = vld [vmem:[#allocation4 + $0x61] sm:$0xff]  ;;  %4495 = vst.msk [vmem:[#allocation4 + $0x88] sm:$0x1] %vm3983_vm5, %v4487_v21  ;;  %v4778_v26 = vld [vmem:[#allocation4 + $0x52] sm:$0xff] }
 0x286   : > { %7275 = vmatprep.mubr.msk.f32.mxu1 %vm3880_vm3, %v9699_v47  ;;  %7329 = vmatmul.mubr.msk.f32.gmra.mxu0 %vm3880_vm3, %v9699_v47  ;;  %v4775_v38 = vld [vmem:[#allocation4 + $0x22] sm:$0xff]  ;;  %v5663_v22 = vld [vmem:[#allocation4 + $0x92] sm:$0xff] }
 0x287   : > { %v9707_v44 = vld [vmem:[#allocation4 + $0x71] sm:$0xff]  ;;  %v4777_v25 = vld [vmem:[#allocation4 + $0x42] sm:$0xff] }
 0x288   : > { %7276 = vmatmul.mubr.msk.f32.gmra.mxu1 %vm3880_vm3, %v9707_v44  ;;  %7331 = vmatprep.mubr.msk.f32.mxu0 %vm3880_vm3, %v9707_v44  ;;  %v4503_v52 = vld [vmem:[#allocation4 + $0x70] sm:$0xff]  ;;  %v4779_v7 = vld [vmem:[#allocation4 + $0x62] sm:$0xff] }
 0x289   : > { %7280 = vmatprep.mubr.msk.f32.mxu1 %vm3880_vm3, %v4496_v28  ;;  %v4780_v24 = vld [vmem:[#allocation4 + $0x72] sm:$0xff] }
 0x28a   : > { %v5516_v34 = vld [vmem:[#allocation4 + $0x91] sm:$0xff] }
 0x28b   : > { %v5368_v35 = vld [vmem:[#allocation4 + $0x80] sm:$0xff] }
 0x28c   : > { %v9714_v18 = vld [vmem:[#allocation4 + $0x81] sm:$0xff]  ;;  %7281 = vmatmul.mubr.msk.f32.vlgmr.msra.gmra.mxu1 %vm3880_vm3, %v4497_v27 }
 0x28d   : > { %7332 = vmatmul.mubr.msk.f32.gmra.mxu0 %vm3880_vm3, %v9714_v18  ;;  %7293 = vmatpush3.msra.mxu1 %v7402_v13  ;;  %v5662_v54 = vld [vmem:[#allocation4 + $0x82] sm:$0xff] }
 0x28e   : > { %7283 = vmatprep.mubr.msk.f32.mxu1 %vm3880_vm3, %v4498_v48  ;;  %7350 = vmatprep.mubr.msk.f32.mxu0 %vm3880_vm3, %v4498_v48 }
 0x28f   : > { %7306 = vmatprep.subr.mxu1 %v6377_v10 }
 0x290   : > { %7284 = vmatmul.mubr.msk.f32.gmra.mxu1 %vm3880_vm3, %v4499_v19 }
 0x291   : > { %7351 = vmatmul.mubr.msk.f32.vlgmr.msra.gmra.mxu0 %vm3880_vm3, %v4499_v19  ;;  %7286 = vmatprep.mubr.msk.f32.mxu1 %vm3880_vm3, %v4500_v36 }
 0x292   : > { %7353 = vmatprep.mubr.msk.f32.mxu0 %vm3880_vm3, %v4500_v36  ;;  %7377 = vmatpush3.msra.mxu0 %v9452_v56  ;;  %v5369_v56 = vld [vmem:[#allocation4 + $0x90] sm:$0xff] }
 0x294   : > { %7287 = vmatmul.mubr.msk.f32.gmra.mxu1 %vm3880_vm3, %v4501_v29 }
 0x295   : > { %7354 = vmatmul.mubr.msk.f32.gmra.mxu0 %vm3880_vm3, %v4501_v29  ;;  %7289 = vmatprep.mubr.msk.f32.mxu1 %vm3880_vm3, %v4502_v37 }
 0x296   : > { %7356 = vmatprep.mubr.msk.f32.mxu0 %vm3880_vm3, %v4502_v37 }
 0x298   : > { %7290 = vmatmul.mubr.msk.f32.gmra.mxu1 %vm3880_vm3, %v4503_v52 }
 0x299   : > { %7357 = vmatmul.mubr.msk.f32.gmra.mxu0 %vm3880_vm3, %v4503_v52  ;;  %7294 = vmatprep.mubr.msk.f32.mxu1 %vm3880_vm3, %v4773_v51 }
 0x29a   : > { %7359 = vmatprep.mubr.msk.f32.mxu0 %vm3880_vm3, %v5368_v35 }
 0x29c   : > { %7295 = vmatmul.mubr.msk.f32.vlgmr.msra.gmra.mxu1 %vm3880_vm3, %v4774_v17 }
 0x29d   : > { %7360 = vmatmul.mubr.msk.f32.gmra.mxu0 %vm3880_vm3, %v5369_v56  ;;  %7307 = vmatpush3.msra.mxu1 %v6377_v10 }
 0x29e   : > { %7297 = vmatprep.mubr.msk.f32.mxu1 %vm3880_vm3, %v4775_v38  ;;  %7378 = vmatprep.mubr.msk.f32.mxu0 %vm3880_vm3, %v4775_v38 }
 0x29f   : > { %7334 = vmatprep.subr.mxu1 %v6395_v41 }
 0x2a0   : > { %7298 = vmatmul.mubr.msk.f32.gmra.mxu1 %vm3880_vm3, %v4776_v30 }
 0x2a1   : > { %7379 = vmatmul.mubr.msk.f32.vlgmr.msra.gmra.mxu0 %vm3880_vm3, %v4776_v30  ;;  %7300 = vmatprep.mubr.msk.f32.mxu1 %vm3880_vm3, %v4777_v25 }
 0x2a2   : > { %7381 = vmatprep.mubr.msk.f32.mxu0 %vm3880_vm3, %v4777_v25 }
 0x2a4   : > { %7301 = vmatmul.mubr.msk.f32.gmra.mxu1 %vm3880_vm3, %v4778_v26 }
 0x2a5   : > { %7382 = vmatmul.mubr.msk.f32.gmra.mxu0 %vm3880_vm3, %v4778_v26  ;;  %7303 = vmatprep.mubr.msk.f32.mxu1 %vm3880_vm3, %v4779_v7 }
 0x2a6   : > { %7384 = vmatprep.mubr.msk.f32.mxu0 %vm3880_vm3, %v4779_v7 }
 0x2a8   : > { %7304 = vmatmul.mubr.msk.f32.gmra.mxu1 %vm3880_vm3, %v4780_v24 }
 0x2a9   : > { %7385 = vmatmul.mubr.msk.f32.gmra.mxu0 %vm3880_vm3, %v4780_v24  ;;  %7308 = vmatprep.mubr.msk.f32.mxu1 %vm3880_vm3, %v4497_v27 }
 0x2aa   : > { %7387 = vmatprep.mubr.msk.f32.mxu0 %vm3880_vm3, %v5662_v54 }
 0x2ac   : > { %7309 = vmatmul.mubr.msk.f32.vlgmr.msra.gmra.mxu1 %vm3880_vm3, %v4498_v48 }
 0x2ad   : > { %7388 = vmatmul.mubr.msk.f32.gmra.mxu0 %vm3880_vm3, %v5663_v22  ;;  %7335 = vmatpush3.msra.mxu1 %v6395_v41 }
 0x2ae   : > { %7311 = vmatprep.mubr.msk.f32.mxu1 %vm3880_vm3, %v4499_v19  ;;  %7362 = vmatprep.subr.mxu1 %v6413_v59 }
 0x2b0   : > { %7312 = vmatmul.mubr.msk.f32.gmra.mxu1 %vm3880_vm3, %v4500_v36 }
 0x2b1   : > { %7314 = vmatprep.mubr.msk.f32.mxu1 %vm3880_vm3, %v4501_v29 }
 0x2b4   : > { %7315 = vmatmul.mubr.msk.f32.gmra.mxu1 %vm3880_vm3, %v4502_v37 }
 0x2b5   : > { %7317 = vmatprep.mubr.msk.f32.mxu1 %vm3880_vm3, %v4503_v52 }
 0x2b8   : > { %7318 = vmatmul.mubr.msk.f32.gmra.mxu1 %vm3880_vm3, %v5368_v35 }
 0x2b9   : > { %7336 = vmatprep.mubr.msk.f32.mxu1 %vm3880_vm3, %v4774_v17 }
 0x2bc   : > { %7337 = vmatmul.mubr.msk.f32.vlgmr.msra.gmra.mxu1 %vm3880_vm3, %v4775_v38 }
 0x2bd   : > { %7363 = vmatpush3.msra.mxu1 %v6413_v59  ;;  %7339 = vmatprep.mubr.msk.f32.mxu1 %vm3880_vm3, %v4776_v30 }
 0x2c0   : > { %7340 = vmatmul.mubr.msk.f32.gmra.mxu1 %vm3880_vm3, %v4777_v25 }
 0x2c1   : > { %7342 = vmatprep.mubr.msk.f32.mxu1 %vm3880_vm3, %v4778_v26 }
 0x2c4   : > { %7343 = vmatmul.mubr.msk.f32.gmra.mxu1 %vm3880_vm3, %v4779_v7 }
 0x2c5   : > { %7345 = vmatprep.mubr.msk.f32.mxu1 %vm3880_vm3, %v4780_v24 }
 0x2c8   : > { %7346 = vmatmul.mubr.msk.f32.gmra.mxu1 %vm3880_vm3, %v5662_v54 }
 0x2c9   : > { %7364 = vmatprep.mubr.msk.f32.mxu1 %vm3880_vm3, %v9447_v6 }
 0x2cc   : > { %7365 = vmatmul.mubr.msk.f32.vlgmr.msra.gmra.mxu1 %vm3880_vm3, %v9542_v61 }
 0x2cd   : > { %7367 = vmatprep.mubr.msk.f32.mxu1 %vm3880_vm3, %v9633_v32 }
 0x2d0   : > { %7368 = vmatmul.mubr.msk.f32.gmra.mxu1 %vm3880_vm3, %v9661_v55 }
 0x2d1   : > { %7370 = vmatprep.mubr.msk.f32.mxu1 %vm3880_vm3, %v9699_v47 }
 0x2d4   : > { %7371 = vmatmul.mubr.msk.f32.gmra.mxu1 %vm3880_vm3, %v9707_v44  ;;  %v7268_v6 = vpop.f32.mrf.mxu1 }
 0x2d5   : > { %7373 = vmatprep.mubr.msk.f32.mxu1 %vm3880_vm3, %v9714_v18 }
 0x2d6   : > { %v4605_v61 = vpop.f32.mrf.mxu1 }
 0x2d8   : > { %7374 = vmatmul.mubr.msk.f32.gmra.mxu1 %vm3880_vm3, %v5516_v34 }
 0x30d   : > { %v7324_v11 = vpop.f32.mrf.mxu0 }
 0x30f   : > { %v9799_v4 = vpop.f32.mrf.mxu0 }
 0x322   : > { %v7271_v49 = vpop.f32.mrf.mxu1 }
 0x324   : > { %v4615_v42 = vpop.f32.mrf.mxu1 }
 0x33b   : > { %v9801_v15 = vpop.f32.mrf.mxu0 }
 0x33d   : > { %v9803_v50 = vpop.f32.mrf.mxu0 }
 0x33e   : > { %v7274_v32 = vpop.f32.mrf.mxu1 }
 0x340   : > { %v9793_v20 = vpop.f32.mrf.mxu1 }
 0x346   : > { %v9805_v53 = vpop.f32.mrf.mxu0 }
 0x348   : > { %v9795_v60 = vpop.f32.mrf.mxu1  ;;  %v9807_v3 = vpop.f32.mrf.mxu0 }
 0x34a   : > { %v9797_v45 = vpop.f32.mrf.mxu1 }
 0x34c   : > { %v7282_v14 = vpop.f32.mrf.mxu1 }
 0x34d   : > { %v9809_v62 = vpop.f32.mrf.mxu0  ;;  %v4740_v51 = vadd.f32 %v7282_v14, %v7268_v6 }
 0x34e   : > { %v4734_v5 = vpop.f32.mrf.mxu1 }
 0x34f   : > { %v9811_v43 = vpop.f32.mrf.mxu0  ;;  %v4735_v56 = vadd.f32 %v4734_v5, %v4605_v61 }
 0x350   : > { %v7285_v31 = vpop.f32.mrf.mxu1  ;;  %10129 = vst [vmem:[#allocation39_spill] sm:$0xff] %v9811_v43 }
 0x351   : > { %v7352_v16 = vpop.f32.mrf.mxu0  ;;  %v4750_v38 = vadd.f32 %v7285_v31, %v7271_v49 }
 0x352   : > { %v4744_v63 = vpop.f32.mrf.mxu1 }
 0x353   : > { %v9813_v2 = vpop.f32.mrf.mxu0  ;;  %v4745_v24 = vadd.f32 %v4744_v63, %v4615_v42 }
 0x354   : > { %v7288_v55 = vpop.f32.mrf.mxu1 }
 0x355   : > { %v9815_v33 = vpop.f32.mrf.mxu0  ;;  %v4760_v59 = vadd.f32 %v7288_v55, %v7274_v32 }
 0x356   : > { %v4754_v58 = vpop.f32.mrf.mxu1 }
 0x357   : > { %v9817_v47 = vpop.f32.mrf.mxu0  ;;  %v4755_v49 = vadd.f32 %v4754_v58, %v9793_v20 }
 0x358   : > { %v7291_v46 = vpop.f32.mrf.mxu1 }
 0x359   : > { %v9819_v27 = vpop.f32.mrf.mxu0  ;;  %v4770_v31 = vadd.f32 %v7291_v46, %v9795_v60 }
 0x35a   : > { %v4764_v8 = vpop.f32.mrf.mxu1  ;;  %10130 = vst [vmem:[#allocation40_spill] sm:$0xff] %v9819_v27 }
 0x35b   : > { %v9821_v48 = vpop.f32.mrf.mxu0  ;;  %v4765_v55 = vadd.f32 %v4764_v8, %v9797_v45 }
 0x35c   : > { %v7296_v40 = vpop.f32.mrf.mxu1  ;;  %10131 = vst [vmem:[#allocation41_spill] sm:$0xff] %v9821_v48 }
 0x35d   : > { %v9823_v36 = vpop.f32.mrf.mxu0  ;;  %v4913_v17 = vadd.f32 %v7296_v40, %v4740_v51 }
 0x35e   : > { %v4873_v57 = vpop.f32.mrf.mxu1  ;;  %10132 = vst [vmem:[#allocation42_spill] sm:$0xff] %v9823_v36 }
 0x35f   : > { %v9825_v52 = vpop.f32.mrf.mxu0  ;;  %v4912_v30 = vadd.f32 %v4873_v57, %v4735_v56 }
 0x360   : > { %v7299_v0 = vpop.f32.mrf.mxu1  ;;  %10133 = vst [vmem:[#allocation43_spill] sm:$0xff] %v9825_v52 }
 0x361   : > { %v7380_v26 = vpop.f32.mrf.mxu0  ;;  %v4915_v54 = vadd.f32 %v7299_v0, %v4750_v38  ;;  %v10135_v56 = vld [vmem:[#allocation40_spill] sm:$0xff] }
 0x362   : > { %v4883_v39 = vpop.f32.mrf.mxu1 }
 0x363   : > { %v4914_v36 = vadd.f32 %v4883_v39, %v4745_v24  ;;  %v5756_v14 = vpop.f32.mrf.mxu0 }
 0x364   : > { %v7302_v23 = vpop.f32.mrf.mxu1 }
 0x365   : > { %v4917_v6 = vadd.f32 %v7302_v23, %v4760_v59  ;;  %v7383_v0 = vpop.f32.mrf.mxu0 }
 0x366   : > { %v4893_v9 = vpop.f32.mrf.mxu1 }
 0x367   : > { %v4916_v57 = vadd.f32 %v4893_v9, %v4755_v49  ;;  %v6431_v9 = vld [vmem:[%s9912_s4] ss:$0 sm:$0xff] }
 0x368   : > { %v7305_v1 = vpop.f32.mrf.mxu1 }
 0x36a   : > { %v4903_v12 = vpop.f32.mrf.mxu1 }
 0x36c   : > { %v7310_v21 = vpop.f32.mrf.mxu1 }
 0x36d   : > { %v5060_v25 = vadd.f32 %v7310_v21, %v4913_v17 }
 0x36e   : > { %v5020_v28 = vpop.f32.mrf.mxu1 }
 0x36f   : > { %v5059_v22 = vadd.f32 %v5020_v28, %v4912_v30  ;;  %v5207_v27 = vadd.f32 %v7324_v11, %v5060_v25  ;;  %v4919_v11 = vadd.f32 %v7305_v1, %v4770_v31 }
 0x370   : > { %v7313_v44 = vpop.f32.mrf.mxu1 }
 0x371   : > { %v5062_v48 = vadd.f32 %v7313_v44, %v4915_v54  ;;  %v5206_v5 = vadd.f32 %v9799_v4, %v5059_v22  ;;  %v4918_v4 = vadd.f32 %v4903_v12, %v4765_v55  ;;  %v10138_v55 = vld [vmem:[#allocation43_spill] sm:$0xff] }
 0x372   : > { %v5030_v18 = vpop.f32.mrf.mxu1 }
 0x373   : > { %v5061_v43 = vadd.f32 %v5030_v18, %v4914_v36  ;;  %v5209_v32 = vadd.f32 %v9801_v15, %v5062_v48  ;;  %v5766_v18 = vpop.f32.mrf.mxu0 }
 0x374   : > { %v7316_v10 = vpop.f32.mrf.mxu1 }
 0x375   : > { %v5064_v40 = vadd.f32 %v7316_v10, %v4917_v6  ;;  %v5208_v21 = vadd.f32 %v9803_v50, %v5061_v43  ;;  %v7386_v36 = vpop.f32.mrf.mxu0 }
 0x376   : > { %v5040_v13 = vpop.f32.mrf.mxu1 }
 0x377   : > { %v5063_v44 = vadd.f32 %v5040_v13, %v4916_v57  ;;  %v5211_v60 = vadd.f32 %v9805_v53, %v5064_v40  ;;  %v5776_v22 = vpop.f32.mrf.mxu0 }
 0x378   : > { %v7319_v19 = vpop.f32.mrf.mxu1 }
 0x379   : > { %v5066_v20 = vadd.f32 %v7319_v19, %v4919_v11  ;;  %v5210_v12 = vadd.f32 %v9807_v3, %v5063_v44  ;;  %v7389_v40 = vpop.f32.mrf.mxu0 }
 0x37a   : > { %v5050_v29 = vpop.f32.mrf.mxu1 }
 0x37b   : > { %v5065_v45 = vadd.f32 %v5050_v29, %v4918_v4  ;;  %v5213_v53 = vadd.f32 %v9809_v62, %v5066_v20  ;;  %v5786_v44 = vpop.f32.mrf.mxu0 }
 0x37c   : > { %v7338_v37 = vpop.f32.mrf.mxu1 }
 0x37d   : > { %v5354_v61 = vadd.f32 %v7338_v37, %v5207_v27  ;;  %v10134_v37 = vld [vmem:[#allocation39_spill] sm:$0xff] }
 0x37e   : > { %v5314_v35 = vpop.f32.mrf.mxu1  ;;  %v5212_v51 = vadd.f32 %v10134_v37, %v5065_v45 }
 0x37f   : > { %v5353_v63 = vadd.f32 %v5314_v35, %v5206_v5  ;;  %v5502_v28 = vadd.f32 %v7352_v16, %v5354_v61  ;;  %v10137_v61 = vld [vmem:[#allocation42_spill] sm:$0xff] }
 0x380   : > { %v7341_v41 = vpop.f32.mrf.mxu1 }
 0x381   : > { %v5356_v23 = vadd.f32 %v7341_v41, %v5209_v32  ;;  %v5501_v15 = vadd.f32 %v9813_v2, %v5353_v63 }
 0x382   : > { %v5324_v7 = vpop.f32.mrf.mxu1 }
 0x383   : > { %v5355_v46 = vadd.f32 %v5324_v7, %v5208_v21  ;;  %v5504_v16 = vadd.f32 %v9815_v33, %v5356_v23 }
 0x384   : > { %v7344_v34 = vpop.f32.mrf.mxu1 }
 0x385   : > { %v5358_v8 = vadd.f32 %v7344_v34, %v5211_v60  ;;  %v5503_v19 = vadd.f32 %v9817_v47, %v5355_v46  ;;  %v10136_v47 = vld [vmem:[#allocation41_spill] sm:$0xff] }
 0x386   : > { %v5334_v52 = vpop.f32.mrf.mxu1 }
 0x387   : > { %v5357_v29 = vadd.f32 %v5334_v52, %v5210_v12  ;;  %v5506_v17 = vadd.f32 %v10135_v56, %v5358_v8 }
 0x388   : > { %v7347_v42 = vpop.f32.mrf.mxu1 }
 0x389   : > { %v5360_v41 = vadd.f32 %v7347_v42, %v5213_v53  ;;  %v5505_v52 = vadd.f32 %v10136_v47, %v5357_v29 }
 0x38a   : > { %v5344_v39 = vpop.f32.mrf.mxu1 }
 0x38b   : > { %v5359_v3 = vadd.f32 %v5344_v39, %v5212_v51  ;;  %v5508_v5 = vadd.f32 %v10137_v61, %v5360_v41 }
 0x38c   : > { %v7366_v58 = vpop.f32.mrf.mxu1 }
 0x38d   : > { %v5649_v27 = vadd.f32 %v7366_v58, %v5502_v28  ;;  %v5507_v57 = vadd.f32 %v10138_v55, %v5359_v3 }
 0x38e   : > { %v5609_v1 = vpop.f32.mrf.mxu1 }
 0x38f   : > { %v5796_v50 = vadd.f32 %v7380_v26, %v5649_v27  ;;  %v5648_v43 = vadd.f32 %v5609_v1, %v5501_v15 }
 0x390   : > { %v7369_v10 = vpop.f32.mrf.mxu1 }
 0x391   : > { %v5811_v48 = vadd.f32 %v6431_v9, %v5796_v50  ;;  %v5795_v13 = vadd.f32 %v5756_v14, %v5648_v43  ;;  %v5651_v2 = vadd.f32 %v7369_v10, %v5504_v16 }
 0x392   : > { %v5619_v35 = vpop.f32.mrf.mxu1 }
 0x393   : > { %v5810_v38 = vadd.f32 %v6431_v9, %v5795_v13  ;;  %v5798_v33 = vadd.f32 %v7383_v0, %v5651_v2  ;;  %v5650_v30 = vadd.f32 %v5619_v35, %v5503_v19  ;;  %v5819_v25 = vmax.f32 %v5811_v48, 0.0 }
 0x394   : > { %v7372_v62 = vpop.f32.mrf.mxu1 }
 0x395   : > { %v5818_v26 = vmax.f32 %v5810_v38, 0.0  ;;  %v5813_v7 = vadd.f32 %v6431_v9, %v5798_v33  ;;  %v5797_v24 = vadd.f32 %v5766_v18, %v5650_v30  ;;  %v5653_v54 = vadd.f32 %v7372_v62, %v5506_v17 }
 0x396   : > { %v5629_v59 = vpop.f32.mrf.mxu1 }
 0x397   : > { %v5826_v34 = vmax.f32 %v5818_v26, %v5819_v25  ;;  %v5812_v6 = vadd.f32 %v6431_v9, %v5797_v24  ;;  %v5800_v14 = vadd.f32 %v7386_v36, %v5653_v54  ;;  %v5652_v49 = vadd.f32 %v5629_v59, %v5505_v52 }
 0x398   : > { %v7375_v31 = vpop.f32.mrf.mxu1  ;;  %v5821_v42 = vmax.f32 %v5813_v7, 0.0 }
 0x399   : > { %5831 = vst.msk [vmem:[#allocation5] sm:$0xff] %vm5830_vm6, %v5826_v34  ;;  %v5820_v63 = vmax.f32 %v5812_v6, 0.0  ;;  %v5655_v32 = vadd.f32 %v7375_v31, %v5508_v5  ;;  %v5815_v11 = vadd.f32 %v6431_v9, %v5800_v14  ;;  %v5799_v0 = vadd.f32 %v5776_v22, %v5652_v49 }
 0x39a   : > { %v5639_v39 = vpop.f32.mrf.mxu1 }
 0x39b   : > { %v5827_v23 = vmax.f32 %v5820_v63, %v5821_v42  ;;  %v5802_v21 = vadd.f32 %v7389_v40, %v5655_v32  ;;  %v5654_v28 = vadd.f32 %v5639_v39, %v5507_v57  ;;  %v5814_v4 = vadd.f32 %v6431_v9, %v5799_v0 }
 0x39c   : > { %v5823_v58 = vmax.f32 %v5815_v11, 0.0 }
 0x39d   : > { %5832 = vst.msk [vmem:[#allocation5 + $0x8] sm:$0xff] %vm5830_vm6, %v5827_v23  ;;  %v5817_v20 = vadd.f32 %v6431_v9, %v5802_v21  ;;  %v5801_v60 = vadd.f32 %v5786_v44, %v5654_v28  ;;  %v5822_v46 = vmax.f32 %v5814_v4, 0.0 }
 0x39f   : > { %v5825_v27 = vmax.f32 %v5817_v20, 0.0  ;;  %v5816_v15 = vadd.f32 %v6431_v9, %v5801_v60  ;;  %v5828_v1 = vmax.f32 %v5822_v46, %v5823_v58 }
 0x3a0   : > { %v5835_v18 = vld [vmem:[#allocation5] sm:$0x3]  ;;  %v5873_v45 = vld [vmem:[#allocation5 + $0x2] sm:$0x3]  ;;  %v5909_v8 = vld [vmem:[#allocation5 + $0x4] sm:$0x3] }
 0x3a1   : > { %v5840_v50 = vsel %vm5839_vm7, %v5835_v18, -inf  ;;  %v5877_v43 = vsel %vm5839_vm7, %v5873_v45, -inf  ;;  %v5913_v16 = vsel %vm5839_vm7, %v5909_v8, -inf  ;;  %v5945_v12 = vld [vmem:[#allocation5 + $0x6] sm:$0x3]  ;;  %v5824_v53 = vmax.f32 %v5816_v15, 0.0 }
 0x3a2   : > { %v5841_v10 = vrot.slane %v5840_v50, 4  ;;  %v5878_v48 = vrot.slane %v5877_v43, 4  ;;  %v5914_v13 = vrot.slane %v5913_v16, 4  ;;  %v5949_v2 = vsel %vm5839_vm7, %v5945_v12, -inf  ;;  %5833 = vst.msk [vmem:[#allocation5 + $0x10] sm:$0xff] %vm5830_vm6, %v5828_v1 }
 0x3a3   : > { %v5950_v9 = vrot.slane %v5949_v2, 4  ;;  %v5829_v19 = vmax.f32 %v5824_v53, %v5825_v27 }
 0x3a4   : > { %v5842_v36 = vmax.f32 %v5840_v50, %v5841_v10  ;;  %v5879_v29 = vmax.f32 %v5877_v43, %v5878_v48  ;;  %v5915_v37 = vmax.f32 %v5913_v16, %v5914_v13  ;;  %v5836_v51 = vld [vmem:[#allocation5 + $0x8] sm:$0x3]  ;;  %v5874_v35 = vld [vmem:[#allocation5 + $0xa] sm:$0x3]  ;;  %v5910_v56 = vld [vmem:[#allocation5 + $0xc] sm:$0x3] }
 0x3a5   : > { %v5951_v17 = vmax.f32 %v5949_v2, %v5950_v9  ;;  %v5847_v41 = vsel %vm5839_vm7, %v5836_v51, -inf  ;;  %v5884_v38 = vsel %vm5839_vm7, %v5874_v35, -inf  ;;  %v5920_v33 = vsel %vm5839_vm7, %v5910_v56, -inf  ;;  %v5946_v30 = vld [vmem:[#allocation5 + $0xe] sm:$0x3]  ;;  %5834 = vst.msk [vmem:[#allocation5 + $0x18] sm:$0xff] %vm5830_vm6, %v5829_v19 }
 0x3a6   : > { %v5843_v3 = vrot.slane %v5842_v36, 2  ;;  %v5880_v25 = vrot.slane %v5879_v29, 2  ;;  %v5916_v62 = vrot.slane %v5915_v37, 2  ;;  %v5848_v26 = vrot.slane %v5847_v41, 4 }
 0x3a7   : > { %v5952_v7 = vrot.slane %v5951_v17, 2  ;;  %v5885_v24 = vrot.slane %v5884_v38, 4  ;;  %v5921_v54 = vrot.slane %v5920_v33, 4  ;;  %v5956_v22 = vsel %vm5839_vm7, %v5946_v30, -inf }
 0x3a8   : > { %v5844_v47 = vmax.f32 %v5842_v36, %v5843_v3  ;;  %v5881_v52 = vmax.f32 %v5879_v29, %v5880_v25  ;;  %v5917_v59 = vmax.f32 %v5915_v37, %v5916_v62  ;;  %v5849_v34 = vmax.f32 %v5847_v41, %v5848_v26 }
 0x3a9   : > { %v5953_v6 = vmax.f32 %v5951_v17, %v5952_v7  ;;  %v5886_v14 = vmax.f32 %v5884_v38, %v5885_v24  ;;  %v5922_v61 = vmax.f32 %v5920_v33, %v5921_v54  ;;  %v5957_v5 = vrot.slane %v5956_v22, 4  ;;  %v5837_v49 = vld [vmem:[#allocation5 + $0x10] sm:$0x3]  ;;  %v5875_v32 = vld [vmem:[#allocation5 + $0x12] sm:$0x3] }
 0x3aa   : > { %v5845_v31 = vrot.slane %v5844_v47, 1  ;;  %v5882_v40 = vrot.slane %v5881_v52, 1  ;;  %v5918_v42 = vrot.slane %v5917_v59, 1  ;;  %v5850_v63 = vrot.slane %v5849_v34, 2  ;;  %v5911_v39 = vld [vmem:[#allocation5 + $0x14] sm:$0x3] }
 0x3ab   : > { %v5954_v55 = vrot.slane %v5953_v6, 1  ;;  %v5887_v57 = vrot.slane %v5886_v14, 2  ;;  %v5923_v11 = vrot.slane %v5922_v61, 2  ;;  %v5958_v0 = vmax.f32 %v5956_v22, %v5957_v5  ;;  %v5947_v46 = vld [vmem:[#allocation5 + $0x16] sm:$0x3] }
 0x3ac   : > { %v5846_v23 = vmax.f32 %v5844_v47, %v5845_v31  ;;  %v5883_v21 = vmax.f32 %v5881_v52, %v5882_v40  ;;  %v5919_v28 = vmax.f32 %v5917_v59, %v5918_v42  ;;  %v5851_v4 = vmax.f32 %v5849_v34, %v5850_v63  ;;  %v5838_v16 = vld [vmem:[#allocation5 + $0x18] sm:$0x3]  ;;  %v5876_v13 = vld [vmem:[#allocation5 + $0x1a] sm:$0x3]  ;;  %v5912_v56 = vld [vmem:[#allocation5 + $0x1c] sm:$0x3] }
 0x3ad   : > { %v5955_v44 = vmax.f32 %v5953_v6, %v5954_v55  ;;  %v5888_v20 = vmax.f32 %v5886_v14, %v5887_v57  ;;  %v5924_v60 = vmax.f32 %v5922_v61, %v5923_v11  ;;  %v5959_v58 = vrot.slane %v5958_v0, 2  ;;  %v5948_v17 = vld [vmem:[#allocation5 + $0x1e] sm:$0x3] }
 0x3ae   : > { %5869 = vst.msk [vmem:[%s9863_s25] sm:$0x1] %vm5868_vm8, %v5846_v23  ;;  %5905 = vst.msk [vmem:[%s9863_s25 + $0x1] sm:$0x1] %vm5868_vm8, %v5883_v21  ;;  %v5852_v27 = vrot.slane %v5851_v4, 1  ;;  %v5854_v15 = vsel %vm5839_vm7, %v5837_v49, -inf }
 0x3af   : > { %5941 = vst.msk [vmem:[%s9863_s25 + $0x2] sm:$0x1] %vm5868_vm8, %v5919_v28  ;;  %v5891_v18 = vsel %vm5839_vm7, %v5875_v32, -inf  ;;  %v5927_v45 = vsel %vm5839_vm7, %v5911_v39, -inf  ;;  %5977 = vst.msk [vmem:[%s9863_s25 + $0x3] sm:$0x1] %vm5868_vm8, %v5955_v44  ;;  %v5960_v50 = vmax.f32 %v5958_v0, %v5959_v58 }
 0x3b0   : > { %v5889_v8 = vrot.slane %v5888_v20, 1  ;;  %v5925_v1 = vrot.slane %v5924_v60, 1  ;;  %v5855_v43 = vrot.slane %v5854_v15, 4  ;;  %v5853_v12 = vmax.f32 %v5851_v4, %v5852_v27 }
 0x3b1   : > { %v5892_v53 = vrot.slane %v5891_v18, 4  ;;  %v5928_v10 = vrot.slane %v5927_v45, 4  ;;  %v5963_v48 = vsel %vm5839_vm7, %v5947_v46, -inf  ;;  %v5961_v19 = vrot.slane %v5960_v50, 1 }
 0x3b2   : > { %v5890_v2 = vmax.f32 %v5888_v20, %v5889_v8  ;;  %v5926_v9 = vmax.f32 %v5924_v60, %v5925_v1  ;;  %v5856_v36 = vmax.f32 %v5854_v15, %v5855_v43  ;;  %5870 = vst.msk [vmem:[%s9863_s25 + $0x4] sm:$0x1] %vm5868_vm8, %v5853_v12  ;;  %v5964_v51 = vrot.slane %v5963_v48, 4 }
 0x3b3   : > { %v5893_v29 = vmax.f32 %v5891_v18, %v5892_v53  ;;  %v5929_v37 = vmax.f32 %v5927_v45, %v5928_v10  ;;  %v5861_v35 = vsel %vm5839_vm7, %v5838_v16, -inf  ;;  %v5962_v41 = vmax.f32 %v5960_v50, %v5961_v19 }
 0x3b4   : > { %5906 = vst.msk [vmem:[%s9863_s25 + $0x5] sm:$0x1] %vm5868_vm8, %v5890_v2  ;;  %5942 = vst.msk [vmem:[%s9863_s25 + $0x6] sm:$0x1] %vm5868_vm8, %v5926_v9  ;;  %v5857_v38 = vrot.slane %v5856_v36, 2  ;;  %v5862_v33 = vrot.slane %v5861_v35, 4  ;;  %v5965_v62 = vmax.f32 %v5963_v48, %v5964_v51 }
 0x3b5   : > { %v5898_v30 = vsel %vm5839_vm7, %v5876_v13, -inf  ;;  %v5894_v3 = vrot.slane %v5893_v29, 2  ;;  %v5930_v25 = vrot.slane %v5929_v37, 2  ;;  %5978 = vst.msk [vmem:[%s9863_s25 + $0x7] sm:$0x1] %vm5868_vm8, %v5962_v41  ;;  %v5934_v54 = vsel %vm5839_vm7, %v5912_v56, -inf }
 0x3b6   : > { %v5899_v26 = vrot.slane %v5898_v30, 4  ;;  %v5858_v7 = vmax.f32 %v5856_v36, %v5857_v38  ;;  %v5863_v24 = vmax.f32 %v5861_v35, %v5862_v33  ;;  %v5970_v22 = vsel %vm5839_vm7, %v5948_v17, -inf }
 0x3b7   : > { %v5895_v47 = vmax.f32 %v5893_v29, %v5894_v3  ;;  %v5931_v52 = vmax.f32 %v5929_v37, %v5930_v25  ;;  %v5966_v59 = vrot.slane %v5965_v62, 2  ;;  %v5935_v61 = vrot.slane %v5934_v54, 4 }
 0x3b8   : > { %v5900_v34 = vmax.f32 %v5898_v30, %v5899_v26  ;;  %v5859_v6 = vrot.slane %v5858_v7, 1  ;;  %v5864_v14 = vrot.slane %v5863_v24, 2  ;;  %v5971_v5 = vrot.slane %v5970_v22, 4 }
 0x3b9   : > { %v5896_v49 = vrot.slane %v5895_v47, 1  ;;  %v5932_v31 = vrot.slane %v5931_v52, 1  ;;  %v5967_v40 = vmax.f32 %v5965_v62, %v5966_v59  ;;  %v5936_v55 = vmax.f32 %v5934_v54, %v5935_v61 }
 0x3ba   : > { %v5901_v42 = vrot.slane %v5900_v34, 2  ;;  %v5860_v63 = vmax.f32 %v5858_v7, %v5859_v6  ;;  %v5865_v32 = vmax.f32 %v5863_v24, %v5864_v14  ;;  %v5972_v57 = vmax.f32 %v5970_v22, %v5971_v5 }
 0x3bb   : > { %v5897_v11 = vmax.f32 %v5895_v47, %v5896_v49  ;;  %v5933_v0 = vmax.f32 %v5931_v52, %v5932_v31  ;;  %v5968_v39 = vrot.slane %v5967_v40, 1  ;;  %v5937_v28 = vrot.slane %v5936_v55, 2 }
 0x3bc   : > { %v5902_v23 = vmax.f32 %v5900_v34, %v5901_v42  ;;  %5871 = vst.msk [vmem:[%s9863_s25 + $0x8] sm:$0x1] %vm5868_vm8, %v5860_v63  ;;  %v5866_v21 = vrot.slane %v5865_v32, 1  ;;  %v5973_v4 = vrot.slane %v5972_v57, 2 }
 0x3bd   : > { %5907 = vst.msk [vmem:[%s9863_s25 + $0x9] sm:$0x1] %vm5868_vm8, %v5897_v11  ;;  %5943 = vst.msk [vmem:[%s9863_s25 + $0xa] sm:$0x1] %vm5868_vm8, %v5933_v0  ;;  %v5969_v44 = vmax.f32 %v5967_v40, %v5968_v39  ;;  %v5938_v58 = vmax.f32 %v5936_v55, %v5937_v28 }
 0x3be   : > { %v5903_v20 = vrot.slane %v5902_v23, 1  ;;  %v5867_v60 = vmax.f32 %v5865_v32, %v5866_v21  ;;  %v5974_v46 = vmax.f32 %v5972_v57, %v5973_v4 }
 0x3bf   : > { %5979 = vst.msk [vmem:[%s9863_s25 + $0xb] sm:$0x1] %vm5868_vm8, %v5969_v44  ;;  %v5939_v15 = vrot.slane %v5938_v58, 1 }
 0x3c0   : > { %v5904_v27 = vmax.f32 %v5902_v23, %v5903_v20  ;;  %5872 = vst.msk [vmem:[%s9863_s25 + $0xc] sm:$0x1] %vm5868_vm8, %v5867_v60  ;;  %v5975_v18 = vrot.slane %v5974_v46, 1 }
 0x3c1   : > { %v5940_v45 = vmax.f32 %v5938_v58, %v5939_v15 }
 0x3c2   : > { %5908 = vst.msk [vmem:[%s9863_s25 + $0xd] sm:$0x1] %vm5868_vm8, %v5904_v27  ;;  %v5976_v8 = vmax.f32 %v5974_v46, %v5975_v18 }
 0x3c3   : > { %5944 = vst.msk [vmem:[%s9863_s25 + $0xe] sm:$0x1] %vm5868_vm8, %v5940_v45 }
 0x3c4   : > { %5980 = vst.msk [vmem:[%s9863_s25 + $0xf] sm:$0x1] %vm5868_vm8, %v5976_v8 }
 0x3c5 PF: > { %s15_s18 = sadd.s32 1, %s7409_s18  }
 0x3c6   : > { %p12_p4 = scmp.ge.s32.totalorder %s15_s18, 4  }
 0x3c8   :  { %14 = sbr.rel (!%p12_p4) target bundleno = 1 (0x1), region = 90 }

</bundles_post_ra>
